<compile_context>
chip_gen: v6e
topology: v6e:2x2x1
jax: 0.10.0
libtpu: 0.0.40
codegen_flags: <defaults>
</compile_context>

<pallas_src>
import functools

import jax
import jax.numpy as jnp
from jax.experimental import pallas as pl
from jax.experimental.pallas import tpu as pltpu

# Hyper-parameters implied by the module.
Z_DIM = 16
IMG_SIZE = 32          # must be divisible by 32 (5 maxpools of stride 2)
FEATURES_G = 8
CPAD = 128             # lane-dense channel padding for all conv outputs


def _round_up(x, m):
    return (x + m - 1) // m * m


# ----------------------------------------------------------------------------
# Pallas kernels
# ----------------------------------------------------------------------------
def _linear_kernel(z_ref, w_ref, b_ref, o_ref):
    acc = jnp.dot(z_ref[...], w_ref[...], preferred_element_type=jnp.float32)
    o_ref[...] = (acc + b_ref[...]).astype(o_ref.dtype)


def project_linear(z, w, b):
    """cond = z @ w + b  (M tiny, N = IMG*IMG = 1024 -> lane dense)."""
    M, K = z.shape
    N = w.shape[1]
    return pl.pallas_call(
        _linear_kernel,
        out_shape=jax.ShapeDtypeStruct((M, N), jnp.bfloat16),
        grid_spec=pltpu.PrefetchScalarGridSpec(
            num_scalar_prefetch=0,
            grid=(1,),
            in_specs=[pl.BlockSpec((M, K), lambda i: (0, 0)),
                      pl.BlockSpec((K, N), lambda i: (0, 0)),
                      pl.BlockSpec((1, N), lambda i: (0, 0))],
            out_specs=pl.BlockSpec((M, N), lambda i: (0, 0)),
        ),
        compiler_params=pltpu.CompilerParams(
            dimension_semantics=("arbitrary",)),
    )(z, w, b)


def _conv_pool_kernel(cols_ref, w_ref, b_ref, o_ref):
    # cols_ref: (4, tm, Kp) bf16 -- the 4 maxpool members of each pooled pixel
    # w_ref:    (Kp, 128)  bf16   (K and output channels zero-padded to 128-mult)
    # b_ref:    (1, 128)   f32
    # o_ref:    (tm, 128)         lane-dense store
    m = jnp.dot(cols_ref[0], w_ref[...], preferred_element_type=jnp.float32)
    for p in range(1, 4):
        m = jnp.maximum(
            m, jnp.dot(cols_ref[p], w_ref[...],
                       preferred_element_type=jnp.float32))
    # maxpool(relu(conv + b)) == relu(max(conv) + b)  (shared bias, monotone relu)
    y = jnp.maximum(m + b_ref[...], 0.0)
    o_ref[...] = y.astype(o_ref.dtype)


def conv_relu_pool_call(cols, w_mat, b):
    """Fused (conv via im2col) + bias + ReLU + 2x2 maxpool."""
    _, M, K = cols.shape
    N = w_mat.shape[1]
    # Split M across >=2 "parallel" grid steps when big enough (v7x megacore).
    tm = M // 2 if (M % 16 == 0 and M >= 32) else M
    grid = (M // tm,)
    return pl.pallas_call(
        _conv_pool_kernel,
        out_shape=jax.ShapeDtypeStruct((M, N), jnp.bfloat16),
        grid_spec=pltpu.PrefetchScalarGridSpec(
            num_scalar_prefetch=0,
            grid=grid,
            in_specs=[pl.BlockSpec((4, tm, K), lambda i: (0, i, 0)),
                      pl.BlockSpec((K, N), lambda i: (0, 0)),
                      pl.BlockSpec((1, N), lambda i: (0, 0))],
            out_specs=pl.BlockSpec((tm, N), lambda i: (i, 0)),
        ),
        compiler_params=pltpu.CompilerParams(
            dimension_semantics=("parallel",)),
    )(cols, w_mat, b)


def _convT_kernel(cols_ref, w_ref, b_ref, o_ref, *, act):
    # One output parity per grid step.
    y = jnp.dot(cols_ref[0], w_ref[0], preferred_element_type=jnp.float32)
    y = y + b_ref[...]
    if act == "relu":
        y = jnp.maximum(y, 0.0)
    else:  # sigmoid, exact f32 epilogue (exp on EUP)
        y = 1.0 / (1.0 + jnp.exp(-y))
    o_ref[0] = y.astype(o_ref.dtype)


def conv_transpose_call(cols, w_sub, b, act, out_dtype=jnp.bfloat16):
    """Sub-pixel ConvTranspose2d(k=4, s=2, p=1): 4 parity matmuls over grid=(4,)."""
    _, M, K = cols.shape
    N = w_sub.shape[2]
    return pl.pallas_call(
        functools.partial(_convT_kernel, act=act),
        out_shape=jax.ShapeDtypeStruct((4, M, N), out_dtype),
        grid_spec=pltpu.PrefetchScalarGridSpec(
            num_scalar_prefetch=0,
            grid=(4,),
            in_specs=[pl.BlockSpec((1, M, K), lambda p: (p, 0, 0)),
                      pl.BlockSpec((1, K, N), lambda p: (p, 0, 0)),
                      pl.BlockSpec((1, N), lambda p: (0, 0))],
            out_specs=pl.BlockSpec((1, M, N), lambda p: (p, 0, 0)),
        ),
        compiler_params=pltpu.CompilerParams(
            dimension_semantics=("parallel",)),
    )(cols, w_sub, b)


# ----------------------------------------------------------------------------
# XLA glue (small, fuses into 1-2 fusions per layer)
# ----------------------------------------------------------------------------
def _im2col_pool_grouped(x, k, pad):
    """im2col for a 'same' stride-1 conv, with rows grouped by 2x2-pool member.

    x: (B, H, W, C) bf16, H and W even.
    Returns cols of shape (4, B*(H//2)*(W//2), k*k*C); cols[p, m] is the
    im2col row of conv-output pixel (2i+r, 2j+s), p = 2r+s, m = (b, i, j).
    """
    B, H, W, C = x.shape
    xp = jnp.pad(x, ((0, 0), (pad, pad), (pad, pad), (0, 0)))
    taps = [xp[:, dy:dy + H, dx:dx + W, :] for dy in range(k) for dx in range(k)]
    cols = jnp.concatenate(taps, axis=-1)                       # (B, H, W, K)
    K = k * k * C
    cols = cols.reshape(B, H // 2, 2, W // 2, 2, K)
    cols = cols.transpose(2, 4, 0, 1, 3, 5)                     # (2,2,B,H/2,W/2,K)
    return cols.reshape(4, B * (H // 2) * (W // 2), K)


def conv2d_relu_pool(x, w_mat, b, k, pad, c_out):
    B, H, W, _ = x.shape
    cols = _im2col_pool_grouped(x, k, pad)
    K = cols.shape[-1]
    k_pad = w_mat.shape[0]                                       # 128-aligned K
    if k_pad != K:
        cols = jnp.pad(cols, ((0, 0), (0, 0), (0, k_pad - K)))
    out = conv_relu_pool_call(cols, w_mat, b)                    # (M, 128) bf16
    return out.reshape(B, H // 2, W // 2, CPAD)[..., :c_out]


def _im2col_subpixel(x):
    """Sub-pixel im2col for ConvTranspose2d(k=4, stride=2, pad=1).

    Output parity (r, s) is an independent 2x2 conv over the 1-padded input.
    Returns cols of shape (4, B*H*W, 4*C); parity index p = 2r+s.
    """
    B, H, W, C = x.shape
    xp = jnp.pad(x, ((0, 0), (1, 1), (1, 1), (0, 0)))
    cols = []
    for r in range(2):
        for s in range(2):
            taps = [xp[:, r + a:r + a + H, s + c:s + c + W, :]
                    for a in range(2) for c in range(2)]
            cols.append(jnp.concatenate(taps, axis=-1).reshape(B * H * W, 4 * C))
    return jnp.stack(cols, axis=0)                              # (4, B*H*W, 4C)


def conv_transpose2d(x, w_sub, b, c_out, act, out_dtype=jnp.bfloat16):
    B, H, W, _ = x.shape
    cols = _im2col_subpixel(x)
    K = cols.shape[-1]
    k_pad = w_sub.shape[1]                                       # 128-aligned K
    if k_pad != K:
        cols = jnp.pad(cols, ((0, 0), (0, 0), (0, k_pad - K)))
    out = conv_transpose_call(cols, w_sub, b, act, out_dtype)    # (4, B*H*W, 128)
    out = out.reshape(2, 2, B, H, W, CPAD)[..., :c_out]          # (r,s,B,H,W,Co)
    out = out.transpose(2, 3, 0, 4, 1, 5).reshape(B, 2 * H, 2 * W, c_out)
    return out


# ----------------------------------------------------------------------------
# Parameter init (PyTorch-like uniform fan-in; weights pre-packed for kernels)
# ----------------------------------------------------------------------------
def _uniform(key, shape, fan_in):
    s = 1.0 / jnp.sqrt(jnp.float32(fan_in))
    return jax.random.uniform(key, shape, jnp.float32, -s, s)


def _project_params(key):
    kw, kb = jax.random.split(key)
    w = _uniform(kw, (IMG_SIZE * IMG_SIZE, Z_DIM), Z_DIM)       # PyTorch (out,in)
    b = _uniform(kb, (IMG_SIZE * IMG_SIZE,), Z_DIM)
    return w.T.astype(jnp.bfloat16), b.reshape(1, -1).astype(jnp.float32)


def _conv_params(key, c_out, c_in, k):
    kw, kb = jax.random.split(key)
    fan = c_in * k * k
    w = _uniform(kw, (c_out, c_in, k, k), fan)                  # PyTorch (O,I,kh,kw)
    b = _uniform(kb, (c_out,), fan)
    w_mat = jnp.transpose(w, (2, 3, 1, 0)).reshape(k * k * c_in, c_out)
    k_pad = _round_up(k * k * c_in, 128)
    w_mat = jnp.pad(w_mat, ((0, k_pad - k * k * c_in), (0, CPAD - c_out)))
    b_pad = jnp.pad(b, (0, CPAD - c_out))
    return w_mat.astype(jnp.bfloat16), b_pad.reshape(1, CPAD).astype(jnp.float32)


_KY = ((3, 1), (2, 0))   # kernel index used by (output parity r, window tap a)


def _convT_params(key, c_in, c_out, k=4):
    kw, kb = jax.random.split(key)
    fan = c_out * k * k
    w = _uniform(kw, (c_in, c_out, k, k), fan)                  # PyTorch (I,O,kh,kw)
    b = _uniform(kb, (c_out,), fan)
    mats = []
    for r in range(2):
        for s in range(2):
            m = jnp.stack([w[:, :, _KY[r][a], _KY[s][c]]
                           for a in range(2) for c in range(2)], axis=0)
            mats.append(m.reshape(4 * c_in, c_out))             # rows: (a, c, ci)
    w_sub = jnp.stack(mats, axis=0)                             # (4, 4*Cin, Cout)
    k_pad = _round_up(4 * c_in, 128)
    w_sub = jnp.pad(w_sub, ((0, 0), (0, k_pad - 4 * c_in), (0, CPAD - c_out)))
    b_pad = jnp.pad(b, (0, CPAD - c_out))
    return w_sub.astype(jnp.bfloat16), b_pad.reshape(1, CPAD).astype(jnp.float32)


def init_params(key):
    F = FEATURES_G
    keys = jax.random.split(key, 10)
    p = {"project": _project_params(keys[0])}
    conv_cfg = [(F, 4, 5), (2 * F, F, 5), (4 * F, 2 * F, 3),
                (8 * F, 4 * F, 3), (16 * F, 8 * F, 3)]
    for n, (o, i, k) in enumerate(conv_cfg, 1):
        p[f"c{n}"] = _conv_params(keys[n], o, i, k)
    convT_cfg = [(16 * F, 8 * F), (8 * F, 4 * F), (4 * F, 2 * F), (2 * F, 3)]
    for n, (i, o) in enumerate(convT_cfg, 1):
        p[f"t{n}"] = _convT_params(keys[5 + n], i, o)
    return p


# ----------------------------------------------------------------------------
# Forward pass (mirrors Generator.forward)
# ----------------------------------------------------------------------------
def generator_forward(params, x_nchw, z):
    B = x_nchw.shape[0]
    F = FEATURES_G

    w, b = params["project"]
    cond = project_linear(z.astype(jnp.bfloat16), w, b)         # (B, IMG*IMG)
    cond = cond.reshape(B, IMG_SIZE, IMG_SIZE, 1)               # NHWC, 1 channel
    x = jnp.transpose(x_nchw, (0, 2, 3, 1)).astype(jnp.bfloat16)
    h = jnp.concatenate([cond, x], axis=-1)                     # (B,32,32,4)

    h = conv2d_relu_pool(h, *params["c1"], k=5, pad=2, c_out=F)        # (B,16,16,8)
    h = conv2d_relu_pool(h, *params["c2"], k=5, pad=2, c_out=2 * F)    # (B,8,8,16)
    h = conv2d_relu_pool(h, *params["c3"], k=3, pad=1, c_out=4 * F)    # (B,4,4,32)
    h = conv2d_relu_pool(h, *params["c4"], k=3, pad=1, c_out=8 * F)    # (B,2,2,64)
    h = conv2d_relu_pool(h, *params["c5"], k=3, pad=1, c_out=16 * F)   # (B,1,1,128)

    h = conv_transpose2d(h, *params["t1"], c_out=8 * F, act="relu")    # (B,2,2,64)
    h = conv_transpose2d(h, *params["t2"], c_out=4 * F, act="relu")    # (B,4,4,32)
    h = conv_transpose2d(h, *params["t3"], c_out=2 * F, act="relu")    # (B,8,8,16)
    h = conv_transpose2d(h, *params["t4"], c_out=3, act="sigmoid",
                         out_dtype=jnp.float32)                        # (B,16,16,3)

    return jnp.transpose(h, (0, 3, 1, 2))                       # NHWC -> NCHW


# ----------------------------------------------------------------------------
if __name__ == "__main__":
    key = jax.random.PRNGKey(0)
    kp, kx, kz = jax.random.split(key, 3)

    params = init_params(kp)
    x = jax.random.normal(kx, (2, 3, IMG_SIZE, IMG_SIZE), jnp.float32)  # NCHW
    z = jax.random.normal(kz, (2, Z_DIM), jnp.float32)

    out = jax.jit(generator_forward)(params, x, z)
    out = jax.block_until_ready(out)

    assert out.shape == (2, 3, IMG_SIZE // 2, IMG_SIZE // 2), out.shape
    assert out.dtype == jnp.float32
    assert bool(jnp.all(jnp.isfinite(out)))
    assert bool(jnp.all((out >= 0.0) & (out <= 1.0)))            # sigmoid output
    print("KERNEL_OK")
</pallas_src>

<mosaic_0001>
module attributes {stable_mosaic.version = 11 : i64} {
  func.func @_linear_kernel(%arg0: i32, %arg1: memref<2x16xbf16, #tpu.memory_space<vmem>>, %arg2: memref<16x1024xbf16, #tpu.memory_space<vmem>>, %arg3: memref<1x1024xf32, #tpu.memory_space<vmem>>, %arg4: memref<2x1024xbf16, #tpu.memory_space<vmem>>) attributes {dimension_semantics = [#tpu.dimension_semantics<arbitrary>], iteration_bounds = array<i64: 1>, scalar_prefetch = 0 : i64, scratch_operands = 0 : i64, tpu.core_type = #tpu.core_type<tc>, window_params = [{pipeline_mode = #tpu.pipeline_mode<synchronous>, transform_indices = @transform_0, window_bounds = array<i64: 2, 16>}, {pipeline_mode = #tpu.pipeline_mode<synchronous>, transform_indices = @transform_1, window_bounds = array<i64: 16, 1024>}, {pipeline_mode = #tpu.pipeline_mode<synchronous>, transform_indices = @transform_2, window_bounds = array<i64: 1, 1024>}, {pipeline_mode = #tpu.pipeline_mode<synchronous>, transform_indices = @transform_3, window_bounds = array<i64: 2, 1024>}]} {
    %c0 = arith.constant 0 : index
    %c0_0 = arith.constant 0 : index
    %0 = vector.load %arg1[%c0, %c0_0] : memref<2x16xbf16, #tpu.memory_space<vmem>>, vector<2x16xbf16>
    %c0_1 = arith.constant 0 : index
    %c0_2 = arith.constant 0 : index
    %1 = vector.load %arg2[%c0_1, %c0_2] : memref<16x1024xbf16, #tpu.memory_space<vmem>>, vector<16x1024xbf16>
    %cst = arith.constant dense<0.000000e+00> : vector<2x1024xf32>
    %2 = tpu.matmul %0, %1, %cst {dimension_numbers = #tpu.dot_dimension_numbers<[1], [0], [0], [1], [0, 0, 1, 1], [], []>} : vector<2x16xbf16>, vector<16x1024xbf16>, vector<2x1024xf32> -> vector<2x1024xf32>
    %c0_3 = arith.constant 0 : index
    %c0_4 = arith.constant 0 : index
    %3 = vector.load %arg3[%c0_3, %c0_4] : memref<1x1024xf32, #tpu.memory_space<vmem>>, vector<1x1024xf32>
    %4 = vector.broadcast %3 : vector<1x1024xf32> to vector<2x1024xf32>
    %5 = arith.addf %2, %4 : vector<2x1024xf32>
    %6 = arith.truncf %5 : vector<2x1024xf32> to vector<2x1024xbf16>
    %c0_5 = arith.constant 0 : index
    %c0_6 = arith.constant 0 : index
    %7 = vector.load %arg4[%c0_5, %c0_6] : memref<2x1024xbf16, #tpu.memory_space<vmem>>, vector<2x1024xbf16>
    tpu.vector_store %arg4[%c0_5, %c0_6], %6 {strides = array<i32>} : memref<2x1024xbf16, #tpu.memory_space<vmem>>, vector<2x1024xbf16>,
    return
  }
  func.func @transform_0(%arg0: i32) -> (i32, i32) {
    %c0_i32 = arith.constant 0 : i32
    %c0_i32_0 = arith.constant 0 : i32
    %c0_i32_1 = arith.constant 0 : i32
    return %c0_i32, %c0_i32_0 : i32, i32
  }
  func.func @transform_1(%arg0: i32) -> (i32, i32) {
    %c0_i32 = arith.constant 0 : i32
    %c0_i32_0 = arith.constant 0 : i32
    %c0_i32_1 = arith.constant 0 : i32
    return %c0_i32, %c0_i32_0 : i32, i32
  }
  func.func @transform_2(%arg0: i32) -> (i32, i32) {
    %c0_i32 = arith.constant 0 : i32
    %c0_i32_0 = arith.constant 0 : i32
    %c0_i32_1 = arith.constant 0 : i32
    return %c0_i32, %c0_i32_0 : i32, i32
  }
  func.func @transform_3(%arg0: i32) -> (i32, i32) {
    %c0_i32 = arith.constant 0 : i32
    %c0_i32_0 = arith.constant 0 : i32
    %c0_i32_1 = arith.constant 0 : i32
    return %c0_i32, %c0_i32_0 : i32, i32
  }
}

module attributes {stable_mosaic.version = 11 : i64} {
  func.func @_conv_pool_kernel(%arg0: i32, %arg1: memref<4x256x128xbf16, #tpu.memory_space<vmem>>, %arg2: memref<128x128xbf16, #tpu.memory_space<vmem>>, %arg3: memref<1x128xf32, #tpu.memory_space<vmem>>, %arg4: memref<256x128xbf16, #tpu.memory_space<vmem>>) attributes {dimension_semantics = [#tpu.dimension_semantics<parallel>], iteration_bounds = array<i64: 2>, scalar_prefetch = 0 : i64, scratch_operands = 0 : i64, tpu.core_type = #tpu.core_type<tc>, window_params = [{transform_indices = @transform_0, window_bounds = array<i64: 4, 256, 128>}, {pipeline_mode = #tpu.pipeline_mode<synchronous>, transform_indices = @transform_1, window_bounds = array<i64: 128, 128>}, {pipeline_mode = #tpu.pipeline_mode<synchronous>, transform_indices = @transform_2, window_bounds = array<i64: 1, 128>}, {transform_indices = @transform_3, window_bounds = array<i64: 256, 128>}]} {
    %c0 = arith.constant 0 : index
    %c0_0 = arith.constant 0 : index
    %c0_1 = arith.constant 0 : index
    %0 = vector.load %arg1[%c0, %c0_0, %c0_1] : memref<4x256x128xbf16, #tpu.memory_space<vmem>>, vector<1x256x128xbf16>
    %1 = vector.shape_cast %0 : vector<1x256x128xbf16> to vector<256x128xbf16>
    %c0_2 = arith.constant 0 : index
    %c0_3 = arith.constant 0 : index
    %2 = vector.load %arg2[%c0_2, %c0_3] : memref<128x128xbf16, #tpu.memory_space<vmem>>, vector<128x128xbf16>
    %cst = arith.constant dense<0.000000e+00> : vector<256x128xf32>
    %3 = tpu.matmul %1, %2, %cst {dimension_numbers = #tpu.dot_dimension_numbers<[1], [0], [0], [1], [0, 0, 1, 1], [], []>} : vector<256x128xbf16>, vector<128x128xbf16>, vector<256x128xf32> -> vector<256x128xf32>
    %c1 = arith.constant 1 : index
    %c0_4 = arith.constant 0 : index
    %c0_5 = arith.constant 0 : index
    %4 = vector.load %arg1[%c1, %c0_4, %c0_5] : memref<4x256x128xbf16, #tpu.memory_space<vmem>>, vector<1x256x128xbf16>
    %5 = vector.shape_cast %4 : vector<1x256x128xbf16> to vector<256x128xbf16>
    %c0_6 = arith.constant 0 : index
    %c0_7 = arith.constant 0 : index
    %6 = vector.load %arg2[%c0_6, %c0_7] : memref<128x128xbf16, #tpu.memory_space<vmem>>, vector<128x128xbf16>
    %cst_8 = arith.constant dense<0.000000e+00> : vector<256x128xf32>
    %7 = tpu.matmul %5, %6, %cst_8 {dimension_numbers = #tpu.dot_dimension_numbers<[1], [0], [0], [1], [0, 0, 1, 1], [], []>} : vector<256x128xbf16>, vector<128x128xbf16>, vector<256x128xf32> -> vector<256x128xf32>
    %8 = arith.maximumf %3, %7 : vector<256x128xf32>
    %c2 = arith.constant 2 : index
    %c0_9 = arith.constant 0 : index
    %c0_10 = arith.constant 0 : index
    %9 = vector.load %arg1[%c2, %c0_9, %c0_10] : memref<4x256x128xbf16, #tpu.memory_space<vmem>>, vector<1x256x128xbf16>
    %10 = vector.shape_cast %9 : vector<1x256x128xbf16> to vector<256x128xbf16>
    %c0_11 = arith.constant 0 : index
    %c0_12 = arith.constant 0 : index
    %11 = vector.load %arg2[%c0_11, %c0_12] : memref<128x128xbf16, #tpu.memory_space<vmem>>, vector<128x128xbf16>
    %cst_13 = arith.constant dense<0.000000e+00> : vector<256x128xf32>
    %12 = tpu.matmul %10, %11, %cst_13 {dimension_numbers = #tpu.dot_dimension_numbers<[1], [0], [0], [1], [0, 0, 1, 1], [], []>} : vector<256x128xbf16>, vector<128x128xbf16>, vector<256x128xf32> -> vector<256x128xf32>
    %13 = arith.maximumf %8, %12 : vector<256x128xf32>
    %c3 = arith.constant 3 : index
    %c0_14 = arith.constant 0 : index
    %c0_15 = arith.constant 0 : index
    %14 = vector.load %arg1[%c3, %c0_14, %c0_15] : memref<4x256x128xbf16, #tpu.memory_space<vmem>>, vector<1x256x128xbf16>
    %15 = vector.shape_cast %14 : vector<1x256x128xbf16> to vector<256x128xbf16>
    %c0_16 = arith.constant 0 : index
    %c0_17 = arith.constant 0 : index
    %16 = vector.load %arg2[%c0_16, %c0_17] : memref<128x128xbf16, #tpu.memory_space<vmem>>, vector<128x128xbf16>
    %cst_18 = arith.constant dense<0.000000e+00> : vector<256x128xf32>
    %17 = tpu.matmul %15, %16, %cst_18 {dimension_numbers = #tpu.dot_dimension_numbers<[1], [0], [0], [1], [0, 0, 1, 1], [], []>} : vector<256x128xbf16>, vector<128x128xbf16>, vector<256x128xf32> -> vector<256x128xf32>
    %18 = arith.maximumf %13, %17 : vector<256x128xf32>
    %c0_19 = arith.constant 0 : index
    %c0_20 = arith.constant 0 : index
    %19 = vector.load %arg3[%c0_19, %c0_20] : memref<1x128xf32, #tpu.memory_space<vmem>>, vector<1x128xf32>
    %20 = vector.broadcast %19 : vector<1x128xf32> to vector<256x128xf32>
    %21 = arith.addf %18, %20 : vector<256x128xf32>
    %cst_21 = arith.constant 0.000000e+00 : f32
    %22 = vector.broadcast %cst_21 : f32 to vector<256x128xf32>
    %23 = arith.maximumf %21, %22 : vector<256x128xf32>
    %24 = arith.truncf %23 : vector<256x128xf32> to vector<256x128xbf16>
    %c0_22 = arith.constant 0 : index
    %c0_23 = arith.constant 0 : index
    %25 = vector.load %arg4[%c0_22, %c0_23] : memref<256x128xbf16, #tpu.memory_space<vmem>>, vector<256x128xbf16>
    tpu.vector_store %arg4[%c0_22, %c0_23], %24 {strides = array<i32>} : memref<256x128xbf16, #tpu.memory_space<vmem>>, vector<256x128xbf16>,
    return
  }
  func.func @transform_0(%arg0: i32) -> (i32, i32, i32) {
    %c0_i32 = arith.constant 0 : i32
    %c0_i32_0 = arith.constant 0 : i32
    %c0_i32_1 = arith.constant 0 : i32
    return %c0_i32, %arg0, %c0_i32_0 : i32, i32, i32
  }
  func.func @transform_1(%arg0: i32) -> (i32, i32) {
    %c0_i32 = arith.constant 0 : i32
    %c0_i32_0 = arith.constant 0 : i32
    %c0_i32_1 = arith.constant 0 : i32
    return %c0_i32, %c0_i32_0 : i32, i32
  }
  func.func @transform_2(%arg0: i32) -> (i32, i32) {
    %c0_i32 = arith.constant 0 : i32
    %c0_i32_0 = arith.constant 0 : i32
    %c0_i32_1 = arith.constant 0 : i32
    return %c0_i32, %c0_i32_0 : i32, i32
  }
  func.func @transform_3(%arg0: i32) -> (i32, i32) {
    %c0_i32 = arith.constant 0 : i32
    %c0_i32_0 = arith.constant 0 : i32
    return %arg0, %c0_i32 : i32, i32
  }
}

module attributes {stable_mosaic.version = 11 : i64} {
  func.func @_conv_pool_kernel(%arg0: i32, %arg1: memref<4x64x256xbf16, #tpu.memory_space<vmem>>, %arg2: memref<256x128xbf16, #tpu.memory_space<vmem>>, %arg3: memref<1x128xf32, #tpu.memory_space<vmem>>, %arg4: memref<64x128xbf16, #tpu.memory_space<vmem>>) attributes {dimension_semantics = [#tpu.dimension_semantics<parallel>], iteration_bounds = array<i64: 2>, scalar_prefetch = 0 : i64, scratch_operands = 0 : i64, tpu.core_type = #tpu.core_type<tc>, window_params = [{transform_indices = @transform_0, window_bounds = array<i64: 4, 64, 256>}, {pipeline_mode = #tpu.pipeline_mode<synchronous>, transform_indices = @transform_1, window_bounds = array<i64: 256, 128>}, {pipeline_mode = #tpu.pipeline_mode<synchronous>, transform_indices = @transform_2, window_bounds = array<i64: 1, 128>}, {transform_indices = @transform_3, window_bounds = array<i64: 64, 128>}]} {
    %c0 = arith.constant 0 : index
    %c0_0 = arith.constant 0 : index
    %c0_1 = arith.constant 0 : index
    %0 = vector.load %arg1[%c0, %c0_0, %c0_1] : memref<4x64x256xbf16, #tpu.memory_space<vmem>>, vector<1x64x256xbf16>
    %1 = vector.shape_cast %0 : vector<1x64x256xbf16> to vector<64x256xbf16>
    %c0_2 = arith.constant 0 : index
    %c0_3 = arith.constant 0 : index
    %2 = vector.load %arg2[%c0_2, %c0_3] : memref<256x128xbf16, #tpu.memory_space<vmem>>, vector<256x128xbf16>
    %cst = arith.constant dense<0.000000e+00> : vector<64x128xf32>
    %3 = tpu.matmul %1, %2, %cst {dimension_numbers = #tpu.dot_dimension_numbers<[1], [0], [0], [1], [0, 0, 1, 1], [], []>} : vector<64x256xbf16>, vector<256x128xbf16>, vector<64x128xf32> -> vector<64x128xf32>
    %c1 = arith.constant 1 : index
    %c0_4 = arith.constant 0 : index
    %c0_5 = arith.constant 0 : index
    %4 = vector.load %arg1[%c1, %c0_4, %c0_5] : memref<4x64x256xbf16, #tpu.memory_space<vmem>>, vector<1x64x256xbf16>
    %5 = vector.shape_cast %4 : vector<1x64x256xbf16> to vector<64x256xbf16>
    %c0_6 = arith.constant 0 : index
    %c0_7 = arith.constant 0 : index
    %6 = vector.load %arg2[%c0_6, %c0_7] : memref<256x128xbf16, #tpu.memory_space<vmem>>, vector<256x128xbf16>
    %cst_8 = arith.constant dense<0.000000e+00> : vector<64x128xf32>
    %7 = tpu.matmul %5, %6, %cst_8 {dimension_numbers = #tpu.dot_dimension_numbers<[1], [0], [0], [1], [0, 0, 1, 1], [], []>} : vector<64x256xbf16>, vector<256x128xbf16>, vector<64x128xf32> -> vector<64x128xf32>
    %8 = arith.maximumf %3, %7 : vector<64x128xf32>
    %c2 = arith.constant 2 : index
    %c0_9 = arith.constant 0 : index
    %c0_10 = arith.constant 0 : index
    %9 = vector.load %arg1[%c2, %c0_9, %c0_10] : memref<4x64x256xbf16, #tpu.memory_space<vmem>>, vector<1x64x256xbf16>
    %10 = vector.shape_cast %9 : vector<1x64x256xbf16> to vector<64x256xbf16>
    %c0_11 = arith.constant 0 : index
    %c0_12 = arith.constant 0 : index
    %11 = vector.load %arg2[%c0_11, %c0_12] : memref<256x128xbf16, #tpu.memory_space<vmem>>, vector<256x128xbf16>
    %cst_13 = arith.constant dense<0.000000e+00> : vector<64x128xf32>
    %12 = tpu.matmul %10, %11, %cst_13 {dimension_numbers = #tpu.dot_dimension_numbers<[1], [0], [0], [1], [0, 0, 1, 1], [], []>} : vector<64x256xbf16>, vector<256x128xbf16>, vector<64x128xf32> -> vector<64x128xf32>
    %13 = arith.maximumf %8, %12 : vector<64x128xf32>
    %c3 = arith.constant 3 : index
    %c0_14 = arith.constant 0 : index
    %c0_15 = arith.constant 0 : index
    %14 = vector.load %arg1[%c3, %c0_14, %c0_15] : memref<4x64x256xbf16, #tpu.memory_space<vmem>>, vector<1x64x256xbf16>
    %15 = vector.shape_cast %14 : vector<1x64x256xbf16> to vector<64x256xbf16>
    %c0_16 = arith.constant 0 : index
    %c0_17 = arith.constant 0 : index
    %16 = vector.load %arg2[%c0_16, %c0_17] : memref<256x128xbf16, #tpu.memory_space<vmem>>, vector<256x128xbf16>
    %cst_18 = arith.constant dense<0.000000e+00> : vector<64x128xf32>
    %17 = tpu.matmul %15, %16, %cst_18 {dimension_numbers = #tpu.dot_dimension_numbers<[1], [0], [0], [1], [0, 0, 1, 1], [], []>} : vector<64x256xbf16>, vector<256x128xbf16>, vector<64x128xf32> -> vector<64x128xf32>
    %18 = arith.maximumf %13, %17 : vector<64x128xf32>
    %c0_19 = arith.constant 0 : index
    %c0_20 = arith.constant 0 : index
    %19 = vector.load %arg3[%c0_19, %c0_20] : memref<1x128xf32, #tpu.memory_space<vmem>>, vector<1x128xf32>
    %20 = vector.broadcast %19 : vector<1x128xf32> to vector<64x128xf32>
    %21 = arith.addf %18, %20 : vector<64x128xf32>
    %cst_21 = arith.constant 0.000000e+00 : f32
    %22 = vector.broadcast %cst_21 : f32 to vector<64x128xf32>
    %23 = arith.maximumf %21, %22 : vector<64x128xf32>
    %24 = arith.truncf %23 : vector<64x128xf32> to vector<64x128xbf16>
    %c0_22 = arith.constant 0 : index
    %c0_23 = arith.constant 0 : index
    %25 = vector.load %arg4[%c0_22, %c0_23] : memref<64x128xbf16, #tpu.memory_space<vmem>>, vector<64x128xbf16>
    tpu.vector_store %arg4[%c0_22, %c0_23], %24 {strides = array<i32>} : memref<64x128xbf16, #tpu.memory_space<vmem>>, vector<64x128xbf16>,
    return
  }
  func.func @transform_0(%arg0: i32) -> (i32, i32, i32) {
    %c0_i32 = arith.constant 0 : i32
    %c0_i32_0 = arith.constant 0 : i32
    %c0_i32_1 = arith.constant 0 : i32
    return %c0_i32, %arg0, %c0_i32_0 : i32, i32, i32
  }
  func.func @transform_1(%arg0: i32) -> (i32, i32) {
    %c0_i32 = arith.constant 0 : i32
    %c0_i32_0 = arith.constant 0 : i32
    %c0_i32_1 = arith.constant 0 : i32
    return %c0_i32, %c0_i32_0 : i32, i32
  }
  func.func @transform_2(%arg0: i32) -> (i32, i32) {
    %c0_i32 = arith.constant 0 : i32
    %c0_i32_0 = arith.constant 0 : i32
    %c0_i32_1 = arith.constant 0 : i32
    return %c0_i32, %c0_i32_0 : i32, i32
  }
  func.func @transform_3(%arg0: i32) -> (i32, i32) {
    %c0_i32 = arith.constant 0 : i32
    %c0_i32_0 = arith.constant 0 : i32
    return %arg0, %c0_i32 : i32, i32
  }
}

module attributes {stable_mosaic.version = 11 : i64} {
  func.func @_conv_pool_kernel(%arg0: i32, %arg1: memref<4x16x256xbf16, #tpu.memory_space<vmem>>, %arg2: memref<256x128xbf16, #tpu.memory_space<vmem>>, %arg3: memref<1x128xf32, #tpu.memory_space<vmem>>, %arg4: memref<16x128xbf16, #tpu.memory_space<vmem>>) attributes {dimension_semantics = [#tpu.dimension_semantics<parallel>], iteration_bounds = array<i64: 2>, scalar_prefetch = 0 : i64, scratch_operands = 0 : i64, tpu.core_type = #tpu.core_type<tc>, window_params = [{transform_indices = @transform_0, window_bounds = array<i64: 4, 16, 256>}, {pipeline_mode = #tpu.pipeline_mode<synchronous>, transform_indices = @transform_1, window_bounds = array<i64: 256, 128>}, {pipeline_mode = #tpu.pipeline_mode<synchronous>, transform_indices = @transform_2, window_bounds = array<i64: 1, 128>}, {transform_indices = @transform_3, window_bounds = array<i64: 16, 128>}]} {
    %c0 = arith.constant 0 : index
    %c0_0 = arith.constant 0 : index
    %c0_1 = arith.constant 0 : index
    %0 = vector.load %arg1[%c0, %c0_0, %c0_1] : memref<4x16x256xbf16, #tpu.memory_space<vmem>>, vector<1x16x256xbf16>
    %1 = vector.shape_cast %0 : vector<1x16x256xbf16> to vector<16x256xbf16>
    %c0_2 = arith.constant 0 : index
    %c0_3 = arith.constant 0 : index
    %2 = vector.load %arg2[%c0_2, %c0_3] : memref<256x128xbf16, #tpu.memory_space<vmem>>, vector<256x128xbf16>
    %cst = arith.constant dense<0.000000e+00> : vector<16x128xf32>
    %3 = tpu.matmul %1, %2, %cst {dimension_numbers = #tpu.dot_dimension_numbers<[1], [0], [0], [1], [0, 0, 1, 1], [], []>} : vector<16x256xbf16>, vector<256x128xbf16>, vector<16x128xf32> -> vector<16x128xf32>
    %c1 = arith.constant 1 : index
    %c0_4 = arith.constant 0 : index
    %c0_5 = arith.constant 0 : index
    %4 = vector.load %arg1[%c1, %c0_4, %c0_5] : memref<4x16x256xbf16, #tpu.memory_space<vmem>>, vector<1x16x256xbf16>
    %5 = vector.shape_cast %4 : vector<1x16x256xbf16> to vector<16x256xbf16>
    %c0_6 = arith.constant 0 : index
    %c0_7 = arith.constant 0 : index
    %6 = vector.load %arg2[%c0_6, %c0_7] : memref<256x128xbf16, #tpu.memory_space<vmem>>, vector<256x128xbf16>
    %cst_8 = arith.constant dense<0.000000e+00> : vector<16x128xf32>
    %7 = tpu.matmul %5, %6, %cst_8 {dimension_numbers = #tpu.dot_dimension_numbers<[1], [0], [0], [1], [0, 0, 1, 1], [], []>} : vector<16x256xbf16>, vector<256x128xbf16>, vector<16x128xf32> -> vector<16x128xf32>
    %8 = arith.maximumf %3, %7 : vector<16x128xf32>
    %c2 = arith.constant 2 : index
    %c0_9 = arith.constant 0 : index
    %c0_10 = arith.constant 0 : index
    %9 = vector.load %arg1[%c2, %c0_9, %c0_10] : memref<4x16x256xbf16, #tpu.memory_space<vmem>>, vector<1x16x256xbf16>
    %10 = vector.shape_cast %9 : vector<1x16x256xbf16> to vector<16x256xbf16>
    %c0_11 = arith.constant 0 : index
    %c0_12 = arith.constant 0 : index
    %11 = vector.load %arg2[%c0_11, %c0_12] : memref<256x128xbf16, #tpu.memory_space<vmem>>, vector<256x128xbf16>
    %cst_13 = arith.constant dense<0.000000e+00> : vector<16x128xf32>
    %12 = tpu.matmul %10, %11, %cst_13 {dimension_numbers = #tpu.dot_dimension_numbers<[1], [0], [0], [1], [0, 0, 1, 1], [], []>} : vector<16x256xbf16>, vector<256x128xbf16>, vector<16x128xf32> -> vector<16x128xf32>
    %13 = arith.maximumf %8, %12 : vector<16x128xf32>
    %c3 = arith.constant 3 : index
    %c0_14 = arith.constant 0 : index
    %c0_15 = arith.constant 0 : index
    %14 = vector.load %arg1[%c3, %c0_14, %c0_15] : memref<4x16x256xbf16, #tpu.memory_space<vmem>>, vector<1x16x256xbf16>
    %15 = vector.shape_cast %14 : vector<1x16x256xbf16> to vector<16x256xbf16>
    %c0_16 = arith.constant 0 : index
    %c0_17 = arith.constant 0 : index
    %16 = vector.load %arg2[%c0_16, %c0_17] : memref<256x128xbf16, #tpu.memory_space<vmem>>, vector<256x128xbf16>
    %cst_18 = arith.constant dense<0.000000e+00> : vector<16x128xf32>
    %17 = tpu.matmul %15, %16, %cst_18 {dimension_numbers = #tpu.dot_dimension_numbers<[1], [0], [0], [1], [0, 0, 1, 1], [], []>} : vector<16x256xbf16>, vector<256x128xbf16>, vector<16x128xf32> -> vector<16x128xf32>
    %18 = arith.maximumf %13, %17 : vector<16x128xf32>
    %c0_19 = arith.constant 0 : index
    %c0_20 = arith.constant 0 : index
    %19 = vector.load %arg3[%c0_19, %c0_20] : memref<1x128xf32, #tpu.memory_space<vmem>>, vector<1x128xf32>
    %20 = vector.broadcast %19 : vector<1x128xf32> to vector<16x128xf32>
    %21 = arith.addf %18, %20 : vector<16x128xf32>
    %cst_21 = arith.constant 0.000000e+00 : f32
    %22 = vector.broadcast %cst_21 : f32 to vector<16x128xf32>
    %23 = arith.maximumf %21, %22 : vector<16x128xf32>
    %24 = arith.truncf %23 : vector<16x128xf32> to vector<16x128xbf16>
    %c0_22 = arith.constant 0 : index
    %c0_23 = arith.constant 0 : index
    %25 = vector.load %arg4[%c0_22, %c0_23] : memref<16x128xbf16, #tpu.memory_space<vmem>>, vector<16x128xbf16>
    tpu.vector_store %arg4[%c0_22, %c0_23], %24 {strides = array<i32>} : memref<16x128xbf16, #tpu.memory_space<vmem>>, vector<16x128xbf16>,
    return
  }
  func.func @transform_0(%arg0: i32) -> (i32, i32, i32) {
    %c0_i32 = arith.constant 0 : i32
    %c0_i32_0 = arith.constant 0 : i32
    %c0_i32_1 = arith.constant 0 : i32
    return %c0_i32, %arg0, %c0_i32_0 : i32, i32, i32
  }
  func.func @transform_1(%arg0: i32) -> (i32, i32) {
    %c0_i32 = arith.constant 0 : i32
    %c0_i32_0 = arith.constant 0 : i32
    %c0_i32_1 = arith.constant 0 : i32
    return %c0_i32, %c0_i32_0 : i32, i32
  }
  func.func @transform_2(%arg0: i32) -> (i32, i32) {
    %c0_i32 = arith.constant 0 : i32
    %c0_i32_0 = arith.constant 0 : i32
    %c0_i32_1 = arith.constant 0 : i32
    return %c0_i32, %c0_i32_0 : i32, i32
  }
  func.func @transform_3(%arg0: i32) -> (i32, i32) {
    %c0_i32 = arith.constant 0 : i32
    %c0_i32_0 = arith.constant 0 : i32
    return %arg0, %c0_i32 : i32, i32
  }
}

module attributes {stable_mosaic.version = 11 : i64} {
  func.func @_conv_pool_kernel(%arg0: i32, %arg1: memref<4x2x640xbf16, #tpu.memory_space<vmem>>, %arg2: memref<640x128xbf16, #tpu.memory_space<vmem>>, %arg3: memref<1x128xf32, #tpu.memory_space<vmem>>, %arg4: memref<2x128xbf16, #tpu.memory_space<vmem>>) attributes {dimension_semantics = [#tpu.dimension_semantics<parallel>], iteration_bounds = array<i64: 1>, scalar_prefetch = 0 : i64, scratch_operands = 0 : i64, tpu.core_type = #tpu.core_type<tc>, window_params = [{transform_indices = @transform_0, window_bounds = array<i64: 4, 2, 640>}, {pipeline_mode = #tpu.pipeline_mode<synchronous>, transform_indices = @transform_1, window_bounds = array<i64: 640, 128>}, {pipeline_mode = #tpu.pipeline_mode<synchronous>, transform_indices = @transform_2, window_bounds = array<i64: 1, 128>}, {transform_indices = @transform_3, window_bounds = array<i64: 2, 128>}]} {
    %c0 = arith.constant 0 : index
    %c0_0 = arith.constant 0 : index
    %c0_1 = arith.constant 0 : index
    %0 = vector.load %arg1[%c0, %c0_0, %c0_1] : memref<4x2x640xbf16, #tpu.memory_space<vmem>>, vector<1x2x640xbf16>
    %1 = vector.shape_cast %0 : vector<1x2x640xbf16> to vector<2x640xbf16>
    %c0_2 = arith.constant 0 : index
    %c0_3 = arith.constant 0 : index
    %2 = vector.load %arg2[%c0_2, %c0_3] : memref<640x128xbf16, #tpu.memory_space<vmem>>, vector<640x128xbf16>
    %cst = arith.constant dense<0.000000e+00> : vector<2x128xf32>
    %3 = tpu.matmul %1, %2, %cst {dimension_numbers = #tpu.dot_dimension_numbers<[1], [0], [0], [1], [0, 0, 1, 1], [], []>} : vector<2x640xbf16>, vector<640x128xbf16>, vector<2x128xf32> -> vector<2x128xf32>
    %c1 = arith.constant 1 : index
    %c0_4 = arith.constant 0 : index
    %c0_5 = arith.constant 0 : index
    %4 = vector.load %arg1[%c1, %c0_4, %c0_5] : memref<4x2x640xbf16, #tpu.memory_space<vmem>>, vector<1x2x640xbf16>
    %5 = vector.shape_cast %4 : vector<1x2x640xbf16> to vector<2x640xbf16>
    %c0_6 = arith.constant 0 : index
    %c0_7 = arith.constant 0 : index
    %6 = vector.load %arg2[%c0_6, %c0_7] : memref<640x128xbf16, #tpu.memory_space<vmem>>, vector<640x128xbf16>
    %cst_8 = arith.constant dense<0.000000e+00> : vector<2x128xf32>
    %7 = tpu.matmul %5, %6, %cst_8 {dimension_numbers = #tpu.dot_dimension_numbers<[1], [0], [0], [1], [0, 0, 1, 1], [], []>} : vector<2x640xbf16>, vector<640x128xbf16>, vector<2x128xf32> -> vector<2x128xf32>
    %8 = arith.maximumf %3, %7 : vector<2x128xf32>
    %c2 = arith.constant 2 : index
    %c0_9 = arith.constant 0 : index
    %c0_10 = arith.constant 0 : index
    %9 = vector.load %arg1[%c2, %c0_9, %c0_10] : memref<4x2x640xbf16, #tpu.memory_space<vmem>>, vector<1x2x640xbf16>
    %10 = vector.shape_cast %9 : vector<1x2x640xbf16> to vector<2x640xbf16>
    %c0_11 = arith.constant 0 : index
    %c0_12 = arith.constant 0 : index
    %11 = vector.load %arg2[%c0_11, %c0_12] : memref<640x128xbf16, #tpu.memory_space<vmem>>, vector<640x128xbf16>
    %cst_13 = arith.constant dense<0.000000e+00> : vector<2x128xf32>
    %12 = tpu.matmul %10, %11, %cst_13 {dimension_numbers = #tpu.dot_dimension_numbers<[1], [0], [0], [1], [0, 0, 1, 1], [], []>} : vector<2x640xbf16>, vector<640x128xbf16>, vector<2x128xf32> -> vector<2x128xf32>
    %13 = arith.maximumf %8, %12 : vector<2x128xf32>
    %c3 = arith.constant 3 : index
    %c0_14 = arith.constant 0 : index
    %c0_15 = arith.constant 0 : index
    %14 = vector.load %arg1[%c3, %c0_14, %c0_15] : memref<4x2x640xbf16, #tpu.memory_space<vmem>>, vector<1x2x640xbf16>
    %15 = vector.shape_cast %14 : vector<1x2x640xbf16> to vector<2x640xbf16>
    %c0_16 = arith.constant 0 : index
    %c0_17 = arith.constant 0 : index
    %16 = vector.load %arg2[%c0_16, %c0_17] : memref<640x128xbf16, #tpu.memory_space<vmem>>, vector<640x128xbf16>
    %cst_18 = arith.constant dense<0.000000e+00> : vector<2x128xf32>
    %17 = tpu.matmul %15, %16, %cst_18 {dimension_numbers = #tpu.dot_dimension_numbers<[1], [0], [0], [1], [0, 0, 1, 1], [], []>} : vector<2x640xbf16>, vector<640x128xbf16>, vector<2x128xf32> -> vector<2x128xf32>
    %18 = arith.maximumf %13, %17 : vector<2x128xf32>
    %c0_19 = arith.constant 0 : index
    %c0_20 = arith.constant 0 : index
    %19 = vector.load %arg3[%c0_19, %c0_20] : memref<1x128xf32, #tpu.memory_space<vmem>>, vector<1x128xf32>
    %20 = vector.broadcast %19 : vector<1x128xf32> to vector<2x128xf32>
    %21 = arith.addf %18, %20 : vector<2x128xf32>
    %cst_21 = arith.constant 0.000000e+00 : f32
    %22 = vector.broadcast %cst_21 : f32 to vector<2x128xf32>
    %23 = arith.maximumf %21, %22 : vector<2x128xf32>
    %24 = arith.truncf %23 : vector<2x128xf32> to vector<2x128xbf16>
    %c0_22 = arith.constant 0 : index
    %c0_23 = arith.constant 0 : index
    %25 = vector.load %arg4[%c0_22, %c0_23] : memref<2x128xbf16, #tpu.memory_space<vmem>>, vector<2x128xbf16>
    tpu.vector_store %arg4[%c0_22, %c0_23], %24 {strides = array<i32>} : memref<2x128xbf16, #tpu.memory_space<vmem>>, vector<2x128xbf16>,
    return
  }
  func.func @transform_0(%arg0: i32) -> (i32, i32, i32) {
    %c0_i32 = arith.constant 0 : i32
    %c0_i32_0 = arith.constant 0 : i32
    %c0_i32_1 = arith.constant 0 : i32
    return %c0_i32, %arg0, %c0_i32_0 : i32, i32, i32
  }
  func.func @transform_1(%arg0: i32) -> (i32, i32) {
    %c0_i32 = arith.constant 0 : i32
    %c0_i32_0 = arith.constant 0 : i32
    %c0_i32_1 = arith.constant 0 : i32
    return %c0_i32, %c0_i32_0 : i32, i32
  }
  func.func @transform_2(%arg0: i32) -> (i32, i32) {
    %c0_i32 = arith.constant 0 : i32
    %c0_i32_0 = arith.constant 0 : i32
    %c0_i32_1 = arith.constant 0 : i32
    return %c0_i32, %c0_i32_0 : i32, i32
  }
  func.func @transform_3(%arg0: i32) -> (i32, i32) {
    %c0_i32 = arith.constant 0 : i32
    %c0_i32_0 = arith.constant 0 : i32
    return %arg0, %c0_i32 : i32, i32
  }
}

module attributes {stable_mosaic.version = 11 : i64} {
  func.func @_conv_pool_kernel(%arg0: i32, %arg1: memref<4x8x384xbf16, #tpu.memory_space<vmem>>, %arg2: memref<384x128xbf16, #tpu.memory_space<vmem>>, %arg3: memref<1x128xf32, #tpu.memory_space<vmem>>, %arg4: memref<8x128xbf16, #tpu.memory_space<vmem>>) attributes {dimension_semantics = [#tpu.dimension_semantics<parallel>], iteration_bounds = array<i64: 1>, scalar_prefetch = 0 : i64, scratch_operands = 0 : i64, tpu.core_type = #tpu.core_type<tc>, window_params = [{transform_indices = @transform_0, window_bounds = array<i64: 4, 8, 384>}, {pipeline_mode = #tpu.pipeline_mode<synchronous>, transform_indices = @transform_1, window_bounds = array<i64: 384, 128>}, {pipeline_mode = #tpu.pipeline_mode<synchronous>, transform_indices = @transform_2, window_bounds = array<i64: 1, 128>}, {transform_indices = @transform_3, window_bounds = array<i64: 8, 128>}]} {
    %c0 = arith.constant 0 : index
    %c0_0 = arith.constant 0 : index
    %c0_1 = arith.constant 0 : index
    %0 = vector.load %arg1[%c0, %c0_0, %c0_1] : memref<4x8x384xbf16, #tpu.memory_space<vmem>>, vector<1x8x384xbf16>
    %1 = vector.shape_cast %0 : vector<1x8x384xbf16> to vector<8x384xbf16>
    %c0_2 = arith.constant 0 : index
    %c0_3 = arith.constant 0 : index
    %2 = vector.load %arg2[%c0_2, %c0_3] : memref<384x128xbf16, #tpu.memory_space<vmem>>, vector<384x128xbf16>
    %cst = arith.constant dense<0.000000e+00> : vector<8x128xf32>
    %3 = tpu.matmul %1, %2, %cst {dimension_numbers = #tpu.dot_dimension_numbers<[1], [0], [0], [1], [0, 0, 1, 1], [], []>} : vector<8x384xbf16>, vector<384x128xbf16>, vector<8x128xf32> -> vector<8x128xf32>
    %c1 = arith.constant 1 : index
    %c0_4 = arith.constant 0 : index
    %c0_5 = arith.constant 0 : index
    %4 = vector.load %arg1[%c1, %c0_4, %c0_5] : memref<4x8x384xbf16, #tpu.memory_space<vmem>>, vector<1x8x384xbf16>
    %5 = vector.shape_cast %4 : vector<1x8x384xbf16> to vector<8x384xbf16>
    %c0_6 = arith.constant 0 : index
    %c0_7 = arith.constant 0 : index
    %6 = vector.load %arg2[%c0_6, %c0_7] : memref<384x128xbf16, #tpu.memory_space<vmem>>, vector<384x128xbf16>
    %cst_8 = arith.constant dense<0.000000e+00> : vector<8x128xf32>
    %7 = tpu.matmul %5, %6, %cst_8 {dimension_numbers = #tpu.dot_dimension_numbers<[1], [0], [0], [1], [0, 0, 1, 1], [], []>} : vector<8x384xbf16>, vector<384x128xbf16>, vector<8x128xf32> -> vector<8x128xf32>
    %8 = arith.maximumf %3, %7 : vector<8x128xf32>
    %c2 = arith.constant 2 : index
    %c0_9 = arith.constant 0 : index
    %c0_10 = arith.constant 0 : index
    %9 = vector.load %arg1[%c2, %c0_9, %c0_10] : memref<4x8x384xbf16, #tpu.memory_space<vmem>>, vector<1x8x384xbf16>
    %10 = vector.shape_cast %9 : vector<1x8x384xbf16> to vector<8x384xbf16>
    %c0_11 = arith.constant 0 : index
    %c0_12 = arith.constant 0 : index
    %11 = vector.load %arg2[%c0_11, %c0_12] : memref<384x128xbf16, #tpu.memory_space<vmem>>, vector<384x128xbf16>
    %cst_13 = arith.constant dense<0.000000e+00> : vector<8x128xf32>
    %12 = tpu.matmul %10, %11, %cst_13 {dimension_numbers = #tpu.dot_dimension_numbers<[1], [0], [0], [1], [0, 0, 1, 1], [], []>} : vector<8x384xbf16>, vector<384x128xbf16>, vector<8x128xf32> -> vector<8x128xf32>
    %13 = arith.maximumf %8, %12 : vector<8x128xf32>
    %c3 = arith.constant 3 : index
    %c0_14 = arith.constant 0 : index
    %c0_15 = arith.constant 0 : index
    %14 = vector.load %arg1[%c3, %c0_14, %c0_15] : memref<4x8x384xbf16, #tpu.memory_space<vmem>>, vector<1x8x384xbf16>
    %15 = vector.shape_cast %14 : vector<1x8x384xbf16> to vector<8x384xbf16>
    %c0_16 = arith.constant 0 : index
    %c0_17 = arith.constant 0 : index
    %16 = vector.load %arg2[%c0_16, %c0_17] : memref<384x128xbf16, #tpu.memory_space<vmem>>, vector<384x128xbf16>
    %cst_18 = arith.constant dense<0.000000e+00> : vector<8x128xf32>
    %17 = tpu.matmul %15, %16, %cst_18 {dimension_numbers = #tpu.dot_dimension_numbers<[1], [0], [0], [1], [0, 0, 1, 1], [], []>} : vector<8x384xbf16>, vector<384x128xbf16>, vector<8x128xf32> -> vector<8x128xf32>
    %18 = arith.maximumf %13, %17 : vector<8x128xf32>
    %c0_19 = arith.constant 0 : index
    %c0_20 = arith.constant 0 : index
    %19 = vector.load %arg3[%c0_19, %c0_20] : memref<1x128xf32, #tpu.memory_space<vmem>>, vector<1x128xf32>
    %20 = vector.broadcast %19 : vector<1x128xf32> to vector<8x128xf32>
    %21 = arith.addf %18, %20 : vector<8x128xf32>
    %cst_21 = arith.constant 0.000000e+00 : f32
    %22 = vector.broadcast %cst_21 : f32 to vector<8x128xf32>
    %23 = arith.maximumf %21, %22 : vector<8x128xf32>
    %24 = arith.truncf %23 : vector<8x128xf32> to vector<8x128xbf16>
    %c0_22 = arith.constant 0 : index
    %c0_23 = arith.constant 0 : index
    %25 = vector.load %arg4[%c0_22, %c0_23] : memref<8x128xbf16, #tpu.memory_space<vmem>>, vector<8x128xbf16>
    tpu.vector_store %arg4[%c0_22, %c0_23], %24 {strides = array<i32>} : memref<8x128xbf16, #tpu.memory_space<vmem>>, vector<8x128xbf16>,
    return
  }
  func.func @transform_0(%arg0: i32) -> (i32, i32, i32) {
    %c0_i32 = arith.constant 0 : i32
    %c0_i32_0 = arith.constant 0 : i32
    %c0_i32_1 = arith.constant 0 : i32
    return %c0_i32, %arg0, %c0_i32_0 : i32, i32, i32
  }
  func.func @transform_1(%arg0: i32) -> (i32, i32) {
    %c0_i32 = arith.constant 0 : i32
    %c0_i32_0 = arith.constant 0 : i32
    %c0_i32_1 = arith.constant 0 : i32
    return %c0_i32, %c0_i32_0 : i32, i32
  }
  func.func @transform_2(%arg0: i32) -> (i32, i32) {
    %c0_i32 = arith.constant 0 : i32
    %c0_i32_0 = arith.constant 0 : i32
    %c0_i32_1 = arith.constant 0 : i32
    return %c0_i32, %c0_i32_0 : i32, i32
  }
  func.func @transform_3(%arg0: i32) -> (i32, i32) {
    %c0_i32 = arith.constant 0 : i32
    %c0_i32_0 = arith.constant 0 : i32
    return %arg0, %c0_i32 : i32, i32
  }
}

module attributes {stable_mosaic.version = 11 : i64} {
  func.func @_convT_kernel(%arg0: i32, %arg1: memref<1x2x512xbf16, #tpu.memory_space<vmem>>, %arg2: memref<1x512x128xbf16, #tpu.memory_space<vmem>>, %arg3: memref<1x128xf32, #tpu.memory_space<vmem>>, %arg4: memref<1x2x128xbf16, #tpu.memory_space<vmem>>) attributes {dimension_semantics = [#tpu.dimension_semantics<parallel>], iteration_bounds = array<i64: 4>, scalar_prefetch = 0 : i64, scratch_operands = 0 : i64, tpu.core_type = #tpu.core_type<tc>, window_params = [{transform_indices = @transform_0, window_bounds = array<i64: 1, 2, 512>}, {transform_indices = @transform_1, window_bounds = array<i64: 1, 512, 128>}, {pipeline_mode = #tpu.pipeline_mode<synchronous>, transform_indices = @transform_2, window_bounds = array<i64: 1, 128>}, {transform_indices = @transform_3, window_bounds = array<i64: 1, 2, 128>}]} {
    %c0 = arith.constant 0 : index
    %c0_0 = arith.constant 0 : index
    %c0_1 = arith.constant 0 : index
    %0 = vector.load %arg1[%c0, %c0_0, %c0_1] : memref<1x2x512xbf16, #tpu.memory_space<vmem>>, vector<1x2x512xbf16>
    %1 = vector.shape_cast %0 : vector<1x2x512xbf16> to vector<2x512xbf16>
    %c0_2 = arith.constant 0 : index
    %c0_3 = arith.constant 0 : index
    %c0_4 = arith.constant 0 : index
    %2 = vector.load %arg2[%c0_2, %c0_3, %c0_4] : memref<1x512x128xbf16, #tpu.memory_space<vmem>>, vector<1x512x128xbf16>
    %3 = vector.shape_cast %2 : vector<1x512x128xbf16> to vector<512x128xbf16>
    %cst = arith.constant dense<0.000000e+00> : vector<2x128xf32>
    %4 = tpu.matmul %1, %3, %cst {dimension_numbers = #tpu.dot_dimension_numbers<[1], [0], [0], [1], [0, 0, 1, 1], [], []>} : vector<2x512xbf16>, vector<512x128xbf16>, vector<2x128xf32> -> vector<2x128xf32>
    %c0_5 = arith.constant 0 : index
    %c0_6 = arith.constant 0 : index
    %5 = vector.load %arg3[%c0_5, %c0_6] : memref<1x128xf32, #tpu.memory_space<vmem>>, vector<1x128xf32>
    %6 = vector.broadcast %5 : vector<1x128xf32> to vector<2x128xf32>
    %7 = arith.addf %4, %6 : vector<2x128xf32>
    %cst_7 = arith.constant 0.000000e+00 : f32
    %8 = vector.broadcast %cst_7 : f32 to vector<2x128xf32>
    %9 = arith.maximumf %7, %8 : vector<2x128xf32>
    %10 = arith.truncf %9 : vector<2x128xf32> to vector<2x128xbf16>
    %c0_8 = arith.constant 0 : index
    %c0_9 = arith.constant 0 : index
    %c0_10 = arith.constant 0 : index
    %11 = vector.load %arg4[%c0_8, %c0_9, %c0_10] : memref<1x2x128xbf16, #tpu.memory_space<vmem>>, vector<1x2x128xbf16>
    %12 = vector.shape_cast %11 : vector<1x2x128xbf16> to vector<2x128xbf16>
    %13 = vector.shape_cast %10 : vector<2x128xbf16> to vector<1x2x128xbf16>
    tpu.vector_store %arg4[%c0_8, %c0_9, %c0_10], %13 {strides = array<i32>} : memref<1x2x128xbf16, #tpu.memory_space<vmem>>, vector<1x2x128xbf16>,
    return
  }
  func.func @transform_0(%arg0: i32) -> (i32, i32, i32) {
    %c0_i32 = arith.constant 0 : i32
    %c0_i32_0 = arith.constant 0 : i32
    %c0_i32_1 = arith.constant 0 : i32
    return %arg0, %c0_i32, %c0_i32_0 : i32, i32, i32
  }
  func.func @transform_1(%arg0: i32) -> (i32, i32, i32) {
    %c0_i32 = arith.constant 0 : i32
    %c0_i32_0 = arith.constant 0 : i32
    %c0_i32_1 = arith.constant 0 : i32
    return %arg0, %c0_i32, %c0_i32_0 : i32, i32, i32
  }
  func.func @transform_2(%arg0: i32) -> (i32, i32) {
    %c0_i32 = arith.constant 0 : i32
    %c0_i32_0 = arith.constant 0 : i32
    %c0_i32_1 = arith.constant 0 : i32
    return %c0_i32, %c0_i32_0 : i32, i32
  }
  func.func @transform_3(%arg0: i32) -> (i32, i32, i32) {
    %c0_i32 = arith.constant 0 : i32
    %c0_i32_0 = arith.constant 0 : i32
    %c0_i32_1 = arith.constant 0 : i32
    return %arg0, %c0_i32, %c0_i32_0 : i32, i32, i32
  }
}

module attributes {stable_mosaic.version = 11 : i64} {
  func.func @_convT_kernel(%arg0: i32, %arg1: memref<1x8x256xbf16, #tpu.memory_space<vmem>>, %arg2: memref<1x256x128xbf16, #tpu.memory_space<vmem>>, %arg3: memref<1x128xf32, #tpu.memory_space<vmem>>, %arg4: memref<1x8x128xbf16, #tpu.memory_space<vmem>>) attributes {dimension_semantics = [#tpu.dimension_semantics<parallel>], iteration_bounds = array<i64: 4>, scalar_prefetch = 0 : i64, scratch_operands = 0 : i64, tpu.core_type = #tpu.core_type<tc>, window_params = [{transform_indices = @transform_0, window_bounds = array<i64: 1, 8, 256>}, {transform_indices = @transform_1, window_bounds = array<i64: 1, 256, 128>}, {pipeline_mode = #tpu.pipeline_mode<synchronous>, transform_indices = @transform_2, window_bounds = array<i64: 1, 128>}, {transform_indices = @transform_3, window_bounds = array<i64: 1, 8, 128>}]} {
    %c0 = arith.constant 0 : index
    %c0_0 = arith.constant 0 : index
    %c0_1 = arith.constant 0 : index
    %0 = vector.load %arg1[%c0, %c0_0, %c0_1] : memref<1x8x256xbf16, #tpu.memory_space<vmem>>, vector<1x8x256xbf16>
    %1 = vector.shape_cast %0 : vector<1x8x256xbf16> to vector<8x256xbf16>
    %c0_2 = arith.constant 0 : index
    %c0_3 = arith.constant 0 : index
    %c0_4 = arith.constant 0 : index
    %2 = vector.load %arg2[%c0_2, %c0_3, %c0_4] : memref<1x256x128xbf16, #tpu.memory_space<vmem>>, vector<1x256x128xbf16>
    %3 = vector.shape_cast %2 : vector<1x256x128xbf16> to vector<256x128xbf16>
    %cst = arith.constant dense<0.000000e+00> : vector<8x128xf32>
    %4 = tpu.matmul %1, %3, %cst {dimension_numbers = #tpu.dot_dimension_numbers<[1], [0], [0], [1], [0, 0, 1, 1], [], []>} : vector<8x256xbf16>, vector<256x128xbf16>, vector<8x128xf32> -> vector<8x128xf32>
    %c0_5 = arith.constant 0 : index
    %c0_6 = arith.constant 0 : index
    %5 = vector.load %arg3[%c0_5, %c0_6] : memref<1x128xf32, #tpu.memory_space<vmem>>, vector<1x128xf32>
    %6 = vector.broadcast %5 : vector<1x128xf32> to vector<8x128xf32>
    %7 = arith.addf %4, %6 : vector<8x128xf32>
    %cst_7 = arith.constant 0.000000e+00 : f32
    %8 = vector.broadcast %cst_7 : f32 to vector<8x128xf32>
    %9 = arith.maximumf %7, %8 : vector<8x128xf32>
    %10 = arith.truncf %9 : vector<8x128xf32> to vector<8x128xbf16>
    %c0_8 = arith.constant 0 : index
    %c0_9 = arith.constant 0 : index
    %c0_10 = arith.constant 0 : index
    %11 = vector.load %arg4[%c0_8, %c0_9, %c0_10] : memref<1x8x128xbf16, #tpu.memory_space<vmem>>, vector<1x8x128xbf16>
    %12 = vector.shape_cast %11 : vector<1x8x128xbf16> to vector<8x128xbf16>
    %13 = vector.shape_cast %10 : vector<8x128xbf16> to vector<1x8x128xbf16>
    tpu.vector_store %arg4[%c0_8, %c0_9, %c0_10], %13 {strides = array<i32>} : memref<1x8x128xbf16, #tpu.memory_space<vmem>>, vector<1x8x128xbf16>,
    return
  }
  func.func @transform_0(%arg0: i32) -> (i32, i32, i32) {
    %c0_i32 = arith.constant 0 : i32
    %c0_i32_0 = arith.constant 0 : i32
    %c0_i32_1 = arith.constant 0 : i32
    return %arg0, %c0_i32, %c0_i32_0 : i32, i32, i32
  }
  func.func @transform_1(%arg0: i32) -> (i32, i32, i32) {
    %c0_i32 = arith.constant 0 : i32
    %c0_i32_0 = arith.constant 0 : i32
    %c0_i32_1 = arith.constant 0 : i32
    return %arg0, %c0_i32, %c0_i32_0 : i32, i32, i32
  }
  func.func @transform_2(%arg0: i32) -> (i32, i32) {
    %c0_i32 = arith.constant 0 : i32
    %c0_i32_0 = arith.constant 0 : i32
    %c0_i32_1 = arith.constant 0 : i32
    return %c0_i32, %c0_i32_0 : i32, i32
  }
  func.func @transform_3(%arg0: i32) -> (i32, i32, i32) {
    %c0_i32 = arith.constant 0 : i32
    %c0_i32_0 = arith.constant 0 : i32
    %c0_i32_1 = arith.constant 0 : i32
    return %arg0, %c0_i32, %c0_i32_0 : i32, i32, i32
  }
}

module attributes {stable_mosaic.version = 11 : i64} {
  func.func @_convT_kernel(%arg0: i32, %arg1: memref<1x32x128xbf16, #tpu.memory_space<vmem>>, %arg2: memref<1x128x128xbf16, #tpu.memory_space<vmem>>, %arg3: memref<1x128xf32, #tpu.memory_space<vmem>>, %arg4: memref<1x32x128xbf16, #tpu.memory_space<vmem>>) attributes {dimension_semantics = [#tpu.dimension_semantics<parallel>], iteration_bounds = array<i64: 4>, scalar_prefetch = 0 : i64, scratch_operands = 0 : i64, tpu.core_type = #tpu.core_type<tc>, window_params = [{transform_indices = @transform_0, window_bounds = array<i64: 1, 32, 128>}, {transform_indices = @transform_1, window_bounds = array<i64: 1, 128, 128>}, {pipeline_mode = #tpu.pipeline_mode<synchronous>, transform_indices = @transform_2, window_bounds = array<i64: 1, 128>}, {transform_indices = @transform_3, window_bounds = array<i64: 1, 32, 128>}]} {
    %c0 = arith.constant 0 : index
    %c0_0 = arith.constant 0 : index
    %c0_1 = arith.constant 0 : index
    %0 = vector.load %arg1[%c0, %c0_0, %c0_1] : memref<1x32x128xbf16, #tpu.memory_space<vmem>>, vector<1x32x128xbf16>
    %1 = vector.shape_cast %0 : vector<1x32x128xbf16> to vector<32x128xbf16>
    %c0_2 = arith.constant 0 : index
    %c0_3 = arith.constant 0 : index
    %c0_4 = arith.constant 0 : index
    %2 = vector.load %arg2[%c0_2, %c0_3, %c0_4] : memref<1x128x128xbf16, #tpu.memory_space<vmem>>, vector<1x128x128xbf16>
    %3 = vector.shape_cast %2 : vector<1x128x128xbf16> to vector<128x128xbf16>
    %cst = arith.constant dense<0.000000e+00> : vector<32x128xf32>
    %4 = tpu.matmul %1, %3, %cst {dimension_numbers = #tpu.dot_dimension_numbers<[1], [0], [0], [1], [0, 0, 1, 1], [], []>} : vector<32x128xbf16>, vector<128x128xbf16>, vector<32x128xf32> -> vector<32x128xf32>
    %c0_5 = arith.constant 0 : index
    %c0_6 = arith.constant 0 : index
    %5 = vector.load %arg3[%c0_5, %c0_6] : memref<1x128xf32, #tpu.memory_space<vmem>>, vector<1x128xf32>
    %6 = vector.broadcast %5 : vector<1x128xf32> to vector<32x128xf32>
    %7 = arith.addf %4, %6 : vector<32x128xf32>
    %cst_7 = arith.constant 0.000000e+00 : f32
    %8 = vector.broadcast %cst_7 : f32 to vector<32x128xf32>
    %9 = arith.maximumf %7, %8 : vector<32x128xf32>
    %10 = arith.truncf %9 : vector<32x128xf32> to vector<32x128xbf16>
    %c0_8 = arith.constant 0 : index
    %c0_9 = arith.constant 0 : index
    %c0_10 = arith.constant 0 : index
    %11 = vector.load %arg4[%c0_8, %c0_9, %c0_10] : memref<1x32x128xbf16, #tpu.memory_space<vmem>>, vector<1x32x128xbf16>
    %12 = vector.shape_cast %11 : vector<1x32x128xbf16> to vector<32x128xbf16>
    %13 = vector.shape_cast %10 : vector<32x128xbf16> to vector<1x32x128xbf16>
    tpu.vector_store %arg4[%c0_8, %c0_9, %c0_10], %13 {strides = array<i32>} : memref<1x32x128xbf16, #tpu.memory_space<vmem>>, vector<1x32x128xbf16>,
    return
  }
  func.func @transform_0(%arg0: i32) -> (i32, i32, i32) {
    %c0_i32 = arith.constant 0 : i32
    %c0_i32_0 = arith.constant 0 : i32
    %c0_i32_1 = arith.constant 0 : i32
    return %arg0, %c0_i32, %c0_i32_0 : i32, i32, i32
  }
  func.func @transform_1(%arg0: i32) -> (i32, i32, i32) {
    %c0_i32 = arith.constant 0 : i32
    %c0_i32_0 = arith.constant 0 : i32
    %c0_i32_1 = arith.constant 0 : i32
    return %arg0, %c0_i32, %c0_i32_0 : i32, i32, i32
  }
  func.func @transform_2(%arg0: i32) -> (i32, i32) {
    %c0_i32 = arith.constant 0 : i32
    %c0_i32_0 = arith.constant 0 : i32
    %c0_i32_1 = arith.constant 0 : i32
    return %c0_i32, %c0_i32_0 : i32, i32
  }
  func.func @transform_3(%arg0: i32) -> (i32, i32, i32) {
    %c0_i32 = arith.constant 0 : i32
    %c0_i32_0 = arith.constant 0 : i32
    %c0_i32_1 = arith.constant 0 : i32
    return %arg0, %c0_i32, %c0_i32_0 : i32, i32, i32
  }
}

module attributes {stable_mosaic.version = 11 : i64} {
  func.func @_convT_kernel(%arg0: i32, %arg1: memref<1x128x128xbf16, #tpu.memory_space<vmem>>, %arg2: memref<1x128x128xbf16, #tpu.memory_space<vmem>>, %arg3: memref<1x128xf32, #tpu.memory_space<vmem>>, %arg4: memref<1x128x128xf32, #tpu.memory_space<vmem>>) attributes {dimension_semantics = [#tpu.dimension_semantics<parallel>], iteration_bounds = array<i64: 4>, scalar_prefetch = 0 : i64, scratch_operands = 0 : i64, tpu.core_type = #tpu.core_type<tc>, window_params = [{transform_indices = @transform_0, window_bounds = array<i64: 1, 128, 128>}, {transform_indices = @transform_1, window_bounds = array<i64: 1, 128, 128>}, {pipeline_mode = #tpu.pipeline_mode<synchronous>, transform_indices = @transform_2, window_bounds = array<i64: 1, 128>}, {transform_indices = @transform_3, window_bounds = array<i64: 1, 128, 128>}]} {
    %c0 = arith.constant 0 : index
    %c0_0 = arith.constant 0 : index
    %c0_1 = arith.constant 0 : index
    %0 = vector.load %arg1[%c0, %c0_0, %c0_1] : memref<1x128x128xbf16, #tpu.memory_space<vmem>>, vector<1x128x128xbf16>
    %1 = vector.shape_cast %0 : vector<1x128x128xbf16> to vector<128x128xbf16>
    %c0_2 = arith.constant 0 : index
    %c0_3 = arith.constant 0 : index
    %c0_4 = arith.constant 0 : index
    %2 = vector.load %arg2[%c0_2, %c0_3, %c0_4] : memref<1x128x128xbf16, #tpu.memory_space<vmem>>, vector<1x128x128xbf16>
    %3 = vector.shape_cast %2 : vector<1x128x128xbf16> to vector<128x128xbf16>
    %cst = arith.constant dense<0.000000e+00> : vector<128x128xf32>
    %4 = tpu.matmul %1, %3, %cst {dimension_numbers = #tpu.dot_dimension_numbers<[1], [0], [0], [1], [0, 0, 1, 1], [], []>} : vector<128x128xbf16>, vector<128x128xbf16>, vector<128x128xf32> -> vector<128x128xf32>
    %c0_5 = arith.constant 0 : index
    %c0_6 = arith.constant 0 : index
    %5 = vector.load %arg3[%c0_5, %c0_6] : memref<1x128xf32, #tpu.memory_space<vmem>>, vector<1x128xf32>
    %6 = vector.broadcast %5 : vector<1x128xf32> to vector<128x128xf32>
    %7 = arith.addf %4, %6 : vector<128x128xf32>
    %cst_7 = arith.constant 0.000000e+00 : f32
    %8 = vector.broadcast %cst_7 : f32 to vector<128x128xf32>
    %9 = arith.subf %8, %7 : vector<128x128xf32>
    %10 = math.exp %9 : vector<128x128xf32>
    %cst_8 = arith.constant 1.000000e+00 : f32
    %11 = vector.broadcast %cst_8 : f32 to vector<128x128xf32>
    %12 = arith.addf %11, %10 : vector<128x128xf32>
    %cst_9 = arith.constant 1.000000e+00 : f32
    %13 = vector.broadcast %cst_9 : f32 to vector<128x128xf32>
    %14 = arith.divf %13, %12 : vector<128x128xf32>
    %c0_10 = arith.constant 0 : index
    %c0_11 = arith.constant 0 : index
    %c0_12 = arith.constant 0 : index
    %15 = vector.load %arg4[%c0_10, %c0_11, %c0_12] : memref<1x128x128xf32, #tpu.memory_space<vmem>>, vector<1x128x128xf32>
    %16 = vector.shape_cast %15 : vector<1x128x128xf32> to vector<128x128xf32>
    %17 = vector.shape_cast %14 : vector<128x128xf32> to vector<1x128x128xf32>
    tpu.vector_store %arg4[%c0_10, %c0_11, %c0_12], %17 {strides = array<i32>} : memref<1x128x128xf32, #tpu.memory_space<vmem>>, vector<1x128x128xf32>,
    return
  }
  func.func @transform_0(%arg0: i32) -> (i32, i32, i32) {
    %c0_i32 = arith.constant 0 : i32
    %c0_i32_0 = arith.constant 0 : i32
    %c0_i32_1 = arith.constant 0 : i32
    return %arg0, %c0_i32, %c0_i32_0 : i32, i32, i32
  }
  func.func @transform_1(%arg0: i32) -> (i32, i32, i32) {
    %c0_i32 = arith.constant 0 : i32
    %c0_i32_0 = arith.constant 0 : i32
    %c0_i32_1 = arith.constant 0 : i32
    return %arg0, %c0_i32, %c0_i32_0 : i32, i32, i32
  }
  func.func @transform_2(%arg0: i32) -> (i32, i32) {
    %c0_i32 = arith.constant 0 : i32
    %c0_i32_0 = arith.constant 0 : i32
    %c0_i32_1 = arith.constant 0 : i32
    return %c0_i32, %c0_i32_0 : i32, i32
  }
  func.func @transform_3(%arg0: i32) -> (i32, i32, i32) {
    %c0_i32 = arith.constant 0 : i32
    %c0_i32_0 = arith.constant 0 : i32
    %c0_i32_1 = arith.constant 0 : i32
    return %arg0, %c0_i32, %c0_i32_0 : i32, i32, i32
  }
}

</mosaic_0001>

<bundles_post_ra>
// kernel: generator_forward.10
= control target key start
LH: loop header
LB: loop body
LE: loop exit
PB: predicated region body
PF: predicated region fallthrough
CT: control target
= control target key end

     0   :  { %v363_v3 = vmov 0   ;;  %vm106_vm0 = vcmask 130048   ;;  %v26_v18 = vlaneseq  ;;  %v364_v25 = vmov 1966171168   ;;  %s418_s1 = inlined_call_operand.vmem [shape: bf16[16,1024], index: 1, kind: input, shape index: {}]   ;;  %s419_s0 = inlined_call_operand.vmem [shape: bf16[2,16], index: 0, kind: input, shape index: {}]   ;;  %s420_s2 = inlined_call_operand.vmem [shape: f32[1,1024], index: 2, kind: input, shape index: {}]   ;;  %s421_s3 = inlined_call_operand.vmem [shape: bf16[2,1024], index: 3, kind: output, shape index: {}]  }
   0x1   :  { %v16_v0 = vld [vmem:[%s418_s1] sm:$0xff]  ;;  %v17_v2 = vld [vmem:[%s418_s1 + $0x8] sm:$0xff]  ;;  %142 = vmatprep.mubr.bf16.mxu0 %v363_v3  ;;  %183 = vmatprep.mubr.bf16.mxu1 %v363_v3  ;;  %v18_v7 = vld [vmem:[%s418_s1 + $0x10] sm:$0xff]  ;;  %v295_v26 = vunpack.c.l.s4 %v364_v25 }
   0x2   :  { %v20_v1 = vld [vmem:[%s418_s1 + $0x20] sm:$0xff]  ;;  %v21_v5 = vld [vmem:[%s418_s1 + $0x28] sm:$0xff]  ;;  %v22_v10 = vld [vmem:[%s418_s1 + $0x30] sm:$0xff]  ;;  %v27_v19 = vshrl.u32 %v26_v18, 7 }
   0x3   :  { %v346_v4 = vcombine.high %v16_v0, %v20_v1  ;;  %v345_v6 = vcombine.low %v16_v0, %v20_v1  ;;  %v348_v8 = vcombine.high %v17_v2, %v21_v5  ;;  %v347_v9 = vcombine.low %v17_v2, %v21_v5  ;;  %v19_v11 = vld [vmem:[%s418_s1 + $0x18] sm:$0xff]  ;;  %v15_v15 = vld [vmem:[%s419_s0] sm:$0x1] }
   0x4   :  { %v23_v12 = vld [vmem:[%s418_s1 + $0x38] sm:$0xff]  ;;  %v350_v13 = vcombine.high %v18_v7, %v22_v10  ;;  %v349_v16 = vcombine.low %v18_v7, %v22_v10  ;;  %v32_v20 = vsub.s32 1, %v27_v19  ;;  %v40_v21 = vsub.s32 3, %v27_v19  ;;  %v24_v24 = vld [vmem:[%s420_s2] sm:$0xff] }
   0x5   :  { %124 = vmatprep.subr.bf16.mxu0 %v346_v4  ;;  %v352_v14 = vcombine.high %v19_v11, %v23_v12  ;;  %165 = vmatprep.subr.bf16.mxu1 %v348_v8  ;;  %v351_v17 = vcombine.low %v19_v11, %v23_v12  ;;  %v28_v22 = vsub.s32 0, %v27_v19  ;;  %v36_v23 = vsub.s32 2, %v27_v19 }
   0x6   :  { %125 = vmatpush1.bf16.msra.mxu0 %v345_v6  ;;  %166 = vmatpush1.bf16.msra.mxu1 %v347_v9  ;;  %v33_v28 = vrot.slane %v24_v24, %v32_v20  ;;  %v41_v29 = vrot.slane %v24_v24, %v40_v21  ;;  %v296_v34 = vunpack.c.0.s8 %v295_v26  ;;  %v44_v36 = vsub.s32 4, %v27_v19 }
   0x7   :  { %206 = vmatprep.subr.bf16.mxu0 %v350_v13  ;;  %247 = vmatprep.subr.bf16.mxu1 %v352_v14  ;;  %v29_v31 = vrot.slane %v24_v24, %v28_v22  ;;  %v37_v32 = vrot.slane %v24_v24, %v36_v23  ;;  %v48_v37 = vsub.s32 5, %v27_v19  ;;  %v52_v41 = vsub.s32 6, %v27_v19 }
   0x8   :  { %v56_v42 = vsub.s32 7, %v27_v19  ;;  %v299_v47 = vsub.s32 %v296_v34, %v27_v19  ;;  %v45_v49 = vrot.slane %v24_v24, %v44_v36 }
   0x9   :  { %353 = vmatmul.mubr.msk.bf16.vlgmr.msra.gmra.mxu0 %vm106_vm0, %v15_v15  ;;  %354 = vmatmul.mubr.msk.bf16.vlgmr.msra.gmra.mxu1 %vm106_vm0, %v15_v15  ;;  %v49_v50 = vrot.slane %v24_v24, %v48_v37  ;;  %v53_v54 = vrot.slane %v24_v24, %v52_v41 }
   0xa   :  { %207 = vmatpush1.bf16.msra.mxu0 %v349_v16  ;;  %248 = vmatpush1.bf16.msra.mxu1 %v351_v17  ;;  %v57_v55 = vrot.slane %v24_v24, %v56_v42 }
   0xb   :  { %224 = vmatprep.mubr.bf16.mxu0 %v363_v3  ;;  %265 = vmatprep.mubr.bf16.mxu1 %v363_v3 }
  0x11   :  { %355 = vmatmul.mubr.msk.bf16.vlgmr.msra.gmra.mxu0 %vm106_vm0, %v15_v15  ;;  %356 = vmatmul.mubr.msk.bf16.vlgmr.msra.gmra.mxu1 %vm106_vm0, %v15_v15 }
  0xc9   :  { %v144_v27 = vpop.f32.mrf.mxu0  ;;  %v185_v30 = vpop.f32.mrf.mxu1 }
  0xca   :  { %v145_v44 = vadd.f32 %v144_v27, %v29_v31  ;;  %v186_v45 = vadd.f32 %v185_v30, %v37_v32 }
  0xcb   :  { %v146_v33 = vpop.f32.mrf.mxu0  ;;  %v187_v35 = vpop.f32.mrf.mxu1 }
  0xcc   :  { %v147_v38 = vadd.f32 %v146_v33, %v33_v28  ;;  %v188_v39 = vadd.f32 %v187_v35, %v41_v29 }
  0xcd   :  { %v148_v40 = vpop.f32.mrf.mxu0  ;;  %v189_v43 = vpop.f32.mrf.mxu1 }
  0xce   :  { %v357_v51 = vpack.c.bf16 %v147_v38, %v145_v44  ;;  %v358_v52 = vpack.c.bf16 %v188_v39, %v186_v45 }
  0xcf   :  { %v149_v46 = vpop.f32.mrf.mxu0  ;;  %v190_v48 = vpop.f32.mrf.mxu1 }
  0xd0   :  { %v300_v61 = vrot.slane %v357_v51, %v299_v47  ;;  %v307_v62 = vrot.slane %v358_v52, %v299_v47 }
  0xd1   :  { %v226_v53 = vpop.f32.mrf.mxu0  ;;  %v267_v56 = vpop.f32.mrf.mxu1 }
  0xd2   :  { %v227_v58 = vadd.f32 %v226_v53, %v45_v49  ;;  %v268_v63 = vadd.f32 %v267_v56, %v53_v54  ;;  %v322_v8 = vcombine.low %v300_v61, %v307_v62 }
  0xd3   :  { %v228_v57 = vpop.f32.mrf.mxu0  ;;  %v269_v60 = vpop.f32.mrf.mxu1 }
  0xd4   :  { %v229_v59 = vadd.f32 %v228_v57, %v49_v50  ;;  %v270_v0 = vadd.f32 %v269_v60, %v57_v55  ;;  %v330_v11 = vrot.slane %v322_v8, %v299_v47 }
  0xd5   :  { %v230_v1 = vpop.f32.mrf.mxu0  ;;  %v271_v3 = vpop.f32.mrf.mxu1 }
  0xd6   :  { %v359_v2 = vpack.c.bf16 %v229_v59, %v227_v58  ;;  %v360_v4 = vpack.c.bf16 %v270_v0, %v268_v63 }
  0xd7   :  { %v231_v5 = vpop.f32.mrf.mxu0  ;;  %v272_v7 = vpop.f32.mrf.mxu1 }
  0xd8   :  { %v314_v6 = vrot.slane %v359_v2, %v299_v47  ;;  %v321_v9 = vrot.slane %v360_v4, %v299_v47 }
  0xda   :  { %v323_v10 = vcombine.low %v314_v6, %v321_v9 }
  0xdc   :  { %v337_v12 = vrot.slane %v323_v10, %v299_v47 }
  0xde   :  { %v338_v13 = vcombine.low %v330_v11, %v337_v12 }
  0xe0   :  { %340 = vst [vmem:[%s421_s3] sm:$0xff] %v338_v13 }

// kernel: generator_forward.11
= control target key start
LH: loop header
LB: loop body
LE: loop exit
PB: predicated region body
PF: predicated region fallthrough
CT: control target
= control target key end

     0   :  { %s3108_s12 = smov 0   ;;  %s3110_s13 = smov 0   ;;  %s3737_s0 = inlined_call_operand.vmem [shape: bf16[4,512,128], index: 0, kind: input, shape index: {}]   ;;  %s3738_s1 = inlined_call_operand.vmem [shape: bf16[128,128], index: 1, kind: input, shape index: {}]   ;;  %s3739_s2 = inlined_call_operand.vmem [shape: f32[1,128], index: 2, kind: input, shape index: {}]   ;;  %s3740_s3 = inlined_call_operand.vmem [shape: bf16[512,128], index: 3, kind: output, shape index: {}]  }
   0x1   :  { %s3112_s14 = smov 0  }
   0x2 LB: > { %s2338_s15 = sadd.s32 4294967295, %s3086_s14   ;;  %s3125_s16 = sadd.s32 1, %s3086_s14   ;;  %s3086_s14 = sphi %s3112_s14, %s3793_s14   ;;  %s3082_s13 = sphi %s3110_s13, %s3792_s13   ;;  %s3078_s12 = sphi %s3108_s12, %s3791_s12  }
   0x3   : > { %s17_s17 = ssub.s32 %s3086_s14, %s3125_s16  ;;  %s20_s18 = sadd.s32 1, %s3082_s13 }
   0x4   : > { %p18_p0 = scmp.eq.s32.totalorder %s17_s17, 0  ;;  %p27_p1 = scmp.ne.s32.totalorder %s3082_s13, %s3078_s12 }
   0x5   : > { %p28_p2 = scmp.eq.s32.totalorder %s3086_s14, 0  ;;  %p2341_p4 = scmp.ge.s32.totalorder %s3086_s14, 2 }
   0x6   : > { %s3134_s19 = scalar_select %p18_p0, %s3082_s13, %s20_s18  }
   0x7   : > { %p29_p3 = por %p28_p2, %p27_p1  ;;  %127 = sbr.rel (%p2341_p4) target bundleno = 48 (0x30), region = 24 }
   0xc   : > { %130 = sbr.rel (!%p29_p3) target bundleno = 48 (0x30), region = 28  ;;  %s132_s20 = sand.u32 (%p29_p3), 1, %s3082_s13  }
   0xd   : > { %s2552_s21 = sshll.u32 (%p29_p3), %s3086_s14, 7  ;;  %s2342_s22 = sshll.u32 (%p29_p3), %s132_s20, 9 }
   0xe   : > { %s3142_s25 = scalar_lea.vmem (%p29_p3), %s3737_s0, %s2552_s21  ;;  %s3147_s26 = scalar_lea.vmem (%p29_p3), [#allocation2], %s2342_s22 }
   0xf   : > { %v154_v0 = vld [vmem:[%s3142_s25] sm:$0xff] (%p29_p3)   ;;  %v158_v1 = vld [vmem:[%s3142_s25 + $0x8] sm:$0xff] (%p29_p3)   ;;  %v162_v2 = vld [vmem:[%s3142_s25 + $0x10] sm:$0xff] (%p29_p3)  }
  0x10   : > { %155 = vst [vmem:[%s3147_s26] sm:$0xff] (%p29_p3), %v154_v0   ;;  %159 = vst [vmem:[%s3147_s26 + $0x8] sm:$0xff] (%p29_p3), %v158_v1   ;;  %v166_v3 = vld [vmem:[%s3142_s25 + $0x18] sm:$0xff] (%p29_p3)   ;;  %v170_v4 = vld [vmem:[%s3142_s25 + $0x20] sm:$0xff] (%p29_p3)  }
  0x11   : > { %163 = vst [vmem:[%s3147_s26 + $0x10] sm:$0xff] %v162_v2   ;;  %v174_v5 = vld [vmem:[%s3142_s25 + $0x28] sm:$0xff]   ;;  %167 = vst [vmem:[%s3147_s26 + $0x18] sm:$0xff] %v166_v3   ;;  %v178_v6 = vld [vmem:[%s3142_s25 + $0x30] sm:$0xff]  }
  0x12   : > { %171 = vst [vmem:[%s3147_s26 + $0x20] sm:$0xff] %v170_v4   ;;  %175 = vst [vmem:[%s3147_s26 + $0x28] sm:$0xff] %v174_v5   ;;  %v182_v7 = vld [vmem:[%s3142_s25 + $0x38] sm:$0xff]   ;;  %v186_v8 = vld [vmem:[%s3142_s25 + $0x40] sm:$0xff]  }
  0x13   : > { %179 = vst [vmem:[%s3147_s26 + $0x30] sm:$0xff] %v178_v6   ;;  %183 = vst [vmem:[%s3147_s26 + $0x38] sm:$0xff] %v182_v7   ;;  %v190_v9 = vld [vmem:[%s3142_s25 + $0x48] sm:$0xff]   ;;  %v194_v10 = vld [vmem:[%s3142_s25 + $0x50] sm:$0xff]  }
  0x14   : > { %187 = vst [vmem:[%s3147_s26 + $0x40] sm:$0xff] %v186_v8   ;;  %v198_v11 = vld [vmem:[%s3142_s25 + $0x58] sm:$0xff]   ;;  %191 = vst [vmem:[%s3147_s26 + $0x48] sm:$0xff] %v190_v9   ;;  %v202_v12 = vld [vmem:[%s3142_s25 + $0x60] sm:$0xff]  }
  0x15   : > { %195 = vst [vmem:[%s3147_s26 + $0x50] sm:$0xff] %v194_v10   ;;  %199 = vst [vmem:[%s3147_s26 + $0x58] sm:$0xff] %v198_v11   ;;  %v206_v13 = vld [vmem:[%s3142_s25 + $0x68] sm:$0xff]   ;;  %v210_v14 = vld [vmem:[%s3142_s25 + $0x70] sm:$0xff]  }
  0x16   : > { %203 = vst [vmem:[%s3147_s26 + $0x60] sm:$0xff] %v202_v12   ;;  %207 = vst [vmem:[%s3147_s26 + $0x68] sm:$0xff] %v206_v13   ;;  %v214_v15 = vld [vmem:[%s3142_s25 + $0x78] sm:$0xff]   ;;  %v218_v16 = vld [vmem:[%s3142_s25 + $0x100] sm:$0xff]  }
  0x17   : > { %211 = vst [vmem:[%s3147_s26 + $0x70] sm:$0xff] %v210_v14   ;;  %v222_v17 = vld [vmem:[%s3142_s25 + $0x108] sm:$0xff]   ;;  %215 = vst [vmem:[%s3147_s26 + $0x78] sm:$0xff] %v214_v15   ;;  %v226_v18 = vld [vmem:[%s3142_s25 + $0x110] sm:$0xff]  }
  0x18   : > { %219 = vst [vmem:[%s3147_s26 + $0x80] sm:$0xff] %v218_v16   ;;  %223 = vst [vmem:[%s3147_s26 + $0x88] sm:$0xff] %v222_v17   ;;  %v230_v19 = vld [vmem:[%s3142_s25 + $0x118] sm:$0xff]   ;;  %v234_v20 = vld [vmem:[%s3142_s25 + $0x120] sm:$0xff]  }
  0x19   : > { %227 = vst [vmem:[%s3147_s26 + $0x90] sm:$0xff] %v226_v18   ;;  %231 = vst [vmem:[%s3147_s26 + $0x98] sm:$0xff] %v230_v19   ;;  %v238_v21 = vld [vmem:[%s3142_s25 + $0x128] sm:$0xff]   ;;  %v242_v22 = vld [vmem:[%s3142_s25 + $0x130] sm:$0xff]  }
  0x1a   : > { %235 = vst [vmem:[%s3147_s26 + $0xa0] sm:$0xff] %v234_v20   ;;  %v246_v23 = vld [vmem:[%s3142_s25 + $0x138] sm:$0xff]   ;;  %239 = vst [vmem:[%s3147_s26 + $0xa8] sm:$0xff] %v238_v21   ;;  %v250_v24 = vld [vmem:[%s3142_s25 + $0x140] sm:$0xff]  }
  0x1b   : > { %243 = vst [vmem:[%s3147_s26 + $0xb0] sm:$0xff] %v242_v22   ;;  %247 = vst [vmem:[%s3147_s26 + $0xb8] sm:$0xff] %v246_v23   ;;  %v254_v25 = vld [vmem:[%s3142_s25 + $0x148] sm:$0xff]   ;;  %v258_v26 = vld [vmem:[%s3142_s25 + $0x150] sm:$0xff]  }
  0x1c   : > { %251 = vst [vmem:[%s3147_s26 + $0xc0] sm:$0xff] %v250_v24   ;;  %255 = vst [vmem:[%s3147_s26 + $0xc8] sm:$0xff] %v254_v25   ;;  %v262_v27 = vld [vmem:[%s3142_s25 + $0x158] sm:$0xff]   ;;  %v266_v28 = vld [vmem:[%s3142_s25 + $0x160] sm:$0xff]  }
  0x1d   : > { %259 = vst [vmem:[%s3147_s26 + $0xd0] sm:$0xff] %v258_v26   ;;  %v270_v29 = vld [vmem:[%s3142_s25 + $0x168] sm:$0xff]   ;;  %263 = vst [vmem:[%s3147_s26 + $0xd8] sm:$0xff] %v262_v27   ;;  %v274_v30 = vld [vmem:[%s3142_s25 + $0x170] sm:$0xff]  }
  0x1e   : > { %267 = vst [vmem:[%s3147_s26 + $0xe0] sm:$0xff] %v266_v28   ;;  %271 = vst [vmem:[%s3147_s26 + $0xe8] sm:$0xff] %v270_v29   ;;  %v278_v31 = vld [vmem:[%s3142_s25 + $0x178] sm:$0xff]   ;;  %v282_v32 = vld [vmem:[%s3142_s25 + $0x200] sm:$0xff]  }
  0x1f   : > { %275 = vst [vmem:[%s3147_s26 + $0xf0] sm:$0xff] %v274_v30   ;;  %279 = vst [vmem:[%s3147_s26 + $0xf8] sm:$0xff] %v278_v31   ;;  %v286_v33 = vld [vmem:[%s3142_s25 + $0x208] sm:$0xff]   ;;  %v290_v34 = vld [vmem:[%s3142_s25 + $0x210] sm:$0xff]  }
  0x20   : > { %283 = vst [vmem:[%s3147_s26 + $0x100] sm:$0xff] %v282_v32   ;;  %v294_v35 = vld [vmem:[%s3142_s25 + $0x218] sm:$0xff]   ;;  %287 = vst [vmem:[%s3147_s26 + $0x108] sm:$0xff] %v286_v33   ;;  %v298_v36 = vld [vmem:[%s3142_s25 + $0x220] sm:$0xff]  }
  0x21   : > { %291 = vst [vmem:[%s3147_s26 + $0x110] sm:$0xff] %v290_v34   ;;  %295 = vst [vmem:[%s3147_s26 + $0x118] sm:$0xff] %v294_v35   ;;  %v302_v37 = vld [vmem:[%s3142_s25 + $0x228] sm:$0xff]   ;;  %v306_v38 = vld [vmem:[%s3142_s25 + $0x230] sm:$0xff]  }
  0x22   : > { %299 = vst [vmem:[%s3147_s26 + $0x120] sm:$0xff] %v298_v36   ;;  %303 = vst [vmem:[%s3147_s26 + $0x128] sm:$0xff] %v302_v37   ;;  %v310_v39 = vld [vmem:[%s3142_s25 + $0x238] sm:$0xff]   ;;  %v314_v40 = vld [vmem:[%s3142_s25 + $0x240] sm:$0xff]  }
  0x23   : > { %307 = vst [vmem:[%s3147_s26 + $0x130] sm:$0xff] %v306_v38   ;;  %v318_v41 = vld [vmem:[%s3142_s25 + $0x248] sm:$0xff]   ;;  %311 = vst [vmem:[%s3147_s26 + $0x138] sm:$0xff] %v310_v39   ;;  %v322_v42 = vld [vmem:[%s3142_s25 + $0x250] sm:$0xff]  }
  0x24   : > { %315 = vst [vmem:[%s3147_s26 + $0x140] sm:$0xff] %v314_v40   ;;  %319 = vst [vmem:[%s3147_s26 + $0x148] sm:$0xff] %v318_v41   ;;  %v326_v43 = vld [vmem:[%s3142_s25 + $0x258] sm:$0xff]   ;;  %v330_v44 = vld [vmem:[%s3142_s25 + $0x260] sm:$0xff]  }
  0x25   : > { %323 = vst [vmem:[%s3147_s26 + $0x150] sm:$0xff] %v322_v42   ;;  %327 = vst [vmem:[%s3147_s26 + $0x158] sm:$0xff] %v326_v43   ;;  %v334_v45 = vld [vmem:[%s3142_s25 + $0x268] sm:$0xff]   ;;  %v338_v46 = vld [vmem:[%s3142_s25 + $0x270] sm:$0xff]  }
  0x26   : > { %331 = vst [vmem:[%s3147_s26 + $0x160] sm:$0xff] %v330_v44   ;;  %v342_v47 = vld [vmem:[%s3142_s25 + $0x278] sm:$0xff]   ;;  %335 = vst [vmem:[%s3147_s26 + $0x168] sm:$0xff] %v334_v45   ;;  %v346_v48 = vld [vmem:[%s3142_s25 + $0x300] sm:$0xff]  }
  0x27   : > { %339 = vst [vmem:[%s3147_s26 + $0x170] sm:$0xff] %v338_v46   ;;  %343 = vst [vmem:[%s3147_s26 + $0x178] sm:$0xff] %v342_v47   ;;  %v350_v49 = vld [vmem:[%s3142_s25 + $0x308] sm:$0xff]   ;;  %v354_v50 = vld [vmem:[%s3142_s25 + $0x310] sm:$0xff]  }
  0x28   : > { %347 = vst [vmem:[%s3147_s26 + $0x180] sm:$0xff] %v346_v48   ;;  %351 = vst [vmem:[%s3147_s26 + $0x188] sm:$0xff] %v350_v49   ;;  %v358_v51 = vld [vmem:[%s3142_s25 + $0x318] sm:$0xff]   ;;  %v362_v52 = vld [vmem:[%s3142_s25 + $0x320] sm:$0xff]  }
  0x29   : > { %355 = vst [vmem:[%s3147_s26 + $0x190] sm:$0xff] %v354_v50   ;;  %v366_v53 = vld [vmem:[%s3142_s25 + $0x328] sm:$0xff]   ;;  %359 = vst [vmem:[%s3147_s26 + $0x198] sm:$0xff] %v358_v51   ;;  %v370_v54 = vld [vmem:[%s3142_s25 + $0x330] sm:$0xff]  }
  0x2a   : > { %363 = vst [vmem:[%s3147_s26 + $0x1a0] sm:$0xff] %v362_v52   ;;  %367 = vst [vmem:[%s3147_s26 + $0x1a8] sm:$0xff] %v366_v53   ;;  %v374_v55 = vld [vmem:[%s3142_s25 + $0x338] sm:$0xff]   ;;  %v378_v56 = vld [vmem:[%s3142_s25 + $0x340] sm:$0xff]  }
  0x2b   : > { %371 = vst [vmem:[%s3147_s26 + $0x1b0] sm:$0xff] %v370_v54   ;;  %375 = vst [vmem:[%s3147_s26 + $0x1b8] sm:$0xff] %v374_v55   ;;  %v382_v57 = vld [vmem:[%s3142_s25 + $0x348] sm:$0xff]   ;;  %v386_v58 = vld [vmem:[%s3142_s25 + $0x350] sm:$0xff]  }
  0x2c   : > { %379 = vst [vmem:[%s3147_s26 + $0x1c0] sm:$0xff] %v378_v56   ;;  %v390_v59 = vld [vmem:[%s3142_s25 + $0x358] sm:$0xff]   ;;  %383 = vst [vmem:[%s3147_s26 + $0x1c8] sm:$0xff] %v382_v57   ;;  %v394_v60 = vld [vmem:[%s3142_s25 + $0x360] sm:$0xff]  }
  0x2d   : > { %387 = vst [vmem:[%s3147_s26 + $0x1d0] sm:$0xff] %v386_v58   ;;  %391 = vst [vmem:[%s3147_s26 + $0x1d8] sm:$0xff] %v390_v59   ;;  %v398_v61 = vld [vmem:[%s3142_s25 + $0x368] sm:$0xff]   ;;  %v402_v62 = vld [vmem:[%s3142_s25 + $0x370] sm:$0xff]  }
  0x2e   : > { %395 = vst [vmem:[%s3147_s26 + $0x1e0] sm:$0xff] %v394_v60   ;;  %399 = vst [vmem:[%s3147_s26 + $0x1e8] sm:$0xff] %v398_v61   ;;  %v406_v63 = vld [vmem:[%s3142_s25 + $0x378] sm:$0xff]  }
  0x2f   : > { %403 = vst [vmem:[%s3147_s26 + $0x1f0] sm:$0xff] %v402_v62   ;;  %407 = vst [vmem:[%s3147_s26 + $0x1f8] sm:$0xff] %v406_v63  }
  0x30 PF: > { %p2345_p5 = scmp.ge.s32.totalorder %s3086_s14, 1  ;;  %p688_p6 = scmp.lt.s32.totalorder %s3086_s14, 3 }
  0x32   : > { %p689_p7 = pnand %p2345_p5, %p688_p6 }
  0x34   : > { %692 = sbr.rel (%p689_p7) target bundleno = 420 (0x1a4), region = 69 }
  0x39   : > { %v2992_v0 = vld [vmem:[%s3738_s1 + $0x38] sm:$0xff]   ;;  %s695_s29 = sand.u32 1, %s3078_s12   ;;  %v2993_v1 = vld [vmem:[%s3738_s1 + $0x30] sm:$0xff]   ;;  %v3286_v2 = vld [vmem:[%s3738_s1 + $0x28] sm:$0xff]   ;;  %s2347_s24 = sshll.u32 %s2338_s15, 5 }
  0x3a   : > { %2776 = vmatprep.subr.bf16.mxu0 %v2992_v0  ;;  %2824 = vmatprep.subr.bf16.mxu1 %v2992_v0  ;;  %s2346_s5 = sshll.u32 %s695_s29, 9  ;;  %v3291_v3 = vld [vmem:[%s3738_s1 + $0x20] sm:$0xff]   ;;  %v3306_v6 = vld [vmem:[%s3738_s1 + $0x18] sm:$0xff]   ;;  %v3315_v7 = vld [vmem:[%s3738_s1 + $0x10] sm:$0xff]   ;;  %p720_p8 = scmp.lt.s32.totalorder %s2347_s24, 63 }
  0x3b   : > { %2777 = vmatpush3.bf16.msra.mxu0 %v2992_v0  ;;  %2825 = vmatpush3.bf16.msra.mxu1 %v2992_v0  ;;  %s3295_s10 = scalar_lea.vmem [#allocation2], %s2346_s5  ;;  %v3324_v8 = vld [vmem:[%s3738_s1 + $0x8] sm:$0xff]   ;;  %v3333_v9 = vld [vmem:[%s3738_s1] sm:$0xff]  }
  0x3c   : > { %2778 = vmatprep.subr.bf16.mxu0 %v2993_v1  ;;  %2826 = vmatprep.subr.bf16.mxu1 %v2993_v1  ;;  %v3000_v4 = vld [vmem:[%s3295_s10] sm:$0xff]   ;;  %v3002_v10 = vld [vmem:[%s3295_s10 + $0x8] sm:$0xff]   ;;  %v3004_v12 = vld [vmem:[%s3295_s10 + $0x10] sm:$0xff]   ;;  %s3795_s24 = smov (!%p720_p8, %s2347_s24), 63 }
  0x3d   : > { %v3001_v5 = vld [vmem:[%s3295_s10 + $0x80] sm:$0xff]   ;;  %2792 = vmatprep.mubr.bf16.mxu0 %v3000_v4  ;;  %v3003_v11 = vld [vmem:[%s3295_s10 + $0x88] sm:$0xff]   ;;  %v3005_v13 = vld [vmem:[%s3295_s10 + $0x90] sm:$0xff]   ;;  %s2348_s15 = sshll.u32 %s3795_s24, 2 }
  0x3e   : > { %2840 = vmatprep.mubr.bf16.mxu1 %v3001_v5  ;;  %v3006_v14 = vld [vmem:[%s3295_s10 + $0x18] sm:$0xff]   ;;  %v3008_v16 = vld [vmem:[%s3295_s10 + $0x20] sm:$0xff]   ;;  %v3010_v18 = vld [vmem:[%s3295_s10 + $0x28] sm:$0xff]   ;;  %s3621_s28 = scalar_lea.vmem %s3740_s3, %s2348_s15 }
  0x3f   : > { %2779 = vmatpush3.bf16.msra.mxu0 %v2993_v1  ;;  %2827 = vmatpush3.bf16.msra.mxu1 %v2993_v1  ;;  %v3007_v15 = vld [vmem:[%s3295_s10 + $0x98] sm:$0xff]   ;;  %v3009_v17 = vld [vmem:[%s3295_s10 + $0xa0] sm:$0xff]   ;;  %v3011_v19 = vld [vmem:[%s3295_s10 + $0xa8] sm:$0xff]  }
  0x40   : > { %2780 = vmatprep.subr.bf16.mxu0 %v3286_v2  ;;  %2828 = vmatprep.subr.bf16.mxu1 %v3286_v2  ;;  %v3012_v20 = vld [vmem:[%s3295_s10 + $0x30] sm:$0xff]   ;;  %v3014_v22 = vld [vmem:[%s3295_s10 + $0x38] sm:$0xff]   ;;  %v3016_v24 = vld [vmem:[%s3295_s10 + $0x40] sm:$0xff]  }
  0x41   : > { %v3013_v21 = vld [vmem:[%s3295_s10 + $0xb0] sm:$0xff]   ;;  %v3015_v23 = vld [vmem:[%s3295_s10 + $0xb8] sm:$0xff]   ;;  %v3017_v25 = vld [vmem:[%s3295_s10 + $0xc0] sm:$0xff]  }
  0x42   : > { %v3018_v26 = vld [vmem:[%s3295_s10 + $0x48] sm:$0xff]   ;;  %v3020_v28 = vld [vmem:[%s3295_s10 + $0x50] sm:$0xff]   ;;  %v3022_v30 = vld [vmem:[%s3295_s10 + $0x58] sm:$0xff]  }
  0x43   : > { %2781 = vmatpush3.bf16.msra.mxu0 %v3286_v2  ;;  %2829 = vmatpush3.bf16.msra.mxu1 %v3286_v2  ;;  %v3019_v27 = vld [vmem:[%s3295_s10 + $0xc8] sm:$0xff]   ;;  %v3021_v29 = vld [vmem:[%s3295_s10 + $0xd0] sm:$0xff]   ;;  %v3023_v31 = vld [vmem:[%s3295_s10 + $0xd8] sm:$0xff]  }
  0x44   : > { %2782 = vmatprep.subr.bf16.mxu0 %v3291_v3  ;;  %2830 = vmatprep.subr.bf16.mxu1 %v3291_v3  ;;  %v3024_v32 = vld [vmem:[%s3295_s10 + $0x60] sm:$0xff]   ;;  %v3026_v34 = vld [vmem:[%s3295_s10 + $0x68] sm:$0xff]   ;;  %v3028_v36 = vld [vmem:[%s3295_s10 + $0x70] sm:$0xff]  }
  0x45   : > { %v3025_v33 = vld [vmem:[%s3295_s10 + $0xe0] sm:$0xff]   ;;  %v3027_v35 = vld [vmem:[%s3295_s10 + $0xe8] sm:$0xff]   ;;  %v3029_v37 = vld [vmem:[%s3295_s10 + $0xf0] sm:$0xff]  }
  0x46   : > { %v3030_v38 = vld [vmem:[%s3295_s10 + $0x78] sm:$0xff]   ;;  %v3032_v40 = vld [vmem:[%s3295_s10 + $0x100] sm:$0xff]   ;;  %v3034_v42 = vld [vmem:[%s3295_s10 + $0x108] sm:$0xff]  }
  0x47   : > { %2783 = vmatpush3.bf16.msra.mxu0 %v3291_v3  ;;  %2831 = vmatpush3.bf16.msra.mxu1 %v3291_v3  ;;  %v3031_v39 = vld [vmem:[%s3295_s10 + $0xf8] sm:$0xff]   ;;  %v3033_v41 = vld [vmem:[%s3295_s10 + $0x180] sm:$0xff]   ;;  %v3035_v43 = vld [vmem:[%s3295_s10 + $0x188] sm:$0xff]  }
  0x48   : > { %2784 = vmatprep.subr.bf16.mxu0 %v3306_v6  ;;  %2832 = vmatprep.subr.bf16.mxu1 %v3306_v6  ;;  %v3036_v44 = vld [vmem:[%s3295_s10 + $0x110] sm:$0xff]   ;;  %v3038_v46 = vld [vmem:[%s3295_s10 + $0x118] sm:$0xff]   ;;  %v3040_v48 = vld [vmem:[%s3295_s10 + $0x120] sm:$0xff]  }
  0x49   : > { %v3037_v45 = vld [vmem:[%s3295_s10 + $0x190] sm:$0xff]   ;;  %v3039_v47 = vld [vmem:[%s3295_s10 + $0x198] sm:$0xff]   ;;  %v3041_v49 = vld [vmem:[%s3295_s10 + $0x1a0] sm:$0xff]  }
  0x4a   : > { %v3042_v50 = vld [vmem:[%s3295_s10 + $0x128] sm:$0xff]   ;;  %v3044_v52 = vld [vmem:[%s3295_s10 + $0x130] sm:$0xff]   ;;  %v3046_v54 = vld [vmem:[%s3295_s10 + $0x138] sm:$0xff]  }
  0x4b   : > { %2785 = vmatpush3.bf16.msra.mxu0 %v3306_v6  ;;  %2833 = vmatpush3.bf16.msra.mxu1 %v3306_v6  ;;  %v3043_v51 = vld [vmem:[%s3295_s10 + $0x1a8] sm:$0xff]   ;;  %v3045_v53 = vld [vmem:[%s3295_s10 + $0x1b0] sm:$0xff]   ;;  %v3047_v55 = vld [vmem:[%s3295_s10 + $0x1b8] sm:$0xff]  }
  0x4c   : > { %2786 = vmatprep.subr.bf16.mxu0 %v3315_v7  ;;  %2834 = vmatprep.subr.bf16.mxu1 %v3315_v7  ;;  %v3048_v56 = vld [vmem:[%s3295_s10 + $0x140] sm:$0xff]   ;;  %v3050_v58 = vld [vmem:[%s3295_s10 + $0x148] sm:$0xff]   ;;  %v3052_v60 = vld [vmem:[%s3295_s10 + $0x150] sm:$0xff]  }
  0x4d   : > { %v3049_v57 = vld [vmem:[%s3295_s10 + $0x1c0] sm:$0xff]   ;;  %v3051_v59 = vld [vmem:[%s3295_s10 + $0x1c8] sm:$0xff]   ;;  %v3053_v61 = vld [vmem:[%s3295_s10 + $0x1d0] sm:$0xff]  }
  0x4e   : > { %v3054_v62 = vld [vmem:[%s3295_s10 + $0x158] sm:$0xff]   ;;  %v3060_v4 = vld [vmem:[%s3295_s10 + $0x170] sm:$0xff]  }
  0x4f   : > { %2787 = vmatpush3.bf16.msra.mxu0 %v3315_v7  ;;  %2835 = vmatpush3.bf16.msra.mxu1 %v3315_v7  ;;  %v3055_v63 = vld [vmem:[%s3295_s10 + $0x1d8] sm:$0xff]   ;;  %v3061_v5 = vld [vmem:[%s3295_s10 + $0x1f0] sm:$0xff]  }
  0x50   : > { %2788 = vmatprep.subr.bf16.mxu0 %v3324_v8  ;;  %2836 = vmatprep.subr.bf16.mxu1 %v3324_v8 }
  0x53   : > { %2789 = vmatpush3.bf16.msra.mxu0 %v3324_v8  ;;  %2837 = vmatpush3.bf16.msra.mxu1 %v3324_v8 }
  0x54   : > { %2790 = vmatprep.subr.bf16.mxu0 %v3333_v9  ;;  %2838 = vmatprep.subr.bf16.mxu1 %v3333_v9 }
  0x57   : > { %2791 = vmatpush3.bf16.msra.mxu0 %v3333_v9  ;;  %2839 = vmatpush3.bf16.msra.mxu1 %v3333_v9 }
  0x58   : > { %2872 = vmatprep.subr.bf16.mxu0 %v2992_v0  ;;  %2920 = vmatprep.subr.bf16.mxu1 %v2992_v0 }
  0x5a   : > { %2793 = vmatmul.mubr.bf16.vlgmr.msra.gmra.mxu0 %v3002_v10  ;;  %2841 = vmatmul.mubr.bf16.vlgmr.msra.gmra.mxu1 %v3003_v11 }
  0x5b   : > { %2873 = vmatpush3.bf16.msra.mxu0 %v2992_v0  ;;  %2921 = vmatpush3.bf16.msra.mxu1 %v2992_v0  ;;  %v3056_v0 = vld [vmem:[%s3295_s10 + $0x160] sm:$0xff]  }
  0x5c   : > { %2796 = vmatprep.mubr.bf16.mxu0 %v3004_v12  ;;  %2844 = vmatprep.mubr.bf16.mxu1 %v3005_v13 }
  0x5d   : > { %2874 = vmatprep.subr.bf16.mxu0 %v2993_v1  ;;  %2922 = vmatprep.subr.bf16.mxu1 %v2993_v1 }
  0x5f   : > { %2875 = vmatpush3.bf16.msra.mxu0 %v2993_v1  ;;  %2923 = vmatpush3.bf16.msra.mxu1 %v2993_v1  ;;  %v3057_v1 = vld [vmem:[%s3295_s10 + $0x1e0] sm:$0xff]  }
  0x60   : > { %2876 = vmatprep.subr.bf16.mxu0 %v3286_v2  ;;  %2924 = vmatprep.subr.bf16.mxu1 %v3286_v2 }
  0x62   : > { %2797 = vmatmul.mubr.bf16.gmra.mxu0 %v3006_v14  ;;  %2845 = vmatmul.mubr.bf16.gmra.mxu1 %v3007_v15 }
  0x63   : > { %2800 = vmatprep.mubr.bf16.mxu0 %v3008_v16  ;;  %2848 = vmatprep.mubr.bf16.mxu1 %v3009_v17 }
  0x64   : > { %2877 = vmatpush3.bf16.msra.mxu0 %v3286_v2  ;;  %2925 = vmatpush3.bf16.msra.mxu1 %v3286_v2  ;;  %v3058_v2 = vld [vmem:[%s3295_s10 + $0x168] sm:$0xff]  }
  0x65   : > { %2878 = vmatprep.subr.bf16.mxu0 %v3291_v3  ;;  %2926 = vmatprep.subr.bf16.mxu1 %v3291_v3 }
  0x68   : > { %2879 = vmatpush3.bf16.msra.mxu0 %v3291_v3  ;;  %2927 = vmatpush3.bf16.msra.mxu1 %v3291_v3  ;;  %v3059_v3 = vld [vmem:[%s3295_s10 + $0x1e8] sm:$0xff]  }
  0x69   : > { %2880 = vmatprep.subr.bf16.mxu0 %v3306_v6  ;;  %2928 = vmatprep.subr.bf16.mxu1 %v3306_v6 }
  0x6a   : > { %2801 = vmatmul.mubr.bf16.gmra.mxu0 %v3010_v18  ;;  %2849 = vmatmul.mubr.bf16.gmra.mxu1 %v3011_v19 }
  0x6b   : > { %2804 = vmatprep.mubr.bf16.mxu0 %v3012_v20  ;;  %2852 = vmatprep.mubr.bf16.mxu1 %v3013_v21 }
  0x6c   : > { %2881 = vmatpush3.bf16.msra.mxu0 %v3306_v6  ;;  %2929 = vmatpush3.bf16.msra.mxu1 %v3306_v6  ;;  %v3062_v6 = vld [vmem:[%s3295_s10 + $0x178] sm:$0xff]  }
  0x6d   : > { %2882 = vmatprep.subr.bf16.mxu0 %v3315_v7  ;;  %2930 = vmatprep.subr.bf16.mxu1 %v3315_v7 }
  0x70   : > { %2883 = vmatpush3.bf16.msra.mxu0 %v3315_v7  ;;  %2931 = vmatpush3.bf16.msra.mxu1 %v3315_v7  ;;  %v3063_v7 = vld [vmem:[%s3295_s10 + $0x1f8] sm:$0xff]  }
  0x71   : > { %2884 = vmatprep.subr.bf16.mxu0 %v3324_v8  ;;  %2932 = vmatprep.subr.bf16.mxu1 %v3324_v8 }
  0x72   : > { %2805 = vmatmul.mubr.bf16.gmra.mxu0 %v3014_v22  ;;  %2853 = vmatmul.mubr.bf16.gmra.mxu1 %v3015_v23 }
  0x73   : > { %2808 = vmatprep.mubr.bf16.mxu0 %v3016_v24  ;;  %2856 = vmatprep.mubr.bf16.mxu1 %v3017_v25 }
  0x74   : > { %2885 = vmatpush3.bf16.msra.mxu0 %v3324_v8  ;;  %2933 = vmatpush3.bf16.msra.mxu1 %v3324_v8 }
  0x75   : > { %2886 = vmatprep.subr.bf16.mxu0 %v3333_v9  ;;  %2934 = vmatprep.subr.bf16.mxu1 %v3333_v9 }
  0x78   : > { %2887 = vmatpush3.bf16.msra.mxu0 %v3333_v9  ;;  %2935 = vmatpush3.bf16.msra.mxu1 %v3333_v9 }
  0x7a   : > { %2809 = vmatmul.mubr.bf16.gmra.mxu0 %v3018_v26  ;;  %2857 = vmatmul.mubr.bf16.gmra.mxu1 %v3019_v27 }
  0x7b   : > { %2812 = vmatprep.mubr.bf16.mxu0 %v3020_v28  ;;  %2860 = vmatprep.mubr.bf16.mxu1 %v3021_v29 }
  0x82   : > { %2813 = vmatmul.mubr.bf16.gmra.mxu0 %v3022_v30  ;;  %2861 = vmatmul.mubr.bf16.gmra.mxu1 %v3023_v31 }
  0x83   : > { %2816 = vmatprep.mubr.bf16.mxu0 %v3024_v32  ;;  %2864 = vmatprep.mubr.bf16.mxu1 %v3025_v33 }
  0x8a   : > { %2817 = vmatmul.mubr.bf16.gmra.mxu0 %v3026_v34  ;;  %2865 = vmatmul.mubr.bf16.gmra.mxu1 %v3027_v35 }
  0x8b   : > { %2820 = vmatprep.mubr.bf16.mxu0 %v3028_v36  ;;  %2868 = vmatprep.mubr.bf16.mxu1 %v3029_v37 }
  0x92   : > { %2821 = vmatmul.mubr.bf16.gmra.mxu0 %v3030_v38  ;;  %2869 = vmatmul.mubr.bf16.gmra.mxu1 %v3031_v39 }
  0x93   : > { %2888 = vmatprep.mubr.bf16.mxu0 %v3032_v40  ;;  %2936 = vmatprep.mubr.bf16.mxu1 %v3033_v41 }
  0x9a   : > { %2889 = vmatmul.mubr.bf16.vlgmr.msra.gmra.mxu0 %v3034_v42  ;;  %2937 = vmatmul.mubr.bf16.vlgmr.msra.gmra.mxu1 %v3035_v43 }
  0x9b   : > { %2892 = vmatprep.mubr.bf16.mxu0 %v3036_v44  ;;  %2940 = vmatprep.mubr.bf16.mxu1 %v3037_v45 }
  0xa2   : > { %2893 = vmatmul.mubr.bf16.gmra.mxu0 %v3038_v46  ;;  %2941 = vmatmul.mubr.bf16.gmra.mxu1 %v3039_v47 }
  0xa3   : > { %2896 = vmatprep.mubr.bf16.mxu0 %v3040_v48  ;;  %2944 = vmatprep.mubr.bf16.mxu1 %v3041_v49 }
  0xaa   : > { %2897 = vmatmul.mubr.bf16.gmra.mxu0 %v3042_v50  ;;  %2945 = vmatmul.mubr.bf16.gmra.mxu1 %v3043_v51 }
  0xab   : > { %2900 = vmatprep.mubr.bf16.mxu0 %v3044_v52  ;;  %2948 = vmatprep.mubr.bf16.mxu1 %v3045_v53 }
  0xb2   : > { %2901 = vmatmul.mubr.bf16.gmra.mxu0 %v3046_v54  ;;  %2949 = vmatmul.mubr.bf16.gmra.mxu1 %v3047_v55 }
  0xb3   : > { %2904 = vmatprep.mubr.bf16.mxu0 %v3048_v56  ;;  %2952 = vmatprep.mubr.bf16.mxu1 %v3049_v57 }
  0xba   : > { %2905 = vmatmul.mubr.bf16.gmra.mxu0 %v3050_v58  ;;  %2953 = vmatmul.mubr.bf16.gmra.mxu1 %v3051_v59 }
  0xbb   : > { %2908 = vmatprep.mubr.bf16.mxu0 %v3052_v60  ;;  %2956 = vmatprep.mubr.bf16.mxu1 %v3053_v61 }
  0xc2   : > { %2909 = vmatmul.mubr.bf16.gmra.mxu0 %v3054_v62  ;;  %2957 = vmatmul.mubr.bf16.gmra.mxu1 %v3055_v63 }
  0xc3   : > { %2912 = vmatprep.mubr.bf16.mxu0 %v3056_v0  ;;  %2960 = vmatprep.mubr.bf16.mxu1 %v3057_v1 }
  0xca   : > { %2913 = vmatmul.mubr.bf16.gmra.mxu0 %v3058_v2  ;;  %2961 = vmatmul.mubr.bf16.gmra.mxu1 %v3059_v3 }
  0xcb   : > { %2916 = vmatprep.mubr.bf16.mxu0 %v3060_v4  ;;  %2964 = vmatprep.mubr.bf16.mxu1 %v3061_v5 }
  0xd2   : > { %2917 = vmatmul.mubr.bf16.gmra.mxu0 %v3062_v6  ;;  %2965 = vmatmul.mubr.bf16.gmra.mxu1 %v3063_v7 }
 0x11a   : > { %v3427_v8 = vpop.f32.mrf.mxu0  ;;  %v3429_v9 = vpop.f32.mrf.mxu1 }
 0x11b   : > { %v3761_v6 = vmax.f32 %v3427_v8, %v3429_v9 }
 0x11c   : > { %v3433_v11 = vpop.f32.mrf.mxu0  ;;  %v3435_v12 = vpop.f32.mrf.mxu1 }
 0x11e   : > { %v3439_v14 = vpop.f32.mrf.mxu0  ;;  %v3441_v15 = vpop.f32.mrf.mxu1 }
 0x11f   : > { %v1372_v63 = vmax.f32 %v3439_v14, %v3441_v15 }
 0x120   : > { %v3443_v16 = vpop.f32.mrf.mxu0  ;;  %v3445_v17 = vpop.f32.mrf.mxu1 }
 0x121   : > { %v1370_v8 = vmax.f32 %v3443_v16, %v3445_v17 }
 0x122   : > { %v3447_v18 = vpop.f32.mrf.mxu0  ;;  %v3449_v19 = vpop.f32.mrf.mxu1 }
 0x123   : > { %v3763_v16 = vmax.f32 %v3447_v18, %v3449_v19 }
 0x124   : > { %v3453_v21 = vpop.f32.mrf.mxu0  ;;  %v3455_v22 = vpop.f32.mrf.mxu1 }
 0x126   : > { %v3459_v24 = vpop.f32.mrf.mxu0  ;;  %v3461_v25 = vpop.f32.mrf.mxu1 }
 0x128   : > { %v3463_v26 = vpop.f32.mrf.mxu0  ;;  %v3465_v27 = vpop.f32.mrf.mxu1 }
 0x12a   : > { %v3467_v28 = vpop.f32.mrf.mxu0  ;;  %v3469_v29 = vpop.f32.mrf.mxu1 }
 0x12c   : > { %v3473_v31 = vpop.f32.mrf.mxu0  ;;  %v3475_v32 = vpop.f32.mrf.mxu1 }
 0x12e   : > { %v3479_v34 = vpop.f32.mrf.mxu0  ;;  %v3481_v35 = vpop.f32.mrf.mxu1 }
 0x130   : > { %v3483_v36 = vpop.f32.mrf.mxu0  ;;  %v3485_v37 = vpop.f32.mrf.mxu1 }
 0x132   : > { %v3487_v38 = vpop.f32.mrf.mxu0  ;;  %v3489_v39 = vpop.f32.mrf.mxu1 }
 0x134   : > { %v3493_v41 = vpop.f32.mrf.mxu0  ;;  %v3495_v42 = vpop.f32.mrf.mxu1 }
 0x136   : > { %v3499_v44 = vpop.f32.mrf.mxu0  ;;  %v3501_v45 = vpop.f32.mrf.mxu1 }
 0x138   : > { %v3503_v46 = vpop.f32.mrf.mxu0  ;;  %v3505_v47 = vpop.f32.mrf.mxu1 }
 0x13a   : > { %v3507_v48 = vpop.f32.mrf.mxu0  ;;  %v3509_v49 = vpop.f32.mrf.mxu1 }
 0x13c   : > { %v3513_v51 = vpop.f32.mrf.mxu0  ;;  %v3515_v52 = vpop.f32.mrf.mxu1 }
 0x13e   : > { %v3519_v54 = vpop.f32.mrf.mxu0  ;;  %v3521_v55 = vpop.f32.mrf.mxu1 }
 0x140   : > { %v3523_v56 = vpop.f32.mrf.mxu0  ;;  %v3525_v57 = vpop.f32.mrf.mxu1 }
 0x142   : > { %v3527_v58 = vpop.f32.mrf.mxu0  ;;  %v3529_v59 = vpop.f32.mrf.mxu1 }
 0x144   : > { %v3533_v61 = vpop.f32.mrf.mxu0  ;;  %v3535_v62 = vpop.f32.mrf.mxu1 }
 0x146   : > { %v3539_v0 = vpop.f32.mrf.mxu0  ;;  %v3541_v1 = vpop.f32.mrf.mxu1 }
 0x148   : > { %v3543_v2 = vpop.f32.mrf.mxu0  ;;  %v3545_v3 = vpop.f32.mrf.mxu1 }
 0x14a   : > { %v3547_v4 = vpop.f32.mrf.mxu0  ;;  %v3549_v5 = vpop.f32.mrf.mxu1 }
 0x14c   : > { %v3553_v7 = vpop.f32.mrf.mxu0  ;;  %v3555_v60 = vpop.f32.mrf.mxu1 }
 0x14d   : > { %3747 = vst [vmem:[#allocation3_spill] sm:$0xff] %v3553_v7  ;;  %3748 = vst [vmem:[#allocation4_spill] sm:$0xff] %v3555_v60 }
 0x14e   : > { %v3559_v53 = vpop.f32.mrf.mxu0  ;;  %v3561_v50 = vpop.f32.mrf.mxu1 }
 0x14f   : > { %3749 = vst [vmem:[#allocation5_spill] sm:$0xff] %v3559_v53  ;;  %3750 = vst [vmem:[#allocation6_spill] sm:$0xff] %v3561_v50 }
 0x150   : > { %v3563_v43 = vpop.f32.mrf.mxu0  ;;  %v3565_v40 = vpop.f32.mrf.mxu1 }
 0x151   : > { %3751 = vst [vmem:[#allocation7_spill] sm:$0xff] %v3563_v43  ;;  %3752 = vst [vmem:[#allocation8_spill] sm:$0xff] %v3565_v40 }
 0x152   : > { %v3567_v33 = vpop.f32.mrf.mxu0  ;;  %v3569_v30 = vpop.f32.mrf.mxu1 }
 0x153   : > { %3753 = vst [vmem:[#allocation9_spill] sm:$0xff] %v3567_v33  ;;  %3754 = vst [vmem:[#allocation10_spill] sm:$0xff] %v3569_v30 }
 0x154   : > { %v3573_v23 = vpop.f32.mrf.mxu0  ;;  %v3575_v20 = vpop.f32.mrf.mxu1 }
 0x155   : > { %3755 = vst [vmem:[#allocation11_spill] sm:$0xff] %v3573_v23  ;;  %3756 = vst [vmem:[#allocation12_spill] sm:$0xff] %v3575_v20 }
 0x156   : > { %v3579_v13 = vpop.f32.mrf.mxu0  ;;  %v3581_v10 = vpop.f32.mrf.mxu1 }
 0x157   : > { %3757 = vst [vmem:[#allocation13_spill] sm:$0xff] %v3579_v13  ;;  %3758 = vst [vmem:[#allocation14_spill] sm:$0xff] %v3581_v10 }
 0x158   : > { %v3583_v43 = vpop.f32.mrf.mxu0  ;;  %v3585_v40 = vpop.f32.mrf.mxu1 }
 0x159   : > { %3759 = vst [vmem:[#allocation15_spill] sm:$0xff] %v3583_v43  ;;  %3760 = vst [vmem:[#allocation16_spill] sm:$0xff] %v3585_v40  ;;  %v3762_v43 = vmax.f32 %v3433_v11, %v3435_v12  ;;  %v3600_v40 = vld [vmem:[%s3739_s2] ss:$0 sm:$0xff] }
 0x15a   : > { %v2890_v60 = vpop.f32.mrf.mxu0  ;;  %v2938_v7 = vpop.f32.mrf.mxu1 }
 0x15b   : > { %v1693_v30 = vmax.f32 %v3761_v6, %v2890_v60 }
 0x15c   : > { %v1564_v33 = vpop.f32.mrf.mxu0  ;;  %v1886_v53 = vpop.f32.mrf.mxu1 }
 0x15d   : > { %v2015_v13 = vmax.f32 %v1693_v30, %v2938_v7  ;;  %v1691_v10 = vmax.f32 %v3762_v43, %v1564_v33 }
 0x15e   : > { %v2891_v20 = vpop.f32.mrf.mxu0  ;;  %v2939_v23 = vpop.f32.mrf.mxu1 }
 0x15f   : > { %v2013_v9 = vmax.f32 %v1691_v10, %v1886_v53  ;;  %v1694_v60 = vmax.f32 %v1372_v63, %v2891_v20  ;;  %v2054_v15 = vadd.f32 %v3600_v40, %v2015_v13 }
 0x160   : > { %v1567_v6 = vpop.f32.mrf.mxu0  ;;  %v1889_v14 = vpop.f32.mrf.mxu1 }
 0x161   : > { %v2016_v30 = vmax.f32 %v1694_v60, %v2939_v23  ;;  %v1692_v11 = vmax.f32 %v1370_v8, %v1567_v6  ;;  %v2052_v43 = vadd.f32 %v3600_v40, %v2013_v9  ;;  %v2086_v53 = vmax.f32 %v2054_v15, 0.0 }
 0x162   : > { %v2894_v12 = vpop.f32.mrf.mxu0  ;;  %v2942_v33 = vpop.f32.mrf.mxu1  ;;  %v3764_v23 = vmax.f32 %v3453_v21, %v3455_v22  ;;  %v1376_v9 = vmax.f32 %v3459_v24, %v3461_v25  ;;  %v1374_v60 = vmax.f32 %v3463_v26, %v3465_v27 }
 0x163   : > { %v2055_v7 = vadd.f32 %v3600_v40, %v2016_v30  ;;  %v2014_v50 = vmax.f32 %v1692_v11, %v1889_v14  ;;  %v1697_v10 = vmax.f32 %v3763_v16, %v2894_v12  ;;  %v2084_v6 = vmax.f32 %v2052_v43, 0.0 }
 0x164   : > { %v1580_v17 = vpop.f32.mrf.mxu0  ;;  %v1902_v20 = vpop.f32.mrf.mxu1  ;;  %v3765_v43 = vmax.f32 %v3467_v28, %v3469_v29 }
 0x165   : > { %v2087_v63 = vmax.f32 %v2055_v7, 0.0  ;;  %v2053_v13 = vadd.f32 %v3600_v40, %v2014_v50  ;;  %v1695_v8 = vmax.f32 %v3764_v23, %v1580_v17  ;;  %v2019_v18 = vmax.f32 %v1697_v10, %v2942_v33 }
 0x166   : > { %v2895_v19 = vpop.f32.mrf.mxu0  ;;  %v2943_v50 = vpop.f32.mrf.mxu1 }
 0x167   : > { %v2593_v14 = vpack.c.bf16 %v2087_v63, %v2086_v53  ;;  %v2085_v21 = vmax.f32 %v2053_v13, 0.0  ;;  %v2017_v22 = vmax.f32 %v1695_v8, %v1902_v20  ;;  %v1698_v15 = vmax.f32 %v1376_v9, %v2895_v19 }
 0x168   : > { %v1583_v30 = vpop.f32.mrf.mxu0  ;;  %v1905_v24 = vpop.f32.mrf.mxu1  ;;  %v2058_v27 = vadd.f32 %v3600_v40, %v2019_v18  ;;  %v1380_v63 = vmax.f32 %v3479_v34, %v3481_v35  ;;  %v3766_v8 = vmax.f32 %v3473_v31, %v3475_v32 }
 0x169   : > { %2665 = vst [vmem:[%s3621_s28 + $0x8] sm:$0xff] %v2593_v14   ;;  %v2588_v25 = vpack.c.bf16 %v2085_v21, %v2084_v6  ;;  %v1696_v26 = vmax.f32 %v1374_v60, %v1583_v30  ;;  %v2020_v11 = vmax.f32 %v1698_v15, %v2943_v50  ;;  %v2056_v33 = vadd.f32 %v3600_v40, %v2017_v22 }
 0x16a   : > { %v2898_v12 = vpop.f32.mrf.mxu0  ;;  %v2946_v7 = vpop.f32.mrf.mxu1  ;;  %v2090_v60 = vmax.f32 %v2058_v27, 0.0  ;;  %v1378_v14 = vmax.f32 %v3483_v36, %v3485_v37  ;;  %v3767_v27 = vmax.f32 %v3487_v38, %v3489_v39  ;;  %v1384_v36 = vmax.f32 %v3499_v44, %v3501_v45 }
 0x16b   : > { %2589 = vst [vmem:[%s3621_s28] sm:$0xff] %v2588_v25   ;;  %v2018_v16 = vmax.f32 %v1696_v26, %v1905_v24  ;;  %v1701_v10 = vmax.f32 %v3765_v43, %v2898_v12  ;;  %v2059_v17 = vadd.f32 %v3600_v40, %v2020_v11  ;;  %v2088_v29 = vmax.f32 %v2056_v33, 0.0 }
 0x16c   : > { %v1596_v20 = vpop.f32.mrf.mxu0  ;;  %v1918_v53 = vpop.f32.mrf.mxu1  ;;  %v1382_v44 = vmax.f32 %v3503_v46, %v3505_v47 }
 0x16d   : > { %v2057_v13 = vadd.f32 %v3600_v40, %v2018_v16  ;;  %v2023_v23 = vmax.f32 %v1701_v10, %v2946_v7  ;;  %v1699_v9 = vmax.f32 %v3766_v8, %v1596_v20  ;;  %v2091_v18 = vmax.f32 %v2059_v17, 0.0 }
 0x16e   : > { %v2899_v19 = vpop.f32.mrf.mxu0  ;;  %v2947_v28 = vpop.f32.mrf.mxu1  ;;  %v3768_v17 = vmax.f32 %v3493_v41, %v3495_v42 }
 0x16f   : > { %v2089_v50 = vmax.f32 %v2057_v13, 0.0  ;;  %v1702_v6 = vmax.f32 %v1380_v63, %v2899_v19  ;;  %v2603_v34 = vpack.c.bf16 %v2091_v18, %v2090_v60  ;;  %v2021_v35 = vmax.f32 %v1699_v9, %v1918_v53 }
 0x170   : > { %v1599_v21 = vpop.f32.mrf.mxu0  ;;  %v1921_v22 = vpop.f32.mrf.mxu1  ;;  %v2062_v31 = vadd.f32 %v3600_v40, %v2023_v23 }
 0x171   : > { %v2598_v15 = vpack.c.bf16 %v2089_v50, %v2088_v29  ;;  %v2024_v32 = vmax.f32 %v1702_v6, %v2947_v28  ;;  %2667 = vst [vmem:[%s3621_s28 + $0x18] sm:$0xff] %v2603_v34   ;;  %v1700_v30 = vmax.f32 %v1378_v14, %v1599_v21  ;;  %v2060_v37 = vadd.f32 %v3600_v40, %v2021_v35 }
 0x172   : > { %v2902_v24 = vpop.f32.mrf.mxu0  ;;  %v2950_v25 = vpop.f32.mrf.mxu1  ;;  %v2094_v16 = vmax.f32 %v2062_v31, 0.0  ;;  %v3769_v6 = vmax.f32 %v3507_v48, %v3509_v49  ;;  %v3770_v31 = vmax.f32 %v3513_v51, %v3515_v52 }
 0x173   : > { %2666 = vst [vmem:[%s3621_s28 + $0x10] sm:$0xff] %v2598_v15   ;;  %v2063_v26 = vadd.f32 %v3600_v40, %v2024_v32  ;;  %v1705_v11 = vmax.f32 %v3767_v27, %v2902_v24  ;;  %v2022_v12 = vmax.f32 %v1700_v30, %v1921_v22  ;;  %v2092_v23 = vmax.f32 %v2060_v37, 0.0 }
 0x174   : > { %v1612_v7 = vpop.f32.mrf.mxu0  ;;  %v1934_v33 = vpop.f32.mrf.mxu1  ;;  %v1388_v30 = vmax.f32 %v3519_v54, %v3521_v55  ;;  %v1386_v24 = vmax.f32 %v3523_v56, %v3525_v57 }
 0x175   : > { %v2095_v43 = vmax.f32 %v2063_v26, 0.0  ;;  %v2027_v10 = vmax.f32 %v1705_v11, %v2950_v25  ;;  %v1703_v20 = vmax.f32 %v3768_v17, %v1612_v7  ;;  %v2061_v53 = vadd.f32 %v3600_v40, %v2022_v12 }
 0x176   : > { %v2903_v38 = vpop.f32.mrf.mxu0  ;;  %v2951_v39 = vpop.f32.mrf.mxu1 }
 0x177   : > { %v2613_v45 = vpack.c.bf16 %v2095_v43, %v2094_v16  ;;  %v2025_v63 = vmax.f32 %v1703_v20, %v1934_v33  ;;  %v1706_v13 = vmax.f32 %v1384_v36, %v2903_v38  ;;  %v2093_v8 = vmax.f32 %v2061_v53, 0.0 }
 0x178   : > { %v1615_v9 = vpop.f32.mrf.mxu0  ;;  %v1937_v60 = vpop.f32.mrf.mxu1  ;;  %v2066_v18 = vadd.f32 %v3600_v40, %v2027_v10  ;;  %v3771_v43 = vmax.f32 %v3527_v58, %v3529_v59  ;;  %v1392_v38 = vmax.f32 %v3539_v0, %v3541_v1 }
 0x179   : > { %2669 = vst [vmem:[%s3621_s28 + $0x28] sm:$0xff] %v2613_v45   ;;  %v2028_v41 = vmax.f32 %v1706_v13, %v2951_v39  ;;  %v1704_v42 = vmax.f32 %v1382_v44, %v1615_v9  ;;  %v2608_v19 = vpack.c.bf16 %v2093_v8, %v2092_v23  ;;  %v2064_v50 = vadd.f32 %v3600_v40, %v2025_v63 }
 0x17a   : > { %v2906_v28 = vpop.f32.mrf.mxu0  ;;  %v2954_v29 = vpop.f32.mrf.mxu1  ;;  %v2098_v21 = vmax.f32 %v2066_v18, 0.0  ;;  %v3772_v45 = vmax.f32 %v3533_v61, %v3535_v62  ;;  %v1390_v18 = vmax.f32 %v3543_v2, %v3545_v3  ;;  %v3774_v2 = vld [vmem:[#allocation6_spill] sm:$0xff]  ;;  %v3775_v3 = vld [vmem:[#allocation5_spill] sm:$0xff] }
 0x17b   : > { %v2067_v46 = vadd.f32 %v3600_v40, %v2028_v41  ;;  %v2026_v47 = vmax.f32 %v1704_v42, %v1937_v60  ;;  %v1709_v14 = vmax.f32 %v3769_v6, %v2906_v28  ;;  %2668 = vst [vmem:[%s3621_s28 + $0x20] sm:$0xff] %v2608_v19   ;;  %v2096_v26 = vmax.f32 %v2064_v50, 0.0 }
 0x17c   : > { %v1628_v34 = vpop.f32.mrf.mxu0  ;;  %v1950_v35 = vpop.f32.mrf.mxu1 }
 0x17d   : > { %v2099_v22 = vmax.f32 %v2067_v46, 0.0  ;;  %v2065_v15 = vadd.f32 %v3600_v40, %v2026_v47  ;;  %v1707_v32 = vmax.f32 %v3770_v31, %v1628_v34  ;;  %v2031_v48 = vmax.f32 %v1709_v14, %v2954_v29 }
 0x17e   : > { %v2907_v49 = vpop.f32.mrf.mxu0  ;;  %v2955_v25 = vpop.f32.mrf.mxu1  ;;  %v3773_v47 = vmax.f32 %v3547_v4, %v3549_v5  ;;  %v1396_v14 = vmax.f32 %v3775_v3, %v3774_v2 }
 0x17f   : > { %v2623_v27 = vpack.c.bf16 %v2099_v22, %v2098_v21  ;;  %v2097_v11 = vmax.f32 %v2065_v15, 0.0  ;;  %v2029_v36 = vmax.f32 %v1707_v32, %v1950_v35  ;;  %v1710_v37 = vmax.f32 %v1388_v30, %v2907_v49  ;;  %v3776_v30 = vld [vmem:[#allocation3_spill] sm:$0xff] }
 0x180   : > { %v1631_v12 = vpop.f32.mrf.mxu0  ;;  %v1953_v7 = vpop.f32.mrf.mxu1  ;;  %v2070_v33 = vadd.f32 %v3600_v40, %v2031_v48 }
 0x181   : > { %2671 = vst [vmem:[%s3621_s28 + $0x38] sm:$0xff] %v2623_v27   ;;  %v2618_v51 = vpack.c.bf16 %v2097_v11, %v2096_v26  ;;  %v1708_v52 = vmax.f32 %v1386_v24, %v1631_v12  ;;  %v2032_v54 = vmax.f32 %v1710_v37, %v2955_v25  ;;  %v2068_v56 = vadd.f32 %v3600_v40, %v2029_v36  ;;  %v3777_v24 = vld [vmem:[#allocation4_spill] sm:$0xff]  ;;  %v3780_v27 = vld [vmem:[#allocation7_spill] sm:$0xff] }
 0x182   : > { %v2910_v55 = vpop.f32.mrf.mxu0  ;;  %v2958_v16 = vpop.f32.mrf.mxu1  ;;  %v2102_v13 = vmax.f32 %v2070_v33, 0.0  ;;  %v3778_v48 = vmax.f32 %v3776_v30, %v3777_v24  ;;  %v3779_v26 = vld [vmem:[#allocation8_spill] sm:$0xff] }
 0x183   : > { %2670 = vst [vmem:[%s3621_s28 + $0x30] sm:$0xff] %v2618_v51   ;;  %v2030_v57 = vmax.f32 %v1708_v52, %v1953_v7  ;;  %v1713_v10 = vmax.f32 %v3771_v43, %v2910_v55  ;;  %v2071_v17 = vadd.f32 %v3600_v40, %v2032_v54  ;;  %v2100_v59 = vmax.f32 %v2068_v56, 0.0 }
 0x184   : > { %v1644_v20 = vpop.f32.mrf.mxu0  ;;  %v1966_v53 = vpop.f32.mrf.mxu1  ;;  %v1394_v11 = vmax.f32 %v3780_v27, %v3779_v26 }
 0x185   : > { %v2069_v39 = vadd.f32 %v3600_v40, %v2030_v57  ;;  %v2035_v44 = vmax.f32 %v1713_v10, %v2958_v16  ;;  %v1711_v63 = vmax.f32 %v3772_v45, %v1644_v20  ;;  %v2103_v23 = vmax.f32 %v2071_v17, 0.0 }
 0x186   : > { %v2911_v8 = vpop.f32.mrf.mxu0  ;;  %v2959_v58 = vpop.f32.mrf.mxu1 }
 0x187   : > { %v2101_v9 = vmax.f32 %v2069_v39, 0.0  ;;  %v1714_v60 = vmax.f32 %v1392_v38, %v2911_v8  ;;  %v2633_v0 = vpack.c.bf16 %v2103_v23, %v2102_v13  ;;  %v2033_v1 = vmax.f32 %v1711_v63, %v1966_v53  ;;  %v3781_v53 = vld [vmem:[#allocation9_spill] sm:$0xff]  ;;  %v3782_v38 = vld [vmem:[#allocation10_spill] sm:$0xff] }
 0x188   : > { %v1647_v41 = vpop.f32.mrf.mxu0  ;;  %v1969_v42 = vpop.f32.mrf.mxu1  ;;  %v2074_v61 = vadd.f32 %v3600_v40, %v2035_v44  ;;  %v3783_v39 = vmax.f32 %v3781_v53, %v3782_v38 }
 0x189   : > { %v2628_v19 = vpack.c.bf16 %v2101_v9, %v2100_v59  ;;  %v2036_v62 = vmax.f32 %v1714_v60, %v2959_v58  ;;  %2673 = vst [vmem:[%s3621_s28 + $0x48] sm:$0xff] %v2633_v0   ;;  %v1712_v28 = vmax.f32 %v1390_v18, %v1647_v41  ;;  %v2072_v34 = vadd.f32 %v3600_v40, %v2033_v1  ;;  %v3784_v58 = vld [vmem:[#allocation11_spill] sm:$0xff]  ;;  %v3785_v59 = vld [vmem:[#allocation12_spill] sm:$0xff]  ;;  %v3787_v18 = vld [vmem:[#allocation14_spill] sm:$0xff] }
 0x18a   : > { %v2914_v29 = vpop.f32.mrf.mxu0  ;;  %v2962_v50 = vpop.f32.mrf.mxu1  ;;  %v2106_v15 = vmax.f32 %v2074_v61, 0.0  ;;  %v3786_v9 = vmax.f32 %v3784_v58, %v3785_v59  ;;  %v3788_v0 = vld [vmem:[#allocation13_spill] sm:$0xff]  ;;  %v3789_v41 = vld [vmem:[#allocation16_spill] sm:$0xff] }
 0x18b   : > { %2672 = vst [vmem:[%s3621_s28 + $0x40] sm:$0xff] %v2628_v19   ;;  %v2075_v46 = vadd.f32 %v3600_v40, %v2036_v62  ;;  %v1717_v6 = vmax.f32 %v3773_v47, %v2914_v29  ;;  %v2034_v35 = vmax.f32 %v1712_v28, %v1969_v42  ;;  %v2104_v7 = vmax.f32 %v2072_v34, 0.0  ;;  %v3790_v42 = vld [vmem:[#allocation15_spill] sm:$0xff] }
 0x18c   : > { %v1660_v21 = vpop.f32.mrf.mxu0  ;;  %v1982_v22 = vpop.f32.mrf.mxu1  ;;  %v1400_v1 = vmax.f32 %v3788_v0, %v3787_v18  ;;  %v1398_v19 = vmax.f32 %v3790_v42, %v3789_v41 }
 0x18d   : > { %v2107_v31 = vmax.f32 %v2075_v46, 0.0  ;;  %v2039_v32 = vmax.f32 %v1717_v6, %v2962_v50  ;;  %v1715_v49 = vmax.f32 %v3778_v48, %v1660_v21  ;;  %v2073_v25 = vadd.f32 %v3600_v40, %v2034_v35 }
 0x18e   : > { %v2915_v4 = vpop.f32.mrf.mxu0  ;;  %v2963_v5 = vpop.f32.mrf.mxu1 }
 0x18f   : > { %v2643_v36 = vpack.c.bf16 %v2107_v31, %v2106_v15  ;;  %v2037_v37 = vmax.f32 %v1715_v49, %v1982_v22  ;;  %v1718_v12 = vmax.f32 %v1396_v14, %v2915_v4  ;;  %v2105_v51 = vmax.f32 %v2073_v25, 0.0 }
 0x190   : > { %v1663_v52 = vpop.f32.mrf.mxu0  ;;  %v1985_v33 = vpop.f32.mrf.mxu1  ;;  %v2078_v54 = vadd.f32 %v3600_v40, %v2039_v32 }
 0x191   : > { %2675 = vst [vmem:[%s3621_s28 + $0x58] sm:$0xff] %v2643_v36   ;;  %v2040_v55 = vmax.f32 %v1718_v12, %v2963_v5  ;;  %v1716_v16 = vmax.f32 %v1394_v11, %v1663_v52  ;;  %v2638_v56 = vpack.c.bf16 %v2105_v51, %v2104_v7  ;;  %v2076_v10 = vadd.f32 %v3600_v40, %v2037_v37 }
 0x192   : > { %v2918_v57 = vpop.f32.mrf.mxu0  ;;  %v2966_v43 = vpop.f32.mrf.mxu1  ;;  %v2110_v13 = vmax.f32 %v2078_v54, 0.0 }
 0x193   : > { %v2079_v17 = vadd.f32 %v3600_v40, %v2040_v55  ;;  %v2038_v20 = vmax.f32 %v1716_v16, %v1985_v33  ;;  %v1721_v44 = vmax.f32 %v3783_v39, %v2918_v57  ;;  %2674 = vst [vmem:[%s3621_s28 + $0x50] sm:$0xff] %v2638_v56   ;;  %v2108_v29 = vmax.f32 %v2076_v10, 0.0 }
 0x194   : > { %v1676_v45 = vpop.f32.mrf.mxu0  ;;  %v1998_v63 = vpop.f32.mrf.mxu1 }
 0x195   : > { %v2111_v23 = vmax.f32 %v2079_v17, 0.0  ;;  %v2077_v8 = vadd.f32 %v3600_v40, %v2038_v20  ;;  %v1719_v60 = vmax.f32 %v3786_v9, %v1676_v45  ;;  %v2043_v61 = vmax.f32 %v1721_v44, %v2966_v43 }
 0x196   : > { %v2919_v62 = vpop.f32.mrf.mxu0  ;;  %v2967_v28 = vpop.f32.mrf.mxu1 }
 0x197   : > { %v2653_v50 = vpack.c.bf16 %v2111_v23, %v2110_v13  ;;  %v2109_v46 = vmax.f32 %v2077_v8, 0.0  ;;  %v2041_v47 = vmax.f32 %v1719_v60, %v1998_v63  ;;  %v1722_v6 = vmax.f32 %v1400_v1, %v2919_v62 }
 0x198   : > { %v1679_v2 = vpop.f32.mrf.mxu0  ;;  %v2082_v34 = vadd.f32 %v3600_v40, %v2043_v61  ;;  %v2001_v21 = vpop.f32.mrf.mxu1 }
 0x199   : > { %2677 = vst [vmem:[%s3621_s28 + $0x68] sm:$0xff] %v2653_v50   ;;  %v2648_v3 = vpack.c.bf16 %v2109_v46, %v2108_v29  ;;  %v1720_v14 = vmax.f32 %v1398_v19, %v1679_v2  ;;  %v2044_v35 = vmax.f32 %v1722_v6, %v2967_v28  ;;  %v2080_v22 = vadd.f32 %v3600_v40, %v2041_v47 }
 0x19a   : > { %v2114_v30 = vmax.f32 %v2082_v34, 0.0 }
 0x19b   : > { %2676 = vst [vmem:[%s3621_s28 + $0x60] sm:$0xff] %v2648_v3   ;;  %v2042_v15 = vmax.f32 %v1720_v14, %v2001_v21  ;;  %v2083_v31 = vadd.f32 %v3600_v40, %v2044_v35  ;;  %v2112_v48 = vmax.f32 %v2080_v22, 0.0 }
 0x19d   : > { %v2081_v32 = vadd.f32 %v3600_v40, %v2042_v15  ;;  %v2115_v24 = vmax.f32 %v2083_v31, 0.0 }
 0x19f   : > { %v2113_v49 = vmax.f32 %v2081_v32, 0.0  ;;  %v2663_v25 = vpack.c.bf16 %v2115_v24, %v2114_v30 }
 0x1a1   : > { %v2658_v4 = vpack.c.bf16 %v2113_v49, %v2112_v48  ;;  %2679 = vst [vmem:[%s3621_s28 + $0x78] sm:$0xff] %v2663_v25  }
 0x1a3   : > { %2678 = vst [vmem:[%s3621_s28 + $0x70] sm:$0xff] %v2658_v4  }
 0x1a4 PF: > { %p10_p9 = scmp.ge.s32.totalorder %s3125_s16, 4   ;;  %s3791_s12 = smov %s3082_s13 }
 0x1a5   : > { %s3792_s13 = smov %s3134_s19  ;;  %s3793_s14 = smov %s3125_s16 }
 0x1a6   :  { %12 = sbr.rel (!%p10_p9) target bundleno = 2 (0x2), region = 111 }

// kernel: generator_forward.12
= control target key start
LH: loop header
LB: loop body
LE: loop exit
PB: predicated region body
PF: predicated region fallthrough
CT: control target
= control target key end

     0   :  { %s1487_s12 = smov 0   ;;  %s1489_s13 = smov 0   ;;  %s1822_s0 = inlined_call_operand.vmem [shape: bf16[4,128,256], index: 0, kind: input, shape index: {}]   ;;  %s1823_s1 = inlined_call_operand.vmem [shape: bf16[256,128], index: 1, kind: input, shape index: {}]   ;;  %s1824_s2 = inlined_call_operand.vmem [shape: f32[1,128], index: 2, kind: input, shape index: {}]   ;;  %s1825_s3 = inlined_call_operand.vmem [shape: bf16[128,128], index: 3, kind: output, shape index: {}]  }
   0x1   :  { %s1491_s14 = smov 0  }
   0x2 LB: > { %s1067_s15 = sadd.s32 4294967295, %s1465_s14   ;;  %s1504_s16 = sadd.s32 1, %s1465_s14   ;;  %s1465_s14 = sphi %s1491_s14, %s1828_s14   ;;  %s1461_s13 = sphi %s1489_s13, %s1827_s13   ;;  %s1457_s12 = sphi %s1487_s12, %s1826_s12  }
   0x3   : > { %s17_s17 = ssub.s32 %s1465_s14, %s1504_s16  ;;  %s20_s18 = sadd.s32 1, %s1461_s13 }
   0x4   : > { %p18_p0 = scmp.eq.s32.totalorder %s17_s17, 0  ;;  %p27_p1 = scmp.ne.s32.totalorder %s1461_s13, %s1457_s12 }
   0x5   : > { %p28_p2 = scmp.eq.s32.totalorder %s1465_s14, 0  ;;  %p1070_p4 = scmp.ge.s32.totalorder %s1465_s14, 2 }
   0x6   : > { %s1513_s19 = scalar_select %p18_p0, %s1461_s13, %s20_s18  }
   0x7   : > { %p29_p3 = por %p28_p2, %p27_p1  ;;  %127 = sbr.rel (%p1070_p4) target bundleno = 32 (0x20), region = 24 }
   0xc   : > { %130 = sbr.rel (!%p29_p3) target bundleno = 32 (0x20), region = 28  ;;  %s132_s20 = sand.u32 (%p29_p3), 1, %s1461_s13  }
   0xd   : > { %s1163_s21 = sshll.u32 (%p29_p3), %s1465_s14, 6  ;;  %s1071_s22 = sshll.u32 (%p29_p3), %s132_s20, 8 }
   0xe   : > { %s1521_s25 = scalar_lea.vmem (%p29_p3), %s1822_s0, %s1163_s21  ;;  %s1526_s26 = scalar_lea.vmem (%p29_p3), [#allocation2], %s1071_s22 }
   0xf   : > { %v229_v0 = vld [vmem:[%s1521_s25] sm:$0xff] (%p29_p3)  ;;  %v231_v1 = vld [vmem:[%s1521_s25 + $0x8] sm:$0xff] (%p29_p3)  ;;  %v233_v2 = vld [vmem:[%s1521_s25 + $0x10] sm:$0xff] (%p29_p3) }
  0x10   : > { %230 = vst [vmem:[%s1526_s26] sm:$0xff] (%p29_p3), %v229_v0  ;;  %232 = vst [vmem:[%s1526_s26 + $0x8] sm:$0xff] (%p29_p3), %v231_v1  ;;  %v235_v3 = vld [vmem:[%s1521_s25 + $0x18] sm:$0xff] (%p29_p3)  ;;  %v237_v4 = vld [vmem:[%s1521_s25 + $0x20] sm:$0xff] (%p29_p3) }
  0x11   : > { %234 = vst [vmem:[%s1526_s26 + $0x10] sm:$0xff] %v233_v2  ;;  %v239_v5 = vld [vmem:[%s1521_s25 + $0x28] sm:$0xff]  ;;  %236 = vst [vmem:[%s1526_s26 + $0x18] sm:$0xff] %v235_v3  ;;  %v241_v6 = vld [vmem:[%s1521_s25 + $0x30] sm:$0xff] }
  0x12   : > { %238 = vst [vmem:[%s1526_s26 + $0x20] sm:$0xff] %v237_v4  ;;  %240 = vst [vmem:[%s1526_s26 + $0x28] sm:$0xff] %v239_v5  ;;  %v243_v7 = vld [vmem:[%s1521_s25 + $0x38] sm:$0xff]  ;;  %v245_v8 = vld [vmem:[%s1521_s25 + $0x80] sm:$0xff] }
  0x13   : > { %242 = vst [vmem:[%s1526_s26 + $0x30] sm:$0xff] %v241_v6  ;;  %244 = vst [vmem:[%s1526_s26 + $0x38] sm:$0xff] %v243_v7  ;;  %v247_v9 = vld [vmem:[%s1521_s25 + $0x88] sm:$0xff]  ;;  %v249_v10 = vld [vmem:[%s1521_s25 + $0x90] sm:$0xff] }
  0x14   : > { %246 = vst [vmem:[%s1526_s26 + $0x40] sm:$0xff] %v245_v8  ;;  %v251_v11 = vld [vmem:[%s1521_s25 + $0x98] sm:$0xff]  ;;  %248 = vst [vmem:[%s1526_s26 + $0x48] sm:$0xff] %v247_v9  ;;  %v253_v12 = vld [vmem:[%s1521_s25 + $0xa0] sm:$0xff] }
  0x15   : > { %250 = vst [vmem:[%s1526_s26 + $0x50] sm:$0xff] %v249_v10  ;;  %252 = vst [vmem:[%s1526_s26 + $0x58] sm:$0xff] %v251_v11  ;;  %v255_v13 = vld [vmem:[%s1521_s25 + $0xa8] sm:$0xff]  ;;  %v257_v14 = vld [vmem:[%s1521_s25 + $0xb0] sm:$0xff] }
  0x16   : > { %254 = vst [vmem:[%s1526_s26 + $0x60] sm:$0xff] %v253_v12  ;;  %256 = vst [vmem:[%s1526_s26 + $0x68] sm:$0xff] %v255_v13  ;;  %v259_v15 = vld [vmem:[%s1521_s25 + $0xb8] sm:$0xff]  ;;  %v261_v16 = vld [vmem:[%s1521_s25 + $0x100] sm:$0xff] }
  0x17   : > { %258 = vst [vmem:[%s1526_s26 + $0x70] sm:$0xff] %v257_v14  ;;  %v263_v17 = vld [vmem:[%s1521_s25 + $0x108] sm:$0xff]  ;;  %260 = vst [vmem:[%s1526_s26 + $0x78] sm:$0xff] %v259_v15  ;;  %v265_v18 = vld [vmem:[%s1521_s25 + $0x110] sm:$0xff] }
  0x18   : > { %262 = vst [vmem:[%s1526_s26 + $0x80] sm:$0xff] %v261_v16  ;;  %264 = vst [vmem:[%s1526_s26 + $0x88] sm:$0xff] %v263_v17  ;;  %v267_v19 = vld [vmem:[%s1521_s25 + $0x118] sm:$0xff]  ;;  %v269_v20 = vld [vmem:[%s1521_s25 + $0x120] sm:$0xff] }
  0x19   : > { %266 = vst [vmem:[%s1526_s26 + $0x90] sm:$0xff] %v265_v18  ;;  %268 = vst [vmem:[%s1526_s26 + $0x98] sm:$0xff] %v267_v19  ;;  %v271_v21 = vld [vmem:[%s1521_s25 + $0x128] sm:$0xff]  ;;  %v273_v22 = vld [vmem:[%s1521_s25 + $0x130] sm:$0xff] }
  0x1a   : > { %270 = vst [vmem:[%s1526_s26 + $0xa0] sm:$0xff] %v269_v20  ;;  %v275_v23 = vld [vmem:[%s1521_s25 + $0x138] sm:$0xff]  ;;  %272 = vst [vmem:[%s1526_s26 + $0xa8] sm:$0xff] %v271_v21  ;;  %v277_v24 = vld [vmem:[%s1521_s25 + $0x180] sm:$0xff] }
  0x1b   : > { %274 = vst [vmem:[%s1526_s26 + $0xb0] sm:$0xff] %v273_v22  ;;  %276 = vst [vmem:[%s1526_s26 + $0xb8] sm:$0xff] %v275_v23  ;;  %v279_v25 = vld [vmem:[%s1521_s25 + $0x188] sm:$0xff]  ;;  %v281_v26 = vld [vmem:[%s1521_s25 + $0x190] sm:$0xff] }
  0x1c   : > { %278 = vst [vmem:[%s1526_s26 + $0xc0] sm:$0xff] %v277_v24  ;;  %280 = vst [vmem:[%s1526_s26 + $0xc8] sm:$0xff] %v279_v25  ;;  %v283_v27 = vld [vmem:[%s1521_s25 + $0x198] sm:$0xff]  ;;  %v285_v28 = vld [vmem:[%s1521_s25 + $0x1a0] sm:$0xff] }
  0x1d   : > { %282 = vst [vmem:[%s1526_s26 + $0xd0] sm:$0xff] %v281_v26  ;;  %v287_v29 = vld [vmem:[%s1521_s25 + $0x1a8] sm:$0xff]  ;;  %284 = vst [vmem:[%s1526_s26 + $0xd8] sm:$0xff] %v283_v27  ;;  %v289_v30 = vld [vmem:[%s1521_s25 + $0x1b0] sm:$0xff] }
  0x1e   : > { %286 = vst [vmem:[%s1526_s26 + $0xe0] sm:$0xff] %v285_v28  ;;  %288 = vst [vmem:[%s1526_s26 + $0xe8] sm:$0xff] %v287_v29  ;;  %v291_v31 = vld [vmem:[%s1521_s25 + $0x1b8] sm:$0xff] }
  0x1f   : > { %290 = vst [vmem:[%s1526_s26 + $0xf0] sm:$0xff] %v289_v30  ;;  %292 = vst [vmem:[%s1526_s26 + $0xf8] sm:$0xff] %v291_v31 }
  0x20 PF: > { %p1075_p5 = scmp.ge.s32.totalorder %s1465_s14, 1  ;;  %p297_p6 = scmp.lt.s32.totalorder %s1465_s14, 3 }
  0x22   : > { %p298_p7 = pnand %p1075_p5, %p297_p6 }
  0x23   : > { %s304_s20 = sand.u32 (!%p298_p7), 1, %s1457_s12   ;;  %s1077_s18 = sshll.u32 (!%p298_p7), %s1067_s15, 3 }
  0x24   : > { %301 = sbr.rel (%p298_p7) target bundleno = 342 (0x156), region = 66  ;;  %s1076_s23 = sshll.u32 (!%p298_p7), %s304_s20, 8 }
  0x25   : > { %s1653_s29 = scalar_lea.vmem (!%p298_p7), [#allocation2], %s1076_s23  ;;  %p329_p8 = scmp.lt.s32.totalorder (!%p298_p7), %s1077_s18, 15 }
  0x29   : > { %v1379_v32 = vld [vmem:[%s1823_s1 + $0x78] sm:$0xff]   ;;  %v1381_v34 = vld [vmem:[%s1823_s1 + $0x70] sm:$0xff]   ;;  %v1608_v36 = vld [vmem:[%s1823_s1 + $0x68] sm:$0xff]   ;;  %s1830_s18 = smov (!%p329_p8, %s1077_s18), 15 }
  0x2a   : > { %v1380_v33 = vld [vmem:[%s1823_s1 + $0x38] sm:$0xff]   ;;  %1195 = vmatprep.subr.bf16.mxu0 %v1379_v32  ;;  %1235 = vmatprep.subr.bf16.mxu1 %v1379_v32  ;;  %v1603_v35 = vld [vmem:[%s1823_s1 + $0x30] sm:$0xff]   ;;  %v1615_v37 = vld [vmem:[%s1823_s1 + $0x28] sm:$0xff]   ;;  %s1078_s14 = sshll.u32 %s1830_s18, 2 }
  0x2b   : > { %1196 = vmatpush3.bf16.msra.mxu0 %v1380_v33  ;;  %1236 = vmatpush3.bf16.msra.mxu1 %v1380_v33  ;;  %v1622_v38 = vld [vmem:[%s1823_s1 + $0x60] sm:$0xff]   ;;  %v1637_v40 = vld [vmem:[%s1823_s1 + $0x58] sm:$0xff]   ;;  %v1651_v42 = vld [vmem:[%s1823_s1 + $0x50] sm:$0xff]   ;;  %s1788_s23 = scalar_lea.vmem %s1825_s3, %s1078_s14 }
  0x2c   : > { %1197 = vmatprep.subr.bf16.mxu0 %v1381_v34  ;;  %1237 = vmatprep.subr.bf16.mxu1 %v1381_v34  ;;  %v1630_v39 = vld [vmem:[%s1823_s1 + $0x20] sm:$0xff]   ;;  %v1644_v41 = vld [vmem:[%s1823_s1 + $0x18] sm:$0xff]   ;;  %v1662_v45 = vld [vmem:[%s1823_s1 + $0x10] sm:$0xff]  }
  0x2d   : > { %v1397_v43 = vld [vmem:[%s1653_s29 + $0x4] ss:$8 sps:$4 sm:$0xff]   ;;  %v1395_v50 = vld [vmem:[%s1653_s29] ss:$8 sps:$4 sm:$0xff]   ;;  %v1401_v52 = vld [vmem:[%s1653_s29 + $0x14] ss:$8 sps:$4 sm:$0xff]  }
  0x2e   : > { %v1400_v44 = vld [vmem:[%s1653_s29 + $0x44] ss:$8 sps:$4 sm:$0xff]   ;;  %543 = vmatprep.mubr.bf16.mxu0 %v1397_v43  ;;  %v1398_v51 = vld [vmem:[%s1653_s29 + $0x40] ss:$8 sps:$4 sm:$0xff]   ;;  %v1403_v53 = vld [vmem:[%s1653_s29 + $0x54] ss:$8 sps:$4 sm:$0xff]  }
  0x2f   : > { %1198 = vmatpush3.bf16.msra.mxu0 %v1603_v35  ;;  %1238 = vmatpush3.bf16.msra.mxu1 %v1603_v35  ;;  %v1669_v46 = vld [vmem:[%s1823_s1 + $0x48] sm:$0xff]   ;;  %v1683_v48 = vld [vmem:[%s1823_s1 + $0x40] sm:$0xff]   ;;  %v1405_v54 = vld [vmem:[%s1653_s29 + $0x10] ss:$8 sps:$4 sm:$0xff]  }
  0x30   : > { %1199 = vmatprep.subr.bf16.mxu0 %v1608_v36  ;;  %1239 = vmatprep.subr.bf16.mxu1 %v1608_v36  ;;  %v1676_v47 = vld [vmem:[%s1823_s1 + $0x8] sm:$0xff]   ;;  %v1690_v49 = vld [vmem:[%s1823_s1] sm:$0xff]   ;;  %v1406_v55 = vld [vmem:[%s1653_s29 + $0x50] ss:$8 sps:$4 sm:$0xff]  }
  0x31   : > { %657 = vmatprep.mubr.bf16.mxu1 %v1400_v44  ;;  %v1407_v56 = vld [vmem:[%s1653_s29 + $0x24] ss:$8 sps:$4 sm:$0xff]   ;;  %v1411_v58 = vld [vmem:[%s1653_s29 + $0x20] ss:$8 sps:$4 sm:$0xff]   ;;  %v1413_v60 = vld [vmem:[%s1653_s29 + $0x34] ss:$8 sps:$4 sm:$0xff]  }
  0x32   : > { %v1409_v57 = vld [vmem:[%s1653_s29 + $0x64] ss:$8 sps:$4 sm:$0xff]   ;;  %v1412_v59 = vld [vmem:[%s1653_s29 + $0x60] ss:$8 sps:$4 sm:$0xff]   ;;  %v1415_v61 = vld [vmem:[%s1653_s29 + $0x74] ss:$8 sps:$4 sm:$0xff]  }
  0x33   : > { %1200 = vmatpush3.bf16.msra.mxu0 %v1615_v37  ;;  %1240 = vmatpush3.bf16.msra.mxu1 %v1615_v37  ;;  %v1417_v62 = vld [vmem:[%s1653_s29 + $0x30] ss:$8 sps:$4 sm:$0xff]   ;;  %v1421_v0 = vld [vmem:[%s1653_s29 + $0x84] ss:$8 sps:$4 sm:$0xff]   ;;  %v1419_v2 = vld [vmem:[%s1653_s29 + $0x80] ss:$8 sps:$4 sm:$0xff]  }
  0x34   : > { %1201 = vmatprep.subr.bf16.mxu0 %v1622_v38  ;;  %1241 = vmatprep.subr.bf16.mxu1 %v1622_v38  ;;  %v1418_v63 = vld [vmem:[%s1653_s29 + $0x70] ss:$8 sps:$4 sm:$0xff]   ;;  %v1424_v1 = vld [vmem:[%s1653_s29 + $0xc4] ss:$8 sps:$4 sm:$0xff]   ;;  %v1422_v3 = vld [vmem:[%s1653_s29 + $0xc0] ss:$8 sps:$4 sm:$0xff]  }
  0x35   : > { %v1425_v4 = vld [vmem:[%s1653_s29 + $0x94] ss:$8 sps:$4 sm:$0xff]   ;;  %v1429_v6 = vld [vmem:[%s1653_s29 + $0x90] ss:$8 sps:$4 sm:$0xff]   ;;  %v1431_v8 = vld [vmem:[%s1653_s29 + $0xa4] ss:$8 sps:$4 sm:$0xff]  }
  0x36   : > { %v1427_v5 = vld [vmem:[%s1653_s29 + $0xd4] ss:$8 sps:$4 sm:$0xff]   ;;  %v1430_v7 = vld [vmem:[%s1653_s29 + $0xd0] ss:$8 sps:$4 sm:$0xff]   ;;  %v1433_v9 = vld [vmem:[%s1653_s29 + $0xe4] ss:$8 sps:$4 sm:$0xff]  }
  0x37   : > { %1202 = vmatpush3.bf16.msra.mxu0 %v1630_v39  ;;  %1242 = vmatpush3.bf16.msra.mxu1 %v1630_v39  ;;  %v1435_v10 = vld [vmem:[%s1653_s29 + $0xa0] ss:$8 sps:$4 sm:$0xff]   ;;  %v1437_v12 = vld [vmem:[%s1653_s29 + $0xb4] ss:$8 sps:$4 sm:$0xff]   ;;  %v1441_v14 = vld [vmem:[%s1653_s29 + $0xb0] ss:$8 sps:$4 sm:$0xff]  }
  0x38   : > { %1203 = vmatprep.subr.bf16.mxu0 %v1637_v40  ;;  %1243 = vmatprep.subr.bf16.mxu1 %v1637_v40  ;;  %v1436_v11 = vld [vmem:[%s1653_s29 + $0xe0] ss:$8 sps:$4 sm:$0xff]   ;;  %v1439_v13 = vld [vmem:[%s1653_s29 + $0xf4] ss:$8 sps:$4 sm:$0xff]   ;;  %v1442_v15 = vld [vmem:[%s1653_s29 + $0xf0] ss:$8 sps:$4 sm:$0xff]  }
  0x3b   : > { %1204 = vmatpush3.bf16.msra.mxu0 %v1644_v41  ;;  %1244 = vmatpush3.bf16.msra.mxu1 %v1644_v41 }
  0x3c   : > { %1205 = vmatprep.subr.bf16.mxu0 %v1651_v42  ;;  %1245 = vmatprep.subr.bf16.mxu1 %v1651_v42 }
  0x3f   : > { %1206 = vmatpush3.bf16.msra.mxu0 %v1662_v45  ;;  %1246 = vmatpush3.bf16.msra.mxu1 %v1662_v45 }
  0x40   : > { %1207 = vmatprep.subr.bf16.mxu0 %v1669_v46  ;;  %1247 = vmatprep.subr.bf16.mxu1 %v1669_v46 }
  0x43   : > { %1208 = vmatpush3.bf16.msra.mxu0 %v1676_v47  ;;  %1248 = vmatpush3.bf16.msra.mxu1 %v1676_v47 }
  0x44   : > { %1209 = vmatprep.subr.bf16.mxu0 %v1683_v48  ;;  %1249 = vmatprep.subr.bf16.mxu1 %v1683_v48 }
  0x47   : > { %1210 = vmatpush3.bf16.msra.mxu0 %v1690_v49  ;;  %1250 = vmatpush3.bf16.msra.mxu1 %v1690_v49 }
  0x48   : > { %1275 = vmatprep.subr.bf16.mxu0 %v1379_v32  ;;  %1315 = vmatprep.subr.bf16.mxu1 %v1379_v32 }
  0x4a   : > { %544 = vmatmul.mubr.bf16.vlgmr.msra.gmra.mxu0 %v1395_v50  ;;  %658 = vmatmul.mubr.bf16.vlgmr.msra.gmra.mxu1 %v1398_v51 }
  0x4b   : > { %1276 = vmatpush3.bf16.msra.mxu0 %v1380_v33  ;;  %1316 = vmatpush3.bf16.msra.mxu1 %v1380_v33 }
  0x4c   : > { %1277 = vmatprep.subr.bf16.mxu0 %v1381_v34  ;;  %1317 = vmatprep.subr.bf16.mxu1 %v1381_v34 }
  0x4d   : > { %551 = vmatprep.mubr.bf16.mxu0 %v1401_v52  ;;  %665 = vmatprep.mubr.bf16.mxu1 %v1403_v53 }
  0x4f   : > { %1278 = vmatpush3.bf16.msra.mxu0 %v1603_v35  ;;  %1318 = vmatpush3.bf16.msra.mxu1 %v1603_v35 }
  0x50   : > { %1279 = vmatprep.subr.bf16.mxu0 %v1608_v36  ;;  %1319 = vmatprep.subr.bf16.mxu1 %v1608_v36 }
  0x52   : > { %552 = vmatmul.mubr.bf16.gmra.mxu0 %v1405_v54  ;;  %666 = vmatmul.mubr.bf16.gmra.mxu1 %v1406_v55 }
  0x53   : > { %1280 = vmatpush3.bf16.msra.mxu0 %v1615_v37  ;;  %1320 = vmatpush3.bf16.msra.mxu1 %v1615_v37 }
  0x54   : > { %1281 = vmatprep.subr.bf16.mxu0 %v1622_v38  ;;  %1321 = vmatprep.subr.bf16.mxu1 %v1622_v38 }
  0x55   : > { %559 = vmatprep.mubr.bf16.mxu0 %v1407_v56  ;;  %673 = vmatprep.mubr.bf16.mxu1 %v1409_v57 }
  0x57   : > { %1282 = vmatpush3.bf16.msra.mxu0 %v1630_v39  ;;  %1322 = vmatpush3.bf16.msra.mxu1 %v1630_v39 }
  0x58   : > { %1283 = vmatprep.subr.bf16.mxu0 %v1637_v40  ;;  %1323 = vmatprep.subr.bf16.mxu1 %v1637_v40 }
  0x5a   : > { %560 = vmatmul.mubr.bf16.gmra.mxu0 %v1411_v58  ;;  %674 = vmatmul.mubr.bf16.gmra.mxu1 %v1412_v59 }
  0x5b   : > { %1284 = vmatpush3.bf16.msra.mxu0 %v1644_v41  ;;  %1324 = vmatpush3.bf16.msra.mxu1 %v1644_v41 }
  0x5c   : > { %1285 = vmatprep.subr.bf16.mxu0 %v1651_v42  ;;  %1325 = vmatprep.subr.bf16.mxu1 %v1651_v42 }
  0x5d   : > { %567 = vmatprep.mubr.bf16.mxu0 %v1413_v60  ;;  %681 = vmatprep.mubr.bf16.mxu1 %v1415_v61 }
  0x5f   : > { %1286 = vmatpush3.bf16.msra.mxu0 %v1662_v45  ;;  %1326 = vmatpush3.bf16.msra.mxu1 %v1662_v45 }
  0x60   : > { %1287 = vmatprep.subr.bf16.mxu0 %v1669_v46  ;;  %1327 = vmatprep.subr.bf16.mxu1 %v1669_v46 }
  0x62   : > { %568 = vmatmul.mubr.bf16.gmra.mxu0 %v1417_v62  ;;  %682 = vmatmul.mubr.bf16.gmra.mxu1 %v1418_v63 }
  0x63   : > { %1288 = vmatpush3.bf16.msra.mxu0 %v1676_v47  ;;  %1328 = vmatpush3.bf16.msra.mxu1 %v1676_v47 }
  0x64   : > { %1289 = vmatprep.subr.bf16.mxu0 %v1683_v48  ;;  %1329 = vmatprep.subr.bf16.mxu1 %v1683_v48 }
  0x65   : > { %779 = vmatprep.mubr.bf16.mxu0 %v1421_v0  ;;  %901 = vmatprep.mubr.bf16.mxu1 %v1424_v1 }
  0x67   : > { %1290 = vmatpush3.bf16.msra.mxu0 %v1690_v49  ;;  %1330 = vmatpush3.bf16.msra.mxu1 %v1690_v49 }
  0x6a   : > { %780 = vmatmul.mubr.bf16.vlgmr.msra.gmra.mxu0 %v1419_v2  ;;  %902 = vmatmul.mubr.bf16.vlgmr.msra.gmra.mxu1 %v1422_v3 }
  0x6b   : > { %787 = vmatprep.mubr.bf16.mxu0 %v1425_v4  ;;  %909 = vmatprep.mubr.bf16.mxu1 %v1427_v5  ;;  %v1781_v5 = vld [vmem:[%s1824_s2] ss:$0 sm:$0xff] }
  0x72   : > { %788 = vmatmul.mubr.bf16.gmra.mxu0 %v1429_v6  ;;  %910 = vmatmul.mubr.bf16.gmra.mxu1 %v1430_v7 }
  0x73   : > { %795 = vmatprep.mubr.bf16.mxu0 %v1431_v8  ;;  %917 = vmatprep.mubr.bf16.mxu1 %v1433_v9 }
  0x7a   : > { %796 = vmatmul.mubr.bf16.gmra.mxu0 %v1435_v10  ;;  %918 = vmatmul.mubr.bf16.gmra.mxu1 %v1436_v11 }
  0x7b   : > { %803 = vmatprep.mubr.bf16.mxu0 %v1437_v12  ;;  %925 = vmatprep.mubr.bf16.mxu1 %v1439_v13 }
  0x82   : > { %804 = vmatmul.mubr.bf16.gmra.mxu0 %v1441_v14  ;;  %926 = vmatmul.mubr.bf16.gmra.mxu1 %v1442_v15 }
 0x10a   : > { %v1211_v16 = vpop.f32.mrf.mxu0  ;;  %v1251_v17 = vpop.f32.mrf.mxu1 }
 0x10c   : > { %v1212_v18 = vpop.f32.mrf.mxu0  ;;  %v1252_v19 = vpop.f32.mrf.mxu1 }
 0x10d   : > { %v1213_v48 = vadd.f32 %v1212_v18, %v1211_v16  ;;  %v1253_v49 = vadd.f32 %v1252_v19, %v1251_v17 }
 0x10e   : > { %v1214_v20 = vpop.f32.mrf.mxu0  ;;  %v1254_v21 = vpop.f32.mrf.mxu1 }
 0x10f   : > { %v690_v56 = vmax.f32 %v1213_v48, %v1253_v49 }
 0x110   : > { %v1215_v22 = vpop.f32.mrf.mxu0  ;;  %v1255_v23 = vpop.f32.mrf.mxu1 }
 0x111   : > { %v1216_v52 = vadd.f32 %v1215_v22, %v1214_v20  ;;  %v1256_v53 = vadd.f32 %v1255_v23, %v1254_v21 }
 0x112   : > { %v1217_v24 = vpop.f32.mrf.mxu0  ;;  %v1257_v25 = vpop.f32.mrf.mxu1 }
 0x113   : > { %v691_v62 = vmax.f32 %v1216_v52, %v1256_v53 }
 0x114   : > { %v1218_v26 = vpop.f32.mrf.mxu0  ;;  %v1258_v27 = vpop.f32.mrf.mxu1 }
 0x115   : > { %v1219_v1 = vadd.f32 %v1218_v26, %v1217_v24  ;;  %v1259_v2 = vadd.f32 %v1258_v27, %v1257_v25 }
 0x116   : > { %v1220_v28 = vpop.f32.mrf.mxu0  ;;  %v1260_v29 = vpop.f32.mrf.mxu1 }
 0x117   : > { %v692_v14 = vmax.f32 %v1219_v1, %v1259_v2 }
 0x118   : > { %v1221_v30 = vpop.f32.mrf.mxu0  ;;  %v1261_v31 = vpop.f32.mrf.mxu1 }
 0x119   : > { %v1222_v10 = vadd.f32 %v1221_v30, %v1220_v28  ;;  %v1262_v11 = vadd.f32 %v1261_v31, %v1260_v29 }
 0x11a   : > { %v1223_v32 = vpop.f32.mrf.mxu0  ;;  %v1263_v33 = vpop.f32.mrf.mxu1 }
 0x11b   : > { %v693_v23 = vmax.f32 %v1222_v10, %v1262_v11 }
 0x11c   : > { %v1224_v34 = vpop.f32.mrf.mxu0  ;;  %v1264_v35 = vpop.f32.mrf.mxu1 }
 0x11d   : > { %v1225_v24 = vadd.f32 %v1224_v34, %v1223_v32  ;;  %v1265_v25 = vadd.f32 %v1264_v35, %v1263_v33 }
 0x11e   : > { %v1752_v36 = vpop.f32.mrf.mxu0  ;;  %v1754_v37 = vpop.f32.mrf.mxu1 }
 0x11f   : > { %v694_v53 = vmax.f32 %v1225_v24, %v1265_v25 }
 0x120   : > { %v1756_v38 = vpop.f32.mrf.mxu0  ;;  %v1758_v39 = vpop.f32.mrf.mxu1 }
 0x121   : > { %v1228_v32 = vadd.f32 %v1756_v38, %v1752_v36  ;;  %v1268_v33 = vadd.f32 %v1758_v39, %v1754_v37 }
 0x122   : > { %v1760_v40 = vpop.f32.mrf.mxu0  ;;  %v1762_v41 = vpop.f32.mrf.mxu1 }
 0x124   : > { %v1764_v42 = vpop.f32.mrf.mxu0  ;;  %v1766_v43 = vpop.f32.mrf.mxu1 }
 0x125   : > { %v1231_v36 = vadd.f32 %v1764_v42, %v1760_v40  ;;  %v1271_v37 = vadd.f32 %v1766_v43, %v1762_v41 }
 0x126   : > { %v1768_v44 = vpop.f32.mrf.mxu0  ;;  %v1770_v45 = vpop.f32.mrf.mxu1 }
 0x127   : > { %v696_v43 = vmax.f32 %v1231_v36, %v1271_v37 }
 0x128   : > { %v1772_v46 = vpop.f32.mrf.mxu0  ;;  %v1774_v47 = vpop.f32.mrf.mxu1 }
 0x129   : > { %v1274_v40 = vadd.f32 %v1774_v47, %v1770_v45 }
 0x12a   : > { %v1291_v50 = vpop.f32.mrf.mxu0  ;;  %v1331_v51 = vpop.f32.mrf.mxu1 }
 0x12c   : > { %v1292_v54 = vpop.f32.mrf.mxu0  ;;  %v1332_v55 = vpop.f32.mrf.mxu1 }
 0x12d   : > { %v1293_v57 = vadd.f32 %v1292_v54, %v1291_v50  ;;  %v1333_v61 = vadd.f32 %v1332_v55, %v1331_v51 }
 0x12e   : > { %v1294_v58 = vpop.f32.mrf.mxu0  ;;  %v1334_v59 = vpop.f32.mrf.mxu1 }
 0x12f   : > { %v812_v60 = vmax.f32 %v690_v56, %v1293_v57 }
 0x130   : > { %v1295_v63 = vpop.f32.mrf.mxu0  ;;  %v1335_v0 = vpop.f32.mrf.mxu1 }
 0x131   : > { %v934_v3 = vmax.f32 %v812_v60, %v1333_v61  ;;  %v1296_v4 = vadd.f32 %v1295_v63, %v1294_v58  ;;  %v1336_v9 = vadd.f32 %v1335_v0, %v1334_v59 }
 0x132   : > { %v1297_v6 = vpop.f32.mrf.mxu0  ;;  %v1337_v7 = vpop.f32.mrf.mxu1 }
 0x133   : > { %v813_v8 = vmax.f32 %v691_v62, %v1296_v4  ;;  %v949_v15 = vadd.f32 %v1781_v5, %v934_v3  ;;  %v695_v62 = vmax.f32 %v1228_v32, %v1268_v33 }
 0x134   : > { %v1298_v12 = vpop.f32.mrf.mxu0  ;;  %v1338_v13 = vpop.f32.mrf.mxu1 }
 0x135   : > { %v935_v16 = vmax.f32 %v813_v8, %v1336_v9  ;;  %v1299_v17 = vadd.f32 %v1298_v12, %v1297_v6  ;;  %v1339_v22 = vadd.f32 %v1338_v13, %v1337_v7  ;;  %v957_v28 = vmax.f32 %v949_v15, 0.0 }
 0x136   : > { %v1300_v18 = vpop.f32.mrf.mxu0  ;;  %v1340_v19 = vpop.f32.mrf.mxu1  ;;  %v1234_v9 = vadd.f32 %v1772_v46, %v1768_v44 }
 0x137   : > { %v950_v20 = vadd.f32 %v1781_v5, %v935_v16  ;;  %v814_v21 = vmax.f32 %v692_v14, %v1299_v17 }
 0x138   : > { %v1301_v26 = vpop.f32.mrf.mxu0  ;;  %v1341_v27 = vpop.f32.mrf.mxu1 }
 0x139   : > { %v958_v29 = vmax.f32 %v950_v20, 0.0  ;;  %v936_v30 = vmax.f32 %v814_v21, %v1339_v22  ;;  %v1302_v31 = vadd.f32 %v1301_v26, %v1300_v18  ;;  %v1342_v52 = vadd.f32 %v1341_v27, %v1340_v19 }
 0x13a   : > { %v1303_v48 = vpop.f32.mrf.mxu0  ;;  %v1343_v49 = vpop.f32.mrf.mxu1  ;;  %v697_v18 = vmax.f32 %v1234_v9, %v1274_v40 }
 0x13b   : > { %v1175_v50 = vpack.c.bf16 %v958_v29, %v957_v28  ;;  %v815_v51 = vmax.f32 %v693_v23, %v1302_v31  ;;  %v951_v54 = vadd.f32 %v1781_v5, %v936_v30 }
 0x13c   : > { %v1304_v34 = vpop.f32.mrf.mxu0  ;;  %v1344_v35 = vpop.f32.mrf.mxu1 }
 0x13d   : > { %1176 = vst [vmem:[%s1788_s23] sm:$0xff] %v1175_v50   ;;  %v937_v55 = vmax.f32 %v815_v51, %v1342_v52  ;;  %v1305_v56 = vadd.f32 %v1304_v34, %v1303_v48  ;;  %v1345_v61 = vadd.f32 %v1344_v35, %v1343_v49  ;;  %v959_v63 = vmax.f32 %v951_v54, 0.0 }
 0x13e   : > { %v1306_v57 = vpop.f32.mrf.mxu0  ;;  %v1346_v58 = vpop.f32.mrf.mxu1 }
 0x13f   : > { %v952_v59 = vadd.f32 %v1781_v5, %v937_v55  ;;  %v816_v60 = vmax.f32 %v694_v53, %v1305_v56 }
 0x140   : > { %v1307_v38 = vpop.f32.mrf.mxu0  ;;  %v1347_v39 = vpop.f32.mrf.mxu1 }
 0x141   : > { %v960_v0 = vmax.f32 %v952_v59, 0.0  ;;  %v938_v1 = vmax.f32 %v816_v60, %v1345_v61  ;;  %v1308_v2 = vadd.f32 %v1307_v38, %v1306_v57  ;;  %v1348_v8 = vadd.f32 %v1347_v39, %v1346_v58 }
 0x142   : > { %v1309_v3 = vpop.f32.mrf.mxu0  ;;  %v1349_v4 = vpop.f32.mrf.mxu1 }
 0x143   : > { %v1180_v6 = vpack.c.bf16 %v960_v0, %v959_v63  ;;  %v817_v7 = vmax.f32 %v695_v62, %v1308_v2  ;;  %v953_v10 = vadd.f32 %v1781_v5, %v938_v1 }
 0x144   : > { %v1310_v42 = vpop.f32.mrf.mxu0  ;;  %v1350_v41 = vpop.f32.mrf.mxu1 }
 0x145   : > { %1192 = vst [vmem:[%s1788_s23 + $0x8] sm:$0xff] %v1180_v6   ;;  %v939_v11 = vmax.f32 %v817_v7, %v1348_v8  ;;  %v1311_v12 = vadd.f32 %v1310_v42, %v1309_v3  ;;  %v1351_v17 = vadd.f32 %v1350_v41, %v1349_v4  ;;  %v961_v45 = vmax.f32 %v953_v10, 0.0 }
 0x146   : > { %v1312_v13 = vpop.f32.mrf.mxu0  ;;  %v1352_v14 = vpop.f32.mrf.mxu1 }
 0x147   : > { %v954_v15 = vadd.f32 %v1781_v5, %v939_v11  ;;  %v818_v16 = vmax.f32 %v696_v43, %v1311_v12 }
 0x148   : > { %v1313_v44 = vpop.f32.mrf.mxu0  ;;  %v1353_v46 = vpop.f32.mrf.mxu1 }
 0x149   : > { %v962_v47 = vmax.f32 %v954_v15, 0.0  ;;  %v940_v19 = vmax.f32 %v818_v16, %v1351_v17  ;;  %v1314_v20 = vadd.f32 %v1313_v44, %v1312_v13  ;;  %v1354_v23 = vadd.f32 %v1353_v46, %v1352_v14 }
 0x14b   : > { %v1185_v21 = vpack.c.bf16 %v962_v47, %v961_v45  ;;  %v819_v22 = vmax.f32 %v697_v18, %v1314_v20  ;;  %v955_v24 = vadd.f32 %v1781_v5, %v940_v19 }
 0x14d   : > { %1193 = vst [vmem:[%s1788_s23 + $0x10] sm:$0xff] %v1185_v21   ;;  %v941_v25 = vmax.f32 %v819_v22, %v1354_v23  ;;  %v963_v27 = vmax.f32 %v955_v24, 0.0 }
 0x14f   : > { %v956_v26 = vadd.f32 %v1781_v5, %v941_v25 }
 0x151   : > { %v964_v28 = vmax.f32 %v956_v26, 0.0 }
 0x153   : > { %v1190_v29 = vpack.c.bf16 %v964_v28, %v963_v27 }
 0x155   : > { %1194 = vst [vmem:[%s1788_s23 + $0x18] sm:$0xff] %v1190_v29  }
 0x156 PF: > { %p10_p9 = scmp.ge.s32.totalorder %s1504_s16, 4   ;;  %s1826_s12 = smov %s1461_s13 }
 0x157   : > { %s1827_s13 = smov %s1513_s19  ;;  %s1828_s14 = smov %s1504_s16 }
 0x158   :  { %12 = sbr.rel (!%p10_p9) target bundleno = 2 (0x2), region = 108 }

// kernel: generator_forward.13
= control target key start
LH: loop header
LB: loop body
LE: loop exit
PB: predicated region body
PF: predicated region fallthrough
CT: control target
= control target key end

     0   :  { %s911_s12 = smov 0   ;;  %s913_s13 = smov 0   ;;  %s1024_s0 = inlined_call_operand.vmem [shape: bf16[4,32,256], index: 0, kind: input, shape index: {}]   ;;  %s1025_s1 = inlined_call_operand.vmem [shape: bf16[256,128], index: 1, kind: input, shape index: {}]   ;;  %s1026_s2 = inlined_call_operand.vmem [shape: f32[1,128], index: 2, kind: input, shape index: {}]   ;;  %s1027_s3 = inlined_call_operand.vmem [shape: bf16[32,128], index: 3, kind: output, shape index: {}]  }
   0x1   :  { %s915_s14 = smov 0  }
   0x2 LB: > { %s671_s15 = sadd.s32 4294967295, %s889_s14   ;;  %s928_s16 = sadd.s32 1, %s889_s14   ;;  %s889_s14 = sphi %s915_s14, %s1030_s14   ;;  %s885_s13 = sphi %s913_s13, %s1029_s13   ;;  %s881_s12 = sphi %s911_s12, %s1028_s12  }
   0x3   : > { %s17_s17 = ssub.s32 %s889_s14, %s928_s16  ;;  %s20_s18 = sadd.s32 1, %s885_s13 }
   0x4   : > { %p18_p0 = scmp.eq.s32.totalorder %s17_s17, 0  ;;  %p27_p1 = scmp.ne.s32.totalorder %s885_s13, %s881_s12 }
   0x5   : > { %p28_p2 = scmp.eq.s32.totalorder %s889_s14, 0  ;;  %p674_p4 = scmp.ge.s32.totalorder %s889_s14, 2 }
   0x6   : > { %s937_s19 = scalar_select %p18_p0, %s885_s13, %s20_s18  }
   0x7   : > { %p29_p3 = por %p28_p2, %p27_p1  ;;  %127 = sbr.rel (%p674_p4) target bundleno = 20 (0x14), region = 24 }
   0xc   : > { %130 = sbr.rel (!%p29_p3) target bundleno = 20 (0x14), region = 28  ;;  %s132_s20 = sand.u32 (%p29_p3), 1, %s885_s13  }
   0xd   : > { %s719_s21 = sshll.u32 (%p29_p3), %s889_s14, 4  ;;  %s675_s22 = sshll.u32 (%p29_p3), %s132_s20, 6 }
   0xe   : > { %s138_s25 = scalar_lea.vmem (%p29_p3), %s1024_s0, %s719_s21  ;;  %s134_s26 = scalar_lea.vmem (%p29_p3), [#allocation2], %s675_s22 }
   0xf   : > { %v181_v0 = vld [vmem:[%s138_s25] sm:$0xff] (%p29_p3)  ;;  %v183_v1 = vld [vmem:[%s138_s25 + $0x8] sm:$0xff] (%p29_p3) }
  0x10   : > { %v185_v2 = vld [vmem:[%s138_s25 + $0x20] sm:$0xff] (%p29_p3)  ;;  %182 = vst [vmem:[%s134_s26] sm:$0xff] (%p29_p3), %v181_v0  ;;  %184 = vst [vmem:[%s134_s26 + $0x8] sm:$0xff] (%p29_p3), %v183_v1  ;;  %v187_v3 = vld [vmem:[%s138_s25 + $0x28] sm:$0xff] (%p29_p3) }
  0x11   : > { %186 = vst [vmem:[%s134_s26 + $0x10] sm:$0xff] %v185_v2  ;;  %v189_v4 = vld [vmem:[%s138_s25 + $0x40] sm:$0xff]  ;;  %v191_v5 = vld [vmem:[%s138_s25 + $0x48] sm:$0xff]  ;;  %188 = vst [vmem:[%s134_s26 + $0x18] sm:$0xff] %v187_v3 }
  0x12   : > { %190 = vst [vmem:[%s134_s26 + $0x20] sm:$0xff] %v189_v4  ;;  %192 = vst [vmem:[%s134_s26 + $0x28] sm:$0xff] %v191_v5  ;;  %v193_v6 = vld [vmem:[%s138_s25 + $0x60] sm:$0xff]  ;;  %v195_v7 = vld [vmem:[%s138_s25 + $0x68] sm:$0xff] }
  0x13   : > { %194 = vst [vmem:[%s134_s26 + $0x30] sm:$0xff] %v193_v6  ;;  %196 = vst [vmem:[%s134_s26 + $0x38] sm:$0xff] %v195_v7 }
  0x14 PF: > { %p679_p5 = scmp.ge.s32.totalorder %s889_s14, 1  ;;  %p201_p6 = scmp.lt.s32.totalorder %s889_s14, 3 }
  0x16   : > { %p202_p7 = pnand %p679_p5, %p201_p6 }
  0x17   : > { %s208_s20 = sand.u32 (!%p202_p7), 1, %s881_s12   ;;  %s681_s18 = sshll.u32 (!%p202_p7), %s671_s15, 1 }
  0x18   : > { %205 = sbr.rel (%p202_p7) target bundleno = 306 (0x132), region = 66  ;;  %s680_s23 = sshll.u32 (!%p202_p7), %s208_s20, 6 }
  0x19   : > { %s981_s29 = scalar_lea.vmem (!%p202_p7), [#allocation2], %s680_s23  ;;  %p233_p8 = scmp.lt.s32.totalorder (!%p202_p7), %s681_s18, 3 }
  0x1d   : > { %v839_v8 = vld [vmem:[%s1025_s1 + $0x78] sm:$0xff]   ;;  %v841_v10 = vld [vmem:[%s1025_s1 + $0x70] sm:$0xff]   ;;  %v843_v12 = vld [vmem:[%s1025_s1 + $0x68] sm:$0xff]   ;;  %s1032_s18 = smov (!%p233_p8, %s681_s18), 3 }
  0x1e   : > { %v840_v9 = vld [vmem:[%s1025_s1 + $0x38] sm:$0xff]   ;;  %727 = vmatprep.subr.bf16.mxu0 %v839_v8  ;;  %749 = vmatprep.subr.bf16.mxu1 %v839_v8  ;;  %v842_v11 = vld [vmem:[%s1025_s1 + $0x30] sm:$0xff]   ;;  %v844_v13 = vld [vmem:[%s1025_s1 + $0x28] sm:$0xff]   ;;  %s682_s14 = sshll.u32 %s1032_s18, 2 }
  0x1f   : > { %728 = vmatpush3.bf16.msra.mxu0 %v840_v9  ;;  %750 = vmatpush3.bf16.msra.mxu1 %v840_v9  ;;  %v845_v14 = vld [vmem:[%s1025_s1 + $0x60] sm:$0xff]   ;;  %v847_v16 = vld [vmem:[%s1025_s1 + $0x58] sm:$0xff]   ;;  %v849_v18 = vld [vmem:[%s1025_s1 + $0x50] sm:$0xff]   ;;  %s236_s23 = scalar_lea.vmem %s1027_s3, %s682_s14 }
  0x20   : > { %729 = vmatprep.subr.bf16.mxu0 %v841_v10  ;;  %751 = vmatprep.subr.bf16.mxu1 %v841_v10  ;;  %v846_v15 = vld [vmem:[%s1025_s1 + $0x20] sm:$0xff]   ;;  %v848_v17 = vld [vmem:[%s1025_s1 + $0x18] sm:$0xff]   ;;  %v850_v21 = vld [vmem:[%s1025_s1 + $0x10] sm:$0xff]  }
  0x21   : > { %v857_v19 = vld [vmem:[%s981_s29 + $0x4] ss:$8 sps:$4 sm:$0xff]   ;;  %v860_v20 = vld [vmem:[%s981_s29 + $0x14] ss:$8 sps:$4 sm:$0xff]   ;;  %v855_v26 = vld [vmem:[%s981_s29] ss:$8 sps:$4 sm:$0xff]  }
  0x22   : > { %v851_v22 = vld [vmem:[%s1025_s1 + $0x48] sm:$0xff]   ;;  %411 = vmatprep.mubr.bf16.mxu0 %v857_v19  ;;  %465 = vmatprep.mubr.bf16.mxu1 %v860_v20  ;;  %v853_v24 = vld [vmem:[%s1025_s1 + $0x40] sm:$0xff]   ;;  %v858_v27 = vld [vmem:[%s981_s29 + $0x10] ss:$8 sps:$4 sm:$0xff]  }
  0x23   : > { %730 = vmatpush3.bf16.msra.mxu0 %v842_v11  ;;  %752 = vmatpush3.bf16.msra.mxu1 %v842_v11  ;;  %v852_v23 = vld [vmem:[%s1025_s1 + $0x8] sm:$0xff]   ;;  %v854_v25 = vld [vmem:[%s1025_s1] sm:$0xff]   ;;  %v866_v29 = vld [vmem:[%s981_s29 + $0x34] ss:$8 sps:$4 sm:$0xff]  }
  0x24   : > { %731 = vmatprep.subr.bf16.mxu0 %v843_v12  ;;  %753 = vmatprep.subr.bf16.mxu1 %v843_v12  ;;  %v863_v28 = vld [vmem:[%s981_s29 + $0x24] ss:$8 sps:$4 sm:$0xff]   ;;  %v861_v30 = vld [vmem:[%s981_s29 + $0x20] ss:$8 sps:$4 sm:$0xff]   ;;  %v864_v31 = vld [vmem:[%s981_s29 + $0x30] ss:$8 sps:$4 sm:$0xff]  }
  0x25   : > { %v713_v59 = vld [vmem:[%s1026_s2] ss:$0 sm:$0xff] }
  0x27   : > { %732 = vmatpush3.bf16.msra.mxu0 %v844_v13  ;;  %754 = vmatpush3.bf16.msra.mxu1 %v844_v13 }
  0x28   : > { %733 = vmatprep.subr.bf16.mxu0 %v845_v14  ;;  %755 = vmatprep.subr.bf16.mxu1 %v845_v14 }
  0x2b   : > { %734 = vmatpush3.bf16.msra.mxu0 %v846_v15  ;;  %756 = vmatpush3.bf16.msra.mxu1 %v846_v15 }
  0x2c   : > { %735 = vmatprep.subr.bf16.mxu0 %v847_v16  ;;  %757 = vmatprep.subr.bf16.mxu1 %v847_v16 }
  0x2f   : > { %736 = vmatpush3.bf16.msra.mxu0 %v848_v17  ;;  %758 = vmatpush3.bf16.msra.mxu1 %v848_v17 }
  0x30   : > { %737 = vmatprep.subr.bf16.mxu0 %v849_v18  ;;  %759 = vmatprep.subr.bf16.mxu1 %v849_v18 }
  0x33   : > { %738 = vmatpush3.bf16.msra.mxu0 %v850_v21  ;;  %760 = vmatpush3.bf16.msra.mxu1 %v850_v21 }
  0x34   : > { %739 = vmatprep.subr.bf16.mxu0 %v851_v22  ;;  %761 = vmatprep.subr.bf16.mxu1 %v851_v22 }
  0x37   : > { %740 = vmatpush3.bf16.msra.mxu0 %v852_v23  ;;  %762 = vmatpush3.bf16.msra.mxu1 %v852_v23 }
  0x38   : > { %741 = vmatprep.subr.bf16.mxu0 %v853_v24  ;;  %763 = vmatprep.subr.bf16.mxu1 %v853_v24 }
  0x3b   : > { %742 = vmatpush3.bf16.msra.mxu0 %v854_v25  ;;  %764 = vmatpush3.bf16.msra.mxu1 %v854_v25 }
  0x3c   : > { %771 = vmatprep.subr.bf16.mxu0 %v839_v8  ;;  %793 = vmatprep.subr.bf16.mxu1 %v839_v8 }
  0x3e   : > { %412 = vmatmul.mubr.bf16.vlgmr.msra.gmra.mxu0 %v855_v26  ;;  %466 = vmatmul.mubr.bf16.vlgmr.msra.gmra.mxu1 %v858_v27 }
  0x3f   : > { %772 = vmatpush3.bf16.msra.mxu0 %v840_v9  ;;  %794 = vmatpush3.bf16.msra.mxu1 %v840_v9 }
  0x40   : > { %773 = vmatprep.subr.bf16.mxu0 %v841_v10  ;;  %795 = vmatprep.subr.bf16.mxu1 %v841_v10 }
  0x41   : > { %521 = vmatprep.mubr.bf16.mxu0 %v863_v28  ;;  %577 = vmatprep.mubr.bf16.mxu1 %v866_v29 }
  0x43   : > { %774 = vmatpush3.bf16.msra.mxu0 %v842_v11  ;;  %796 = vmatpush3.bf16.msra.mxu1 %v842_v11 }
  0x44   : > { %775 = vmatprep.subr.bf16.mxu0 %v843_v12  ;;  %797 = vmatprep.subr.bf16.mxu1 %v843_v12 }
  0x47   : > { %776 = vmatpush3.bf16.msra.mxu0 %v844_v13  ;;  %798 = vmatpush3.bf16.msra.mxu1 %v844_v13 }
  0x48   : > { %777 = vmatprep.subr.bf16.mxu0 %v845_v14  ;;  %799 = vmatprep.subr.bf16.mxu1 %v845_v14 }
  0x4b   : > { %778 = vmatpush3.bf16.msra.mxu0 %v846_v15  ;;  %800 = vmatpush3.bf16.msra.mxu1 %v846_v15 }
  0x4c   : > { %779 = vmatprep.subr.bf16.mxu0 %v847_v16  ;;  %801 = vmatprep.subr.bf16.mxu1 %v847_v16 }
  0x4f   : > { %780 = vmatpush3.bf16.msra.mxu0 %v848_v17  ;;  %802 = vmatpush3.bf16.msra.mxu1 %v848_v17 }
  0x50   : > { %781 = vmatprep.subr.bf16.mxu0 %v849_v18  ;;  %803 = vmatprep.subr.bf16.mxu1 %v849_v18 }
  0x53   : > { %782 = vmatpush3.bf16.msra.mxu0 %v850_v21  ;;  %804 = vmatpush3.bf16.msra.mxu1 %v850_v21 }
  0x54   : > { %783 = vmatprep.subr.bf16.mxu0 %v851_v22  ;;  %805 = vmatprep.subr.bf16.mxu1 %v851_v22 }
  0x57   : > { %784 = vmatpush3.bf16.msra.mxu0 %v852_v23  ;;  %806 = vmatpush3.bf16.msra.mxu1 %v852_v23 }
  0x58   : > { %785 = vmatprep.subr.bf16.mxu0 %v853_v24  ;;  %807 = vmatprep.subr.bf16.mxu1 %v853_v24 }
  0x5b   : > { %786 = vmatpush3.bf16.msra.mxu0 %v854_v25  ;;  %808 = vmatpush3.bf16.msra.mxu1 %v854_v25 }
  0x5e   : > { %522 = vmatmul.mubr.bf16.vlgmr.msra.gmra.mxu0 %v861_v30  ;;  %578 = vmatmul.mubr.bf16.vlgmr.msra.gmra.mxu1 %v864_v31 }
  0xfe   : > { %v743_v32 = vpop.f32.mrf.mxu0  ;;  %v765_v33 = vpop.f32.mrf.mxu1 }
 0x100   : > { %v744_v34 = vpop.f32.mrf.mxu0  ;;  %v766_v35 = vpop.f32.mrf.mxu1 }
 0x101   : > { %v745_v40 = vadd.f32 %v744_v34, %v743_v32  ;;  %v767_v41 = vadd.f32 %v766_v35, %v765_v33 }
 0x102   : > { %v746_v36 = vpop.f32.mrf.mxu0  ;;  %v768_v37 = vpop.f32.mrf.mxu1 }
 0x103   : > { %v474_v46 = vmax.f32 %v745_v40, %v767_v41 }
 0x104   : > { %v747_v38 = vpop.f32.mrf.mxu0  ;;  %v769_v39 = vpop.f32.mrf.mxu1 }
 0x105   : > { %v748_v47 = vadd.f32 %v747_v38, %v746_v36  ;;  %v770_v48 = vadd.f32 %v769_v39, %v768_v37 }
 0x107   : > { %v475_v56 = vmax.f32 %v748_v47, %v770_v48 }
 0x11e   : > { %v787_v42 = vpop.f32.mrf.mxu0  ;;  %v809_v43 = vpop.f32.mrf.mxu1 }
 0x120   : > { %v788_v44 = vpop.f32.mrf.mxu0  ;;  %v810_v45 = vpop.f32.mrf.mxu1 }
 0x121   : > { %v789_v49 = vadd.f32 %v788_v44, %v787_v42  ;;  %v811_v53 = vadd.f32 %v810_v45, %v809_v43 }
 0x122   : > { %v790_v50 = vpop.f32.mrf.mxu0  ;;  %v812_v51 = vpop.f32.mrf.mxu1 }
 0x123   : > { %v530_v52 = vmax.f32 %v474_v46, %v789_v49 }
 0x124   : > { %v791_v54 = vpop.f32.mrf.mxu0  ;;  %v813_v55 = vpop.f32.mrf.mxu1 }
 0x125   : > { %v586_v57 = vmax.f32 %v530_v52, %v811_v53  ;;  %v792_v58 = vadd.f32 %v791_v54, %v790_v50  ;;  %v814_v61 = vadd.f32 %v813_v55, %v812_v51 }
 0x127   : > { %v531_v60 = vmax.f32 %v475_v56, %v792_v58  ;;  %v595_v62 = vadd.f32 %v713_v59, %v586_v57 }
 0x129   : > { %v587_v63 = vmax.f32 %v531_v60, %v814_v61  ;;  %v597_v1 = vmax.f32 %v595_v62, 0.0 }
 0x12b   : > { %v596_v0 = vadd.f32 %v713_v59, %v587_v63 }
 0x12d   : > { %v598_v2 = vmax.f32 %v596_v0, 0.0 }
 0x12f   : > { %v725_v3 = vpack.c.bf16 %v598_v2, %v597_v1 }
 0x131   : > { %726 = vst [vmem:[%s236_s23] sm:$0xff] %v725_v3  }
 0x132 PF: > { %p10_p9 = scmp.ge.s32.totalorder %s928_s16, 4   ;;  %s1028_s12 = smov %s885_s13 }
 0x133   : > { %s1029_s13 = smov %s937_s19  ;;  %s1030_s14 = smov %s928_s16 }
 0x134   :  { %12 = sbr.rel (!%p10_p9) target bundleno = 2 (0x2), region = 108 }

// kernel: generator_forward.15
= control target key start
LH: loop header
LB: loop body
LE: loop exit
PB: predicated region body
PF: predicated region fallthrough
CT: control target
= control target key end

     0   :  { %v1403_v22 = vmov 1966171168   ;;  %v101_v24 = vlaneseq  ;;  %v1404_v40 = vmov 0.0   ;;  %vm1405_vm0 = vmmov 0   ;;  %s1908_s1 = inlined_call_operand.vmem [shape: bf16[640,128], index: 1, kind: input, shape index: {}]   ;;  %s1909_s0 = inlined_call_operand.vmem [shape: bf16[4,2,640], index: 0, kind: input, shape index: {}]   ;;  %s1910_s2 = inlined_call_operand.vmem [shape: f32[1,128], index: 2, kind: input, shape index: {}]   ;;  %s1911_s3 = inlined_call_operand.vmem [shape: bf16[2,128], index: 3, kind: output, shape index: {}]  }
   0x1   :  { %v1429_v0 = vld [vmem:[%s1908_s1 + $0x78] sm:$0xff]   ;;  %v1452_v4 = vld [vmem:[%s1908_s1 + $0x70] sm:$0xff]   ;;  %v1476_v8 = vld [vmem:[%s1908_s1 + $0x68] sm:$0xff]   ;;  %v99_v23 = vunpack.c.l.s4 %v1403_v22 }
   0x2   :  { %v1434_v1 = vld [vmem:[%s1908_s1 + $0xf8] sm:$0xff]   ;;  %1064 = vmatprep.subr.bf16.mxu0 %v1429_v0  ;;  %v1458_v5 = vld [vmem:[%s1908_s1 + $0xf0] sm:$0xff]   ;;  %v1482_v9 = vld [vmem:[%s1908_s1 + $0xe8] sm:$0xff]   ;;  %v102_v30 = vshrl.u32 %v101_v24, 7 }
   0x3   :  { %v1440_v2 = vld [vmem:[%s1908_s1 + $0x38] sm:$0xff]   ;;  %1086 = vmatprep.subr.bf16.mxu1 %v1434_v1  ;;  %v1464_v6 = vld [vmem:[%s1908_s1 + $0x30] sm:$0xff]   ;;  %v1488_v10 = vld [vmem:[%s1908_s1 + $0x28] sm:$0xff]   ;;  %v100_v29 = vunpack.c.0.s8 %v99_v23 }
   0x4   :  { %v1446_v3 = vld [vmem:[%s1908_s1 + $0xb8] sm:$0xff]   ;;  %1065 = vmatpush3.bf16.msra.mxu0 %v1440_v2  ;;  %v1470_v7 = vld [vmem:[%s1908_s1 + $0xb0] sm:$0xff]   ;;  %v1494_v11 = vld [vmem:[%s1908_s1 + $0xa8] sm:$0xff]  }
   0x5   :  { %1087 = vmatpush3.bf16.msra.mxu1 %v1446_v3  ;;  %1066 = vmatprep.subr.bf16.mxu0 %v1452_v4  ;;  %v1500_v12 = vld [vmem:[%s1908_s1 + $0x60] sm:$0xff]   ;;  %v1524_v16 = vld [vmem:[%s1908_s1 + $0x58] sm:$0xff]   ;;  %v1548_v20 = vld [vmem:[%s1908_s1 + $0x50] sm:$0xff]   ;;  %v1604_v35 = vsub.s32 %v100_v29, %v102_v30 }
   0x6   :  { %1088 = vmatprep.subr.bf16.mxu1 %v1458_v5  ;;  %v1506_v13 = vld [vmem:[%s1908_s1 + $0xe0] sm:$0xff]   ;;  %v1530_v17 = vld [vmem:[%s1908_s1 + $0xd8] sm:$0xff]   ;;  %v1554_v21 = vld [vmem:[%s1908_s1 + $0xd0] sm:$0xff]  }
   0x7   :  { %v1512_v14 = vld [vmem:[%s1908_s1 + $0x20] sm:$0xff]   ;;  %v1536_v18 = vld [vmem:[%s1908_s1 + $0x18] sm:$0xff]   ;;  %v1560_v25 = vld [vmem:[%s1908_s1 + $0x10] sm:$0xff]  }
   0x8   :  { %1067 = vmatpush3.bf16.msra.mxu0 %v1464_v6  ;;  %v1518_v15 = vld [vmem:[%s1908_s1 + $0xa0] sm:$0xff]   ;;  %v1542_v19 = vld [vmem:[%s1908_s1 + $0x98] sm:$0xff]   ;;  %v1566_v26 = vld [vmem:[%s1908_s1 + $0x90] sm:$0xff]  }
   0x9   :  { %1089 = vmatpush3.bf16.msra.mxu1 %v1470_v7  ;;  %1068 = vmatprep.subr.bf16.mxu0 %v1476_v8  ;;  %v1572_v27 = vld [vmem:[%s1908_s1 + $0x48] sm:$0xff]   ;;  %v1596_v33 = vld [vmem:[%s1908_s1 + $0x40] sm:$0xff]   ;;  %v1634_v44 = vld [vmem:[%s1908_s1 + $0x138] sm:$0xff]  }
   0xa   :  { %1090 = vmatprep.subr.bf16.mxu1 %v1482_v9  ;;  %v1578_v28 = vld [vmem:[%s1908_s1 + $0xc8] sm:$0xff]   ;;  %v1602_v34 = vld [vmem:[%s1908_s1 + $0xc0] sm:$0xff]   ;;  %v1648_v49 = vld [vmem:[%s1908_s1 + $0x130] sm:$0xff]  }
   0xb   :  { %v1584_v31 = vld [vmem:[%s1908_s1 + $0x8] sm:$0xff]   ;;  %v1610_v36 = vld [vmem:[%s1908_s1] sm:$0xff]   ;;  %v1702_v29 = vld [vmem:[%s1908_s1 + $0x118] sm:$0xff]  }
   0xc   :  { %1069 = vmatpush3.bf16.msra.mxu0 %v1488_v10  ;;  %v1590_v32 = vld [vmem:[%s1908_s1 + $0x88] sm:$0xff]   ;;  %v1616_v37 = vld [vmem:[%s1908_s1 + $0x80] sm:$0xff]   ;;  %v1711_v30 = vld [vmem:[%s1908_s1 + $0x110] sm:$0xff]  }
   0xd   :  { %1091 = vmatpush3.bf16.msra.mxu1 %v1494_v11  ;;  %1070 = vmatprep.subr.bf16.mxu0 %v1500_v12  ;;  %v1622_v38 = vld [vmem:[%s1909_s0] sm:$0x1f]  ;;  %v1639_v47 = vld [vmem:[%s1909_s0 + $0x5] sm:$0x1f]  ;;  %v1061_v48 = vld [vmem:[%s1909_s0 + $0xa] sm:$0x1f] }
   0xe   :  { %1092 = vmatprep.subr.bf16.mxu1 %v1506_v13  ;;  %v104_v39 = vrot.slane %v1622_v38, %v1604_v35  ;;  %v511_v50 = vrot.slane %v1639_v47, %v1604_v35  ;;  %v672_v51 = vcombine.high %v1061_v48, %v1061_v48  ;;  %v1062_v52 = vld [vmem:[%s1909_s0 + $0xf] sm:$0x1f]  ;;  %v679_v53 = vrot.slane %v1061_v48, %v1604_v35  ;;  %v1693_v24 = vld [vmem:[%s1908_s1 + $0x120] sm:$0xff]  }
   0xf   :  { %v847_v54 = vrot.slane %v1062_v52, %v1604_v35  ;;  %v1672_v60 = vld [vmem:[%s1908_s1 + $0x128] sm:$0xff]  }
  0x10   :  { %1071 = vmatpush3.bf16.msra.mxu0 %v1512_v14  ;;  %v112_v41 = vcombine.high %v104_v39, %v104_v39  ;;  %v119_v42 = vrot.slane %v104_v39, %v1604_v35  ;;  %v519_v55 = vcombine.high %v511_v50, %v511_v50  ;;  %v687_v56 = vcombine.high %v679_v53, %v679_v53 }
  0x11   :  { %1093 = vmatpush3.bf16.msra.mxu1 %v1518_v15  ;;  %1072 = vmatprep.subr.bf16.mxu0 %v1524_v16  ;;  %v1663_v57 = vrot.slane %v679_v53, %v1604_v35  ;;  %v1666_v58 = vrot.slane %v672_v51, %v1604_v35  ;;  %v855_v59 = vcombine.high %v847_v54, %v847_v54 }
  0x12   :  { %1094 = vmatprep.subr.bf16.mxu1 %v1530_v17  ;;  %v133_v43 = vrot.slane %v112_v41, %v1604_v35  ;;  %v134_v45 = vcombine.high %v119_v42, %v119_v42  ;;  %v540_v61 = vrot.slane %v519_v55, %v1604_v35  ;;  %v1676_v62 = vrot.slane %v847_v54, %v1604_v35  ;;  %v1722_v41 = vld [vmem:[%s1908_s1 + $0x108] sm:$0xff]  }
  0x13   :  { %v1680_v63 = vrot.slane %v687_v56, %v1604_v35  ;;  %v701_v22 = vrot.slane %v1666_v58, %v1604_v35  ;;  %v1685_v23 = vrot.slane %v855_v59, %v1604_v35  ;;  %v97_v39 = vcombine.high %v1622_v38, %v1622_v38  ;;  %v1732_v38 = vld [vmem:[%s1908_s1 + $0x100] sm:$0xff]  }
  0x14   :  { %1073 = vmatpush3.bf16.msra.mxu0 %v1536_v18  ;;  %413 = vmatprep.mubr.bf16.mxu0 %v133_v43  ;;  %v135_v46 = vcombine.high %v133_v43, %v133_v43  ;;  %v840_v43 = vcombine.high %v1062_v52, %v1062_v52  ;;  %v526_v48 = vrot.slane %v511_v50, %v1604_v35 }
  0x15   :  { %1095 = vmatpush3.bf16.msra.mxu1 %v1542_v19  ;;  %1074 = vmatprep.subr.bf16.mxu0 %v1548_v20  ;;  %v504_v50 = vcombine.high %v1639_v47, %v1639_v47  ;;  %v710_v55 = vcombine.high %v1680_v63, %v1680_v63  ;;  %v709_v56 = vcombine.high %v1663_v57, %v1663_v57 }
  0x16   :  { %1096 = vmatprep.subr.bf16.mxu1 %v1554_v21  ;;  %453 = vmatprep.mubr.bf16.mxu1 %v135_v46  ;;  %v542_v46 = vcombine.high %v540_v61, %v540_v61  ;;  %v1742_v51 = vrot.slane %v840_v43, %v1604_v35  ;;  %v541_v54 = vcombine.high %v526_v48, %v526_v48 }
  0x17   :  { %v518_v53 = vrot.slane %v504_v50, %v1604_v35 }
  0x18   :  { %1075 = vmatpush3.bf16.msra.mxu0 %v1560_v25  ;;  %v869_v52 = vrot.slane %v1742_v51, %v1604_v35 }
  0x19   :  { %1097 = vmatpush3.bf16.msra.mxu1 %v1566_v26  ;;  %1076 = vmatprep.subr.bf16.mxu0 %v1572_v27  ;;  %v533_v47 = vrot.slane %v518_v53, %v1604_v35 }
  0x1a   :  { %1098 = vmatprep.subr.bf16.mxu1 %v1578_v28 }
  0x1c   :  { %1077 = vmatpush3.bf16.msra.mxu0 %v1584_v31 }
  0x1d   :  { %1099 = vmatpush3.bf16.msra.mxu1 %v1590_v32  ;;  %1078 = vmatprep.subr.bf16.mxu0 %v1596_v33 }
  0x1e   :  { %1100 = vmatprep.subr.bf16.mxu1 %v1602_v34 }
  0x20   :  { %1079 = vmatpush3.bf16.msra.mxu0 %v1610_v36 }
  0x21   :  { %1101 = vmatpush3.bf16.msra.mxu1 %v1616_v37  ;;  %1276 = vmatprep.subr.bf16.mxu0 %v1404_v40 }
  0x22   :  { %1117 = vmatprep.subr.bf16.mxu1 %v1429_v0 }
  0x23   :  { %414 = vmatmul.mubr.bf16.vlgmr.msra.gmra.mxu0 %v119_v42  ;;  %v111_v42 = vrot.slane %v97_v39, %v1604_v35 }
  0x24   :  { %1277 = vmatpush3.bf16.msra.mxu0 %v1634_v44  ;;  %454 = vmatmul.mubr.bf16.vlgmr.msra.gmra.mxu1 %v134_v45 }
  0x25   :  { %1278 = vmatprep.subr.bf16.mxu0 %v1404_v40  ;;  %1118 = vmatpush3.bf16.msra.mxu1 %v1440_v2  ;;  %v126_v45 = vrot.slane %v111_v42, %v1604_v35 }
  0x26   :  { %1292 = vmatprep.mubr.msk.bf16.mxu0 %vm1405_vm0, %v1404_v40  ;;  %1119 = vmatprep.subr.bf16.mxu1 %v1452_v4 }
  0x27   :  { %580 = vmatprep.mubr.bf16.mxu1 %v540_v61 }
  0x28   :  { %1279 = vmatpush3.bf16.msra.mxu0 %v1648_v49 }
  0x29   :  { %1280 = vmatprep.subr.bf16.mxu0 %v1404_v40  ;;  %1120 = vmatpush3.bf16.msra.mxu1 %v1464_v6 }
  0x2a   :  { %1121 = vmatprep.subr.bf16.mxu1 %v1476_v8 }
  0x2c   :  { %1281 = vmatpush3.bf16.msra.mxu0 %v1672_v60 }
  0x2d   :  { %1282 = vmatprep.subr.bf16.mxu0 %v1404_v40  ;;  %1122 = vmatpush3.bf16.msra.mxu1 %v1488_v10 }
  0x2e   :  { %1123 = vmatprep.subr.bf16.mxu1 %v1500_v12 }
  0x30   :  { %1283 = vmatpush3.bf16.msra.mxu0 %v1693_v24 }
  0x31   :  { %1284 = vmatprep.subr.bf16.mxu0 %v1404_v40  ;;  %1124 = vmatpush3.bf16.msra.mxu1 %v1512_v14 }
  0x32   :  { %1125 = vmatprep.subr.bf16.mxu1 %v1524_v16 }
  0x34   :  { %1285 = vmatpush3.bf16.msra.mxu0 %v1702_v29 }
  0x35   :  { %1286 = vmatprep.subr.bf16.mxu0 %v1404_v40  ;;  %1126 = vmatpush3.bf16.msra.mxu1 %v1536_v18 }
  0x36   :  { %1127 = vmatprep.subr.bf16.mxu1 %v1548_v20 }
  0x38   :  { %1287 = vmatpush3.bf16.msra.mxu0 %v1711_v30 }
  0x39   :  { %1288 = vmatprep.subr.bf16.mxu0 %v1404_v40  ;;  %1128 = vmatpush3.bf16.msra.mxu1 %v1560_v25 }
  0x3a   :  { %1129 = vmatprep.subr.bf16.mxu1 %v1572_v27 }
  0x3c   :  { %1289 = vmatpush3.bf16.msra.mxu0 %v1722_v41 }
  0x3d   :  { %1290 = vmatprep.subr.bf16.mxu0 %v1404_v40  ;;  %1130 = vmatpush3.bf16.msra.mxu1 %v1584_v31 }
  0x3e   :  { %1131 = vmatprep.subr.bf16.mxu1 %v1596_v33 }
  0x40   :  { %1291 = vmatpush3.bf16.msra.mxu0 %v1732_v38 }
  0x41   :  { %1139 = vmatprep.subr.bf16.mxu0 %v1434_v1  ;;  %1132 = vmatpush3.bf16.msra.mxu1 %v1610_v36 }
  0x42   :  { %1296 = vmatprep.subr.bf16.mxu1 %v1404_v40 }
  0x43   :  { %1293 = vmatmul.mubr.bf16.vlgmr.msra.gmra.mxu0 %v126_v45 }
  0x44   :  { %1140 = vmatpush3.bf16.msra.mxu0 %v1446_v3  ;;  %620 = vmatprep.mubr.bf16.mxu0 %v542_v46 }
  0x45   :  { %581 = vmatmul.mubr.bf16.vlgmr.msra.gmra.mxu1 %v526_v48  ;;  %1141 = vmatprep.subr.bf16.mxu0 %v1458_v5 }
  0x46   :  { %1297 = vmatpush3.bf16.msra.mxu1 %v1634_v44  ;;  %1312 = vmatprep.mubr.msk.bf16.mxu1 %vm1405_vm0, %v1404_v40 }
  0x47   :  { %1298 = vmatprep.subr.bf16.mxu1 %v1404_v40 }
  0x48   :  { %1142 = vmatpush3.bf16.msra.mxu0 %v1470_v7 }
  0x49   :  { %1143 = vmatprep.subr.bf16.mxu0 %v1482_v9 }
  0x4a   :  { %1299 = vmatpush3.bf16.msra.mxu1 %v1648_v49 }
  0x4b   :  { %1300 = vmatprep.subr.bf16.mxu1 %v1404_v40 }
  0x4c   :  { %1144 = vmatpush3.bf16.msra.mxu0 %v1494_v11 }
  0x4d   :  { %1145 = vmatprep.subr.bf16.mxu0 %v1506_v13 }
  0x4e   :  { %1301 = vmatpush3.bf16.msra.mxu1 %v1672_v60 }
  0x4f   :  { %1302 = vmatprep.subr.bf16.mxu1 %v1404_v40 }
  0x50   :  { %1146 = vmatpush3.bf16.msra.mxu0 %v1518_v15 }
  0x51   :  { %1147 = vmatprep.subr.bf16.mxu0 %v1530_v17 }
  0x52   :  { %1303 = vmatpush3.bf16.msra.mxu1 %v1693_v24 }
  0x53   :  { %1304 = vmatprep.subr.bf16.mxu1 %v1404_v40 }
  0x54   :  { %1148 = vmatpush3.bf16.msra.mxu0 %v1542_v19 }
  0x55   :  { %1149 = vmatprep.subr.bf16.mxu0 %v1554_v21 }
  0x56   :  { %1305 = vmatpush3.bf16.msra.mxu1 %v1702_v29 }
  0x57   :  { %1306 = vmatprep.subr.bf16.mxu1 %v1404_v40 }
  0x58   :  { %1150 = vmatpush3.bf16.msra.mxu0 %v1566_v26 }
  0x59   :  { %1151 = vmatprep.subr.bf16.mxu0 %v1578_v28 }
  0x5a   :  { %1307 = vmatpush3.bf16.msra.mxu1 %v1711_v30 }
  0x5b   :  { %1308 = vmatprep.subr.bf16.mxu1 %v1404_v40 }
  0x5c   :  { %1152 = vmatpush3.bf16.msra.mxu0 %v1590_v32 }
  0x5d   :  { %1153 = vmatprep.subr.bf16.mxu0 %v1602_v34 }
  0x5e   :  { %1309 = vmatpush3.bf16.msra.mxu1 %v1722_v41 }
  0x5f   :  { %1310 = vmatprep.subr.bf16.mxu1 %v1404_v40 }
  0x60   :  { %1154 = vmatpush3.bf16.msra.mxu0 %v1616_v37 }
  0x61   :  { %1170 = vmatprep.subr.bf16.mxu0 %v1429_v0 }
  0x62   :  { %1311 = vmatpush3.bf16.msra.mxu1 %v1732_v38 }
  0x63   :  { %621 = vmatmul.mubr.bf16.vlgmr.msra.gmra.mxu0 %v541_v54  ;;  %1192 = vmatprep.subr.bf16.mxu1 %v1434_v1 }
  0x64   :  { %1171 = vmatpush3.bf16.msra.mxu0 %v1440_v2  ;;  %748 = vmatprep.mubr.bf16.mxu0 %v1680_v63 }
  0x65   :  { %1313 = vmatmul.mubr.bf16.vlgmr.msra.gmra.mxu1 %v533_v47  ;;  %1172 = vmatprep.subr.bf16.mxu0 %v1452_v4 }
  0x66   :  { %1193 = vmatpush3.bf16.msra.mxu1 %v1446_v3  ;;  %788 = vmatprep.mubr.bf16.mxu1 %v710_v55 }
  0x67   :  { %1194 = vmatprep.subr.bf16.mxu1 %v1458_v5 }
  0x68   :  { %1173 = vmatpush3.bf16.msra.mxu0 %v1464_v6 }
  0x69   :  { %1174 = vmatprep.subr.bf16.mxu0 %v1476_v8 }
  0x6a   :  { %1195 = vmatpush3.bf16.msra.mxu1 %v1470_v7 }
  0x6b   :  { %1196 = vmatprep.subr.bf16.mxu1 %v1482_v9 }
  0x6c   :  { %1175 = vmatpush3.bf16.msra.mxu0 %v1488_v10 }
  0x6d   :  { %1176 = vmatprep.subr.bf16.mxu0 %v1500_v12 }
  0x6e   :  { %1197 = vmatpush3.bf16.msra.mxu1 %v1494_v11 }
  0x6f   :  { %1198 = vmatprep.subr.bf16.mxu1 %v1506_v13 }
  0x70   :  { %1177 = vmatpush3.bf16.msra.mxu0 %v1512_v14 }
  0x71   :  { %1178 = vmatprep.subr.bf16.mxu0 %v1524_v16 }
  0x72   :  { %1199 = vmatpush3.bf16.msra.mxu1 %v1518_v15 }
  0x73   :  { %1200 = vmatprep.subr.bf16.mxu1 %v1530_v17 }
  0x74   :  { %1179 = vmatpush3.bf16.msra.mxu0 %v1536_v18 }
  0x75   :  { %1180 = vmatprep.subr.bf16.mxu0 %v1548_v20 }
  0x76   :  { %1201 = vmatpush3.bf16.msra.mxu1 %v1542_v19 }
  0x77   :  { %1202 = vmatprep.subr.bf16.mxu1 %v1554_v21 }
  0x78   :  { %1181 = vmatpush3.bf16.msra.mxu0 %v1560_v25 }
  0x79   :  { %1182 = vmatprep.subr.bf16.mxu0 %v1572_v27 }
  0x7a   :  { %1203 = vmatpush3.bf16.msra.mxu1 %v1566_v26 }
  0x7b   :  { %1204 = vmatprep.subr.bf16.mxu1 %v1578_v28 }
  0x7c   :  { %1183 = vmatpush3.bf16.msra.mxu0 %v1584_v31 }
  0x7d   :  { %1184 = vmatprep.subr.bf16.mxu0 %v1596_v33 }
  0x7e   :  { %1205 = vmatpush3.bf16.msra.mxu1 %v1590_v32 }
  0x7f   :  { %1206 = vmatprep.subr.bf16.mxu1 %v1602_v34 }
  0x80   :  { %1185 = vmatpush3.bf16.msra.mxu0 %v1610_v36 }
  0x81   :  { %1316 = vmatprep.subr.bf16.mxu0 %v1404_v40 }
  0x82   :  { %1207 = vmatpush3.bf16.msra.mxu1 %v1616_v37 }
  0x83   :  { %749 = vmatmul.mubr.bf16.vlgmr.msra.gmra.mxu0 %v1663_v57  ;;  %1223 = vmatprep.subr.bf16.mxu1 %v1429_v0  ;;  %v878_v0 = vcombine.high %v1685_v23, %v1685_v23 }
  0x84   :  { %1317 = vmatpush3.bf16.msra.mxu0 %v1634_v44  ;;  %1332 = vmatprep.mubr.msk.bf16.mxu0 %vm1405_vm0, %v1404_v40 }
  0x85   :  { %789 = vmatmul.mubr.bf16.vlgmr.msra.gmra.mxu1 %v709_v56  ;;  %1318 = vmatprep.subr.bf16.mxu0 %v1404_v40 }
  0x86   :  { %1224 = vmatpush3.bf16.msra.mxu1 %v1440_v2  ;;  %916 = vmatprep.mubr.bf16.mxu1 %v1685_v23 }
  0x87   :  { %1225 = vmatprep.subr.bf16.mxu1 %v1452_v4 }
  0x88   :  { %1319 = vmatpush3.bf16.msra.mxu0 %v1648_v49 }
  0x89   :  { %1320 = vmatprep.subr.bf16.mxu0 %v1404_v40 }
  0x8a   :  { %1226 = vmatpush3.bf16.msra.mxu1 %v1464_v6 }
  0x8b   :  { %1227 = vmatprep.subr.bf16.mxu1 %v1476_v8 }
  0x8c   :  { %1321 = vmatpush3.bf16.msra.mxu0 %v1672_v60 }
  0x8d   :  { %1322 = vmatprep.subr.bf16.mxu0 %v1404_v40 }
  0x8e   :  { %1228 = vmatpush3.bf16.msra.mxu1 %v1488_v10 }
  0x8f   :  { %1229 = vmatprep.subr.bf16.mxu1 %v1500_v12 }
  0x90   :  { %1323 = vmatpush3.bf16.msra.mxu0 %v1693_v24 }
  0x91   :  { %1324 = vmatprep.subr.bf16.mxu0 %v1404_v40 }
  0x92   :  { %1230 = vmatpush3.bf16.msra.mxu1 %v1512_v14 }
  0x93   :  { %1231 = vmatprep.subr.bf16.mxu1 %v1524_v16 }
  0x94   :  { %1325 = vmatpush3.bf16.msra.mxu0 %v1702_v29 }
  0x95   :  { %1326 = vmatprep.subr.bf16.mxu0 %v1404_v40 }
  0x96   :  { %1232 = vmatpush3.bf16.msra.mxu1 %v1536_v18 }
  0x97   :  { %1233 = vmatprep.subr.bf16.mxu1 %v1548_v20 }
  0x98   :  { %1327 = vmatpush3.bf16.msra.mxu0 %v1711_v30 }
  0x99   :  { %1328 = vmatprep.subr.bf16.mxu0 %v1404_v40 }
  0x9a   :  { %1234 = vmatpush3.bf16.msra.mxu1 %v1560_v25 }
  0x9b   :  { %1235 = vmatprep.subr.bf16.mxu1 %v1572_v27 }
  0x9c   :  { %1329 = vmatpush3.bf16.msra.mxu0 %v1722_v41 }
  0x9d   :  { %1330 = vmatprep.subr.bf16.mxu0 %v1404_v40 }
  0x9e   :  { %1236 = vmatpush3.bf16.msra.mxu1 %v1584_v31 }
  0x9f   :  { %1237 = vmatprep.subr.bf16.mxu1 %v1596_v33 }
  0xa0   :  { %1331 = vmatpush3.bf16.msra.mxu0 %v1732_v38 }
  0xa1   :  { %1245 = vmatprep.subr.bf16.mxu0 %v1434_v1  ;;  %v877_v1 = vcombine.high %v1676_v62, %v1676_v62 }
  0xa2   :  { %1238 = vmatpush3.bf16.msra.mxu1 %v1610_v36 }
  0xa3   :  { %1333 = vmatmul.mubr.bf16.vlgmr.msra.gmra.mxu0 %v701_v22  ;;  %1336 = vmatprep.subr.bf16.mxu1 %v1404_v40 }
  0xa4   :  { %1246 = vmatpush3.bf16.msra.mxu0 %v1446_v3  ;;  %956 = vmatprep.mubr.bf16.mxu0 %v878_v0 }
  0xa5   :  { %917 = vmatmul.mubr.bf16.vlgmr.msra.gmra.mxu1 %v1676_v62  ;;  %1247 = vmatprep.subr.bf16.mxu0 %v1458_v5 }
  0xa6   :  { %1337 = vmatpush3.bf16.msra.mxu1 %v1634_v44  ;;  %1352 = vmatprep.mubr.msk.bf16.mxu1 %vm1405_vm0, %v1404_v40 }
  0xa7   :  { %1338 = vmatprep.subr.bf16.mxu1 %v1404_v40 }
  0xa8   :  { %1248 = vmatpush3.bf16.msra.mxu0 %v1470_v7 }
  0xa9   :  { %1249 = vmatprep.subr.bf16.mxu0 %v1482_v9 }
  0xaa   :  { %1339 = vmatpush3.bf16.msra.mxu1 %v1648_v49 }
  0xab   :  { %1340 = vmatprep.subr.bf16.mxu1 %v1404_v40 }
  0xac   :  { %1250 = vmatpush3.bf16.msra.mxu0 %v1494_v11 }
  0xad   :  { %1251 = vmatprep.subr.bf16.mxu0 %v1506_v13 }
  0xae   :  { %1341 = vmatpush3.bf16.msra.mxu1 %v1672_v60 }
  0xaf   :  { %1342 = vmatprep.subr.bf16.mxu1 %v1404_v40 }
  0xb0   :  { %1252 = vmatpush3.bf16.msra.mxu0 %v1518_v15 }
  0xb1   :  { %1253 = vmatprep.subr.bf16.mxu0 %v1530_v17 }
  0xb2   :  { %1343 = vmatpush3.bf16.msra.mxu1 %v1693_v24 }
  0xb3   :  { %1344 = vmatprep.subr.bf16.mxu1 %v1404_v40 }
  0xb4   :  { %1254 = vmatpush3.bf16.msra.mxu0 %v1542_v19 }
  0xb5   :  { %1255 = vmatprep.subr.bf16.mxu0 %v1554_v21 }
  0xb6   :  { %1345 = vmatpush3.bf16.msra.mxu1 %v1702_v29 }
  0xb7   :  { %1346 = vmatprep.subr.bf16.mxu1 %v1404_v40 }
  0xb8   :  { %1256 = vmatpush3.bf16.msra.mxu0 %v1566_v26 }
  0xb9   :  { %1257 = vmatprep.subr.bf16.mxu0 %v1578_v28 }
  0xba   :  { %1347 = vmatpush3.bf16.msra.mxu1 %v1711_v30 }
  0xbb   :  { %1348 = vmatprep.subr.bf16.mxu1 %v1404_v40 }
  0xbc   :  { %1258 = vmatpush3.bf16.msra.mxu0 %v1590_v32 }
  0xbd   :  { %1259 = vmatprep.subr.bf16.mxu0 %v1602_v34 }
  0xbe   :  { %1349 = vmatpush3.bf16.msra.mxu1 %v1722_v41 }
  0xbf   :  { %1350 = vmatprep.subr.bf16.mxu1 %v1404_v40 }
  0xc0   :  { %1260 = vmatpush3.bf16.msra.mxu0 %v1616_v37 }
  0xc2   :  { %1351 = vmatpush3.bf16.msra.mxu1 %v1732_v38 }
  0xc3   :  { %957 = vmatmul.mubr.bf16.vlgmr.msra.gmra.mxu0 %v877_v1 }
  0xc5   :  { %1353 = vmatmul.mubr.bf16.vlgmr.msra.gmra.mxu1 %v869_v52 }
  0xe3   :  { %v1080_v2 = vpop.f32.mrf.mxu0 }
  0xe4   :  { %v1102_v3 = vpop.f32.mrf.mxu1 }
  0xe5   :  { %v1081_v4 = vpop.f32.mrf.mxu0 }
  0xe6   :  { %v1082_v5 = vadd.f32 %v1081_v4, %v1080_v2  ;;  %v1103_v6 = vpop.f32.mrf.mxu1 }
  0xe7   :  { %v1083_v7 = vpop.f32.mrf.mxu0  ;;  %v1104_v8 = vadd.f32 %v1103_v6, %v1102_v3  ;;  %v1063_v3 = vld [vmem:[%s1910_s2] ss:$0 sm:$0xff] }
  0xe8   :  { %v1105_v9 = vpop.f32.mrf.mxu1 }
  0xe9   :  { %v1084_v10 = vpop.f32.mrf.mxu0  ;;  %v456_v11 = vadd.f32 %v1104_v8, %v1082_v5 }
  0xea   :  { %v1106_v12 = vpop.f32.mrf.mxu1 }
 0x103   :  { %v495_v13 = vpop.f32.mrf.mxu0 }
 0x104   :  { %v496_v14 = vadd.f32 %v495_v13, %v456_v11 }
 0x105   :  { %v1133_v15 = vpop.f32.mrf.mxu1  ;;  %v1294_v16 = vpop.f32.mrf.mxu0 }
 0x107   :  { %v1134_v17 = vpop.f32.mrf.mxu1  ;;  %v498_v18 = vpop.f32.mrf.mxu0 }
 0x108   :  { %v1135_v19 = vadd.f32 %v1134_v17, %v1133_v15 }
 0x109   :  { %v1136_v20 = vpop.f32.mrf.mxu1  ;;  %v1295_v21 = vpop.f32.mrf.mxu0 }
 0x10b   :  { %v1137_v25 = vpop.f32.mrf.mxu1 }
 0x123   :  { %v1155_v26 = vpop.f32.mrf.mxu0 }
 0x125   :  { %v662_v27 = vpop.f32.mrf.mxu1  ;;  %v1156_v28 = vpop.f32.mrf.mxu0 }
 0x126   :  { %v1157_v31 = vadd.f32 %v1156_v28, %v1155_v26 }
 0x127   :  { %v1314_v32 = vpop.f32.mrf.mxu1  ;;  %v1158_v33 = vpop.f32.mrf.mxu0 }
 0x128   :  { %v623_v34 = vadd.f32 %v1157_v31, %v1135_v19 }
 0x129   :  { %v665_v35 = vpop.f32.mrf.mxu1  ;;  %v1159_v36 = vpop.f32.mrf.mxu0 }
 0x12a   :  { %v663_v37 = vadd.f32 %v662_v27, %v623_v34 }
 0x12b   :  { %v1315_v40 = vpop.f32.mrf.mxu1 }
 0x12c   :  { %v668_v44 = vmax.f32 %v496_v14, %v663_v37 }
 0x143   :  { %v1186_v49 = vpop.f32.mrf.mxu0 }
 0x145   :  { %v1208_v57 = vpop.f32.mrf.mxu1  ;;  %v1187_v58 = vpop.f32.mrf.mxu0 }
 0x146   :  { %v1188_v22 = vadd.f32 %v1187_v58, %v1186_v49 }
 0x147   :  { %v1209_v59 = vpop.f32.mrf.mxu1  ;;  %v1189_v60 = vpop.f32.mrf.mxu0 }
 0x148   :  { %v1210_v23 = vadd.f32 %v1209_v59, %v1208_v57 }
 0x149   :  { %v1211_v61 = vpop.f32.mrf.mxu1  ;;  %v1190_v62 = vpop.f32.mrf.mxu0 }
 0x14a   :  { %v791_v24 = vadd.f32 %v1210_v23, %v1188_v22 }
 0x14b   :  { %v1212_v63 = vpop.f32.mrf.mxu1 }
 0x163   :  { %v830_v29 = vpop.f32.mrf.mxu0 }
 0x164   :  { %v831_v30 = vadd.f32 %v830_v29, %v791_v24 }
 0x165   :  { %v1239_v39 = vpop.f32.mrf.mxu1  ;;  %v1334_v41 = vpop.f32.mrf.mxu0 }
 0x166   :  { %v836_v42 = vmax.f32 %v668_v44, %v831_v30 }
 0x167   :  { %v1240_v38 = vpop.f32.mrf.mxu1  ;;  %v833_v43 = vpop.f32.mrf.mxu0 }
 0x168   :  { %v1241_v53 = vadd.f32 %v1240_v38, %v1239_v39 }
 0x169   :  { %v1242_v45 = vpop.f32.mrf.mxu1  ;;  %v1335_v46 = vpop.f32.mrf.mxu0 }
 0x16b   :  { %v1243_v48 = vpop.f32.mrf.mxu1 }
 0x183   :  { %v1261_v51 = vpop.f32.mrf.mxu0 }
 0x185   :  { %v998_v52 = vpop.f32.mrf.mxu1  ;;  %v1262_v50 = vpop.f32.mrf.mxu0 }
 0x186   :  { %v1263_v54 = vadd.f32 %v1262_v50, %v1261_v51 }
 0x187   :  { %v1354_v47 = vpop.f32.mrf.mxu1  ;;  %v1264_v55 = vpop.f32.mrf.mxu0 }
 0x188   :  { %v959_v56 = vadd.f32 %v1263_v54, %v1241_v53 }
 0x189   :  { %v1001_v0 = vpop.f32.mrf.mxu1  ;;  %v1265_v1 = vpop.f32.mrf.mxu0 }
 0x18a   :  { %v999_v2 = vadd.f32 %v998_v52, %v959_v56 }
 0x18b   :  { %v1355_v4 = vpop.f32.mrf.mxu1 }
 0x18c   :  { %v1004_v5 = vmax.f32 %v836_v42, %v999_v2 }
 0x18e   :  { %v1012_v6 = vadd.f32 %v1063_v3, %v1004_v5 }
 0x190   :  { %v1013_v7 = vmax.f32 %v1012_v6, 0.0 }
 0x192   :  { %v1014_v8 = vpack.c.bf16 %v1013_v7, %v1013_v7 }
 0x194   :  { %1015 = vst [vmem:[%s1911_s3] sm:$0x1] %v1014_v8 }

// kernel: generator_forward.16
= control target key start
LH: loop header
LB: loop body
LE: loop exit
PB: predicated region body
PF: predicated region fallthrough
CT: control target
= control target key end

     0   :  { %s779_s12 = smov 0   ;;  %s841_s0 = inlined_call_operand.vmem [shape: bf16[4,2,512], index: 0, kind: input, shape index: {}]   ;;  %s842_s1 = inlined_call_operand.vmem [shape: bf16[4,512,128], index: 1, kind: input, shape index: {}]   ;;  %s843_s2 = inlined_call_operand.vmem [shape: f32[1,128], index: 2, kind: input, shape index: {}]   ;;  %s844_s3 = inlined_call_operand.vmem [shape: bf16[4,2,128], index: 3, kind: output, shape index: {}]  }
   0x1 LB: > { %s620_s13 = sadd.s32 4294967295, %s756_s12   ;;  %p624_p0 = scmp.ge.s32.totalorder %s756_s12, 1  ;;  %s756_s12 = sphi %s779_s12, %s13_s12  }
   0x2   : > { %p146_p1 = scmp.lt.s32.totalorder %s756_s12, 5 }
   0x4   : > { %p147_p2 = pnand %p624_p0, %p146_p1 }
   0x5   : > { %p172_p3 = scmp.lt.s32.totalorder (!%p147_p2), %s620_s13, 3 }
   0x6   : > { %150 = sbr.rel (%p147_p2) target bundleno = 254 (0xfe), region = 32 }
   0xb   : > { %s846_s13 = smov (!%p172_p3, %s620_s13), 3  ;;  %v758_v22 = vmov 1966171168   ;;  %v269_v24 = vlaneseq  ;;  %v628_v46 = vld [vmem:[%s843_s2] ss:$0 sm:$0xff] }
   0xc   : > { %s664_s14 = sshll.u32 %s846_s13, 8  ;;  %v267_v23 = vunpack.c.l.s4 %v758_v22  ;;  %s625_s18 = sshll.u32 %s846_s13, 2 }
   0xd   : > { %s793_s17 = scalar_lea.vmem %s842_s1, %s664_s14  ;;  %v270_v30 = vshrl.u32 %v269_v24, 7  ;;  %s175_s21 = scalar_lea.vmem %s841_s0, %s625_s18 }
   0xe   : > { %v718_v0 = vld [vmem:[%s793_s17 + $0x78] sm:$0xff]   ;;  %v722_v4 = vld [vmem:[%s793_s17 + $0x70] sm:$0xff]   ;;  %v726_v8 = vld [vmem:[%s793_s17 + $0x68] sm:$0xff]   ;;  %v268_v29 = vunpack.c.0.s8 %v267_v23  ;;  %s183_s26 = scalar_lea.vmem %s844_s3, %s846_s13 }
   0xf   : > { %v719_v1 = vld [vmem:[%s793_s17 + $0xf8] sm:$0xff]   ;;  %665 = vmatprep.subr.bf16.mxu0 %v718_v0  ;;  %v723_v5 = vld [vmem:[%s793_s17 + $0xf0] sm:$0xff]   ;;  %v727_v9 = vld [vmem:[%s793_s17 + $0xe8] sm:$0xff]  }
  0x10   : > { %v720_v2 = vld [vmem:[%s793_s17 + $0x38] sm:$0xff]   ;;  %687 = vmatprep.subr.bf16.mxu1 %v719_v1  ;;  %v724_v6 = vld [vmem:[%s793_s17 + $0x30] sm:$0xff]   ;;  %v728_v10 = vld [vmem:[%s793_s17 + $0x28] sm:$0xff]   ;;  %v271_v35 = vsub.s32 %v268_v29, %v270_v30 }
  0x11   : > { %v721_v3 = vld [vmem:[%s793_s17 + $0xb8] sm:$0xff]   ;;  %666 = vmatpush3.bf16.msra.mxu0 %v720_v2  ;;  %v725_v7 = vld [vmem:[%s793_s17 + $0xb0] sm:$0xff]   ;;  %v729_v11 = vld [vmem:[%s793_s17 + $0xa8] sm:$0xff]  }
  0x12   : > { %688 = vmatpush3.bf16.msra.mxu1 %v721_v3  ;;  %667 = vmatprep.subr.bf16.mxu0 %v722_v4  ;;  %v730_v12 = vld [vmem:[%s793_s17 + $0x60] sm:$0xff]   ;;  %v734_v16 = vld [vmem:[%s793_s17 + $0x58] sm:$0xff]   ;;  %v738_v20 = vld [vmem:[%s793_s17 + $0x50] sm:$0xff]  }
  0x13   : > { %689 = vmatprep.subr.bf16.mxu1 %v723_v5  ;;  %v731_v13 = vld [vmem:[%s793_s17 + $0xe0] sm:$0xff]   ;;  %v735_v17 = vld [vmem:[%s793_s17 + $0xd8] sm:$0xff]   ;;  %v739_v21 = vld [vmem:[%s793_s17 + $0xd0] sm:$0xff]  }
  0x14   : > { %v732_v14 = vld [vmem:[%s793_s17 + $0x20] sm:$0xff]   ;;  %v736_v18 = vld [vmem:[%s793_s17 + $0x18] sm:$0xff]   ;;  %v740_v25 = vld [vmem:[%s793_s17 + $0x10] sm:$0xff]  }
  0x15   : > { %668 = vmatpush3.bf16.msra.mxu0 %v724_v6  ;;  %v733_v15 = vld [vmem:[%s793_s17 + $0xa0] sm:$0xff]   ;;  %v737_v19 = vld [vmem:[%s793_s17 + $0x98] sm:$0xff]   ;;  %v741_v26 = vld [vmem:[%s793_s17 + $0x90] sm:$0xff]  }
  0x16   : > { %690 = vmatpush3.bf16.msra.mxu1 %v725_v7  ;;  %669 = vmatprep.subr.bf16.mxu0 %v726_v8  ;;  %v742_v27 = vld [vmem:[%s793_s17 + $0x48] sm:$0xff]   ;;  %v746_v33 = vld [vmem:[%s793_s17 + $0x40] sm:$0xff]  }
  0x17   : > { %691 = vmatprep.subr.bf16.mxu1 %v727_v9  ;;  %v743_v28 = vld [vmem:[%s793_s17 + $0xc8] sm:$0xff]   ;;  %v747_v34 = vld [vmem:[%s793_s17 + $0xc0] sm:$0xff]  }
  0x18   : > { %v744_v31 = vld [vmem:[%s793_s17 + $0x8] sm:$0xff]   ;;  %v748_v36 = vld [vmem:[%s793_s17] sm:$0xff]  }
  0x19   : > { %670 = vmatpush3.bf16.msra.mxu0 %v728_v10  ;;  %v745_v32 = vld [vmem:[%s793_s17 + $0x88] sm:$0xff]   ;;  %v749_v37 = vld [vmem:[%s793_s17 + $0x80] sm:$0xff]  }
  0x1a   : > { %692 = vmatpush3.bf16.msra.mxu1 %v729_v11  ;;  %671 = vmatprep.subr.bf16.mxu0 %v730_v12  ;;  %v629_v38 = vld.sshfl [vmem:[%s175_s21] sm:$0x33 pattern:$0x75316420] }
  0x1b   : > { %693 = vmatprep.subr.bf16.mxu1 %v731_v13  ;;  %v265_v39 = vcombine.high %v629_v38, %v629_v38  ;;  %v272_v40 = vrot.slane %v629_v38, %v271_v35 }
  0x1d   : > { %672 = vmatpush3.bf16.msra.mxu0 %v732_v14  ;;  %v279_v41 = vrot.slane %v265_v39, %v271_v35  ;;  %v280_v42 = vcombine.high %v272_v40, %v272_v40 }
  0x1e   : > { %694 = vmatpush3.bf16.msra.mxu1 %v733_v15  ;;  %673 = vmatprep.subr.bf16.mxu0 %v734_v16 }
  0x1f   : > { %695 = vmatprep.subr.bf16.mxu1 %v735_v17  ;;  %510 = vmatprep.mubr.bf16.mxu0 %v279_v41  ;;  %v281_v43 = vcombine.high %v279_v41, %v279_v41 }
  0x21   : > { %674 = vmatpush3.bf16.msra.mxu0 %v736_v18  ;;  %550 = vmatprep.mubr.bf16.mxu1 %v281_v43 }
  0x22   : > { %696 = vmatpush3.bf16.msra.mxu1 %v737_v19  ;;  %675 = vmatprep.subr.bf16.mxu0 %v738_v20 }
  0x23   : > { %697 = vmatprep.subr.bf16.mxu1 %v739_v21 }
  0x25   : > { %676 = vmatpush3.bf16.msra.mxu0 %v740_v25 }
  0x26   : > { %698 = vmatpush3.bf16.msra.mxu1 %v741_v26  ;;  %677 = vmatprep.subr.bf16.mxu0 %v742_v27 }
  0x27   : > { %699 = vmatprep.subr.bf16.mxu1 %v743_v28 }
  0x29   : > { %678 = vmatpush3.bf16.msra.mxu0 %v744_v31 }
  0x2a   : > { %700 = vmatpush3.bf16.msra.mxu1 %v745_v32  ;;  %679 = vmatprep.subr.bf16.mxu0 %v746_v33 }
  0x2b   : > { %701 = vmatprep.subr.bf16.mxu1 %v747_v34 }
  0x2d   : > { %680 = vmatpush3.bf16.msra.mxu0 %v748_v36 }
  0x2e   : > { %702 = vmatpush3.bf16.msra.mxu1 %v749_v37 }
  0x30   : > { %511 = vmatmul.mubr.bf16.vlgmr.msra.gmra.mxu0 %v272_v40 }
  0x31   : > { %551 = vmatmul.mubr.bf16.vlgmr.msra.gmra.mxu1 %v280_v42 }
  0xf0   : > { %v681_v44 = vpop.f32.mrf.mxu0 }
  0xf1   : > { %v703_v45 = vpop.f32.mrf.mxu1 }
  0xf2   : > { %v682_v47 = vpop.f32.mrf.mxu0 }
  0xf3   : > { %v683_v48 = vadd.f32 %v682_v47, %v681_v44  ;;  %v704_v49 = vpop.f32.mrf.mxu1 }
  0xf4   : > { %v684_v50 = vpop.f32.mrf.mxu0  ;;  %v705_v52 = vadd.f32 %v704_v49, %v703_v45 }
  0xf5   : > { %v513_v51 = vadd.f32 %v683_v48, %v628_v46  ;;  %v706_v53 = vpop.f32.mrf.mxu1 }
  0xf6   : > { %v685_v54 = vpop.f32.mrf.mxu0 }
  0xf7   : > { %v553_v55 = vadd.f32 %v705_v52, %v513_v51  ;;  %v707_v56 = vpop.f32.mrf.mxu1 }
  0xf9   : > { %v558_v57 = vmax.f32 %v553_v55, 0.0 }
  0xfb   : > { %v559_v58 = vpack.c.bf16 %v558_v57, %v558_v57 }
  0xfd   : > { %560 = vst [vmem:[%s183_s26] sm:$0x1] %v559_v58 }
  0xfe PF: > { %s13_s12 = sadd.s32 1, %s756_s12  }
  0xff   : > { %p10_p4 = scmp.ge.s32.totalorder %s13_s12, 6  }
 0x101   :  { %12 = sbr.rel (!%p10_p4) target bundleno = 1 (0x1), region = 65 }

// kernel: generator_forward.14
= control target key start
LH: loop header
LB: loop body
LE: loop exit
PB: predicated region body
PF: predicated region fallthrough
CT: control target
= control target key end

     0   :  { %v885_v0 = vmov 0.0   ;;  %vm886_vm0 = vmmov 0   ;;  %s1193_s1 = inlined_call_operand.vmem [shape: bf16[384,128], index: 1, kind: input, shape index: {}]   ;;  %s1194_s0 = inlined_call_operand.vmem [shape: bf16[4,8,384], index: 0, kind: input, shape index: {}]   ;;  %s1195_s2 = inlined_call_operand.vmem [shape: f32[1,128], index: 2, kind: input, shape index: {}]   ;;  %s1196_s3 = inlined_call_operand.vmem [shape: bf16[8,128], index: 3, kind: output, shape index: {}]  }
   0x1   :  { %767 = vmatprep.subr.bf16.mxu1 %v885_v0  ;;  %v911_v1 = vld [vmem:[%s1193_s1 + $0x78] sm:$0xff]   ;;  %783 = vmatprep.mubr.msk.bf16.mxu1 %vm886_vm0, %v885_v0  ;;  %v930_v4 = vld [vmem:[%s1193_s1 + $0x70] sm:$0xff]   ;;  %v948_v7 = vld [vmem:[%s1193_s1 + $0x68] sm:$0xff]  }
   0x2   :  { %v918_v2 = vld [vmem:[%s1193_s1 + $0xb8] sm:$0xff]   ;;  %643 = vmatprep.subr.bf16.mxu0 %v911_v1  ;;  %v937_v5 = vld [vmem:[%s1193_s1 + $0xb0] sm:$0xff]   ;;  %v954_v8 = vld [vmem:[%s1193_s1 + $0xa8] sm:$0xff]  }
   0x3   :  { %v924_v3 = vld [vmem:[%s1193_s1 + $0x38] sm:$0xff]   ;;  %768 = vmatpush3.bf16.msra.mxu1 %v918_v2  ;;  %v943_v6 = vld [vmem:[%s1193_s1 + $0x30] sm:$0xff]   ;;  %v961_v9 = vld [vmem:[%s1193_s1 + $0x28] sm:$0xff]  }
   0x4   :  { %644 = vmatpush3.bf16.msra.mxu0 %v924_v3  ;;  %769 = vmatprep.subr.bf16.mxu1 %v885_v0  ;;  %v967_v10 = vld [vmem:[%s1193_s1 + $0x60] sm:$0xff]   ;;  %v986_v13 = vld [vmem:[%s1193_s1 + $0x58] sm:$0xff]   ;;  %v1005_v16 = vld [vmem:[%s1193_s1 + $0x50] sm:$0xff]  }
   0x5   :  { %645 = vmatprep.subr.bf16.mxu0 %v930_v4  ;;  %v973_v11 = vld [vmem:[%s1193_s1 + $0xa0] sm:$0xff]   ;;  %v992_v14 = vld [vmem:[%s1193_s1 + $0x98] sm:$0xff]   ;;  %v1011_v17 = vld [vmem:[%s1193_s1 + $0x90] sm:$0xff]  }
   0x6   :  { %v980_v12 = vld [vmem:[%s1193_s1 + $0x20] sm:$0xff]   ;;  %v999_v15 = vld [vmem:[%s1193_s1 + $0x18] sm:$0xff]   ;;  %v1018_v18 = vld [vmem:[%s1193_s1 + $0x10] sm:$0xff]  }
   0x7   :  { %770 = vmatpush3.bf16.msra.mxu1 %v937_v5  ;;  %v1024_v19 = vld [vmem:[%s1193_s1 + $0x48] sm:$0xff]   ;;  %v15_v22 = vld [vmem:[%s1194_s0] sm:$0xff]  ;;  %v878_v31 = vld [vmem:[%s1194_s0 + $0x14] ss:$0 sps:$4 sm:$0xff]  }
   0x8   :  { %646 = vmatpush3.bf16.msra.mxu0 %v943_v6  ;;  %771 = vmatprep.subr.bf16.mxu1 %v885_v0  ;;  %v1030_v20 = vld [vmem:[%s1193_s1 + $0x88] sm:$0xff]   ;;  %v1046_v23 = vld [vmem:[%s1193_s1 + $0x40] sm:$0xff]   ;;  %v601_v24 = vcombine.high %v15_v22, %v15_v22  ;;  %v600_v28 = vcombine.low %v15_v22, %v15_v22  ;;  %v632_v33 = vld [vmem:[%s1194_s0 + $0x18] sm:$0xff] }
   0x9   :  { %647 = vmatprep.subr.bf16.mxu0 %v948_v7  ;;  %v1037_v21 = vld [vmem:[%s1193_s1 + $0x8] sm:$0xff]   ;;  %v1052_v25 = vld [vmem:[%s1193_s1 + $0x80] sm:$0xff]   ;;  %v635_v34 = vcombine.high %v632_v33, %v632_v33  ;;  %v634_v36 = vcombine.low %v632_v33, %v632_v33 }
   0xa   :  { %252 = vmatprep.mubr.bf16.mxu0 %v601_v24  ;;  %v1059_v26 = vld [vmem:[%s1193_s1] sm:$0xff]   ;;  %v875_v27 = vld [vmem:[%s1194_s0 + $0x8] ss:$0 sps:$4 sm:$0xff]   ;;  %v627_v29 = vld [vmem:[%s1194_s0 + $0xc] sm:$0xff] }
   0xb   :  { %772 = vmatpush3.bf16.msra.mxu1 %v954_v8  ;;  %v630_v30 = vcombine.high %v627_v29, %v627_v29  ;;  %v629_v32 = vcombine.low %v627_v29, %v627_v29  ;;  %v881_v35 = vld [vmem:[%s1194_s0 + $0x20] ss:$0 sps:$4 sm:$0xff]   ;;  %v637_v37 = vld [vmem:[%s1194_s0 + $0x24] sm:$0xff]  ;;  %v884_v39 = vld [vmem:[%s1194_s0 + $0x2c] ss:$0 sps:$4 sm:$0xff]  }
   0xc   :  { %648 = vmatpush3.bf16.msra.mxu0 %v961_v9  ;;  %773 = vmatprep.subr.bf16.mxu1 %v885_v0  ;;  %v640_v38 = vcombine.high %v637_v37, %v637_v37  ;;  %v639_v40 = vcombine.low %v637_v37, %v637_v37 }
   0xd   :  { %649 = vmatprep.subr.bf16.mxu0 %v967_v10 }
   0xf   :  { %774 = vmatpush3.bf16.msra.mxu1 %v973_v11 }
  0x10   :  { %650 = vmatpush3.bf16.msra.mxu0 %v980_v12  ;;  %775 = vmatprep.subr.bf16.mxu1 %v885_v0 }
  0x11   :  { %651 = vmatprep.subr.bf16.mxu0 %v986_v13 }
  0x13   :  { %776 = vmatpush3.bf16.msra.mxu1 %v992_v14 }
  0x14   :  { %652 = vmatpush3.bf16.msra.mxu0 %v999_v15  ;;  %777 = vmatprep.subr.bf16.mxu1 %v885_v0 }
  0x15   :  { %653 = vmatprep.subr.bf16.mxu0 %v1005_v16 }
  0x17   :  { %778 = vmatpush3.bf16.msra.mxu1 %v1011_v17 }
  0x18   :  { %654 = vmatpush3.bf16.msra.mxu0 %v1018_v18  ;;  %779 = vmatprep.subr.bf16.mxu1 %v885_v0 }
  0x19   :  { %655 = vmatprep.subr.bf16.mxu0 %v1024_v19 }
  0x1b   :  { %780 = vmatpush3.bf16.msra.mxu1 %v1030_v20 }
  0x1c   :  { %656 = vmatpush3.bf16.msra.mxu0 %v1037_v21  ;;  %781 = vmatprep.subr.bf16.mxu1 %v885_v0 }
  0x1d   :  { %657 = vmatprep.subr.bf16.mxu0 %v1046_v23 }
  0x1f   :  { %782 = vmatpush3.bf16.msra.mxu1 %v1052_v25 }
  0x20   :  { %658 = vmatpush3.bf16.msra.mxu0 %v1059_v26  ;;  %787 = vmatprep.subr.bf16.mxu1 %v885_v0 }
  0x21   :  { %674 = vmatprep.subr.bf16.mxu0 %v911_v1 }
  0x22   :  { %784 = vmatmul.mubr.bf16.vlgmr.msra.gmra.mxu1 %v875_v27 }
  0x23   :  { %253 = vmatmul.mubr.bf16.vlgmr.msra.gmra.mxu0 %v600_v28  ;;  %788 = vmatpush3.bf16.msra.mxu1 %v918_v2 }
  0x24   :  { %675 = vmatpush3.bf16.msra.mxu0 %v924_v3  ;;  %789 = vmatprep.subr.bf16.mxu1 %v885_v0 }
  0x25   :  { %676 = vmatprep.subr.bf16.mxu0 %v930_v4  ;;  %803 = vmatprep.mubr.msk.bf16.mxu1 %vm886_vm0, %v885_v0 }
  0x26   :  { %346 = vmatprep.mubr.bf16.mxu0 %v630_v30 }
  0x27   :  { %790 = vmatpush3.bf16.msra.mxu1 %v937_v5 }
  0x28   :  { %677 = vmatpush3.bf16.msra.mxu0 %v943_v6  ;;  %791 = vmatprep.subr.bf16.mxu1 %v885_v0 }
  0x29   :  { %678 = vmatprep.subr.bf16.mxu0 %v948_v7 }
  0x2b   :  { %792 = vmatpush3.bf16.msra.mxu1 %v954_v8 }
  0x2c   :  { %679 = vmatpush3.bf16.msra.mxu0 %v961_v9  ;;  %793 = vmatprep.subr.bf16.mxu1 %v885_v0 }
  0x2d   :  { %680 = vmatprep.subr.bf16.mxu0 %v967_v10 }
  0x2f   :  { %794 = vmatpush3.bf16.msra.mxu1 %v973_v11 }
  0x30   :  { %681 = vmatpush3.bf16.msra.mxu0 %v980_v12  ;;  %795 = vmatprep.subr.bf16.mxu1 %v885_v0 }
  0x31   :  { %682 = vmatprep.subr.bf16.mxu0 %v986_v13 }
  0x33   :  { %796 = vmatpush3.bf16.msra.mxu1 %v992_v14 }
  0x34   :  { %683 = vmatpush3.bf16.msra.mxu0 %v999_v15  ;;  %797 = vmatprep.subr.bf16.mxu1 %v885_v0 }
  0x35   :  { %684 = vmatprep.subr.bf16.mxu0 %v1005_v16 }
  0x37   :  { %798 = vmatpush3.bf16.msra.mxu1 %v1011_v17 }
  0x38   :  { %685 = vmatpush3.bf16.msra.mxu0 %v1018_v18  ;;  %799 = vmatprep.subr.bf16.mxu1 %v885_v0 }
  0x39   :  { %686 = vmatprep.subr.bf16.mxu0 %v1024_v19 }
  0x3b   :  { %800 = vmatpush3.bf16.msra.mxu1 %v1030_v20 }
  0x3c   :  { %687 = vmatpush3.bf16.msra.mxu0 %v1037_v21  ;;  %801 = vmatprep.subr.bf16.mxu1 %v885_v0 }
  0x3d   :  { %688 = vmatprep.subr.bf16.mxu0 %v1046_v23 }
  0x3f   :  { %802 = vmatpush3.bf16.msra.mxu1 %v1052_v25 }
  0x40   :  { %689 = vmatpush3.bf16.msra.mxu0 %v1059_v26  ;;  %807 = vmatprep.subr.bf16.mxu1 %v885_v0 }
  0x41   :  { %705 = vmatprep.subr.bf16.mxu0 %v911_v1 }
  0x42   :  { %804 = vmatmul.mubr.bf16.vlgmr.msra.gmra.mxu1 %v878_v31 }
  0x43   :  { %347 = vmatmul.mubr.bf16.vlgmr.msra.gmra.mxu0 %v629_v32  ;;  %808 = vmatpush3.bf16.msra.mxu1 %v918_v2 }
  0x44   :  { %706 = vmatpush3.bf16.msra.mxu0 %v924_v3  ;;  %809 = vmatprep.subr.bf16.mxu1 %v885_v0 }
  0x45   :  { %707 = vmatprep.subr.bf16.mxu0 %v930_v4  ;;  %823 = vmatprep.mubr.msk.bf16.mxu1 %vm886_vm0, %v885_v0 }
  0x46   :  { %441 = vmatprep.mubr.bf16.mxu0 %v635_v34 }
  0x47   :  { %810 = vmatpush3.bf16.msra.mxu1 %v937_v5 }
  0x48   :  { %708 = vmatpush3.bf16.msra.mxu0 %v943_v6  ;;  %811 = vmatprep.subr.bf16.mxu1 %v885_v0 }
  0x49   :  { %709 = vmatprep.subr.bf16.mxu0 %v948_v7 }
  0x4b   :  { %812 = vmatpush3.bf16.msra.mxu1 %v954_v8 }
  0x4c   :  { %710 = vmatpush3.bf16.msra.mxu0 %v961_v9  ;;  %813 = vmatprep.subr.bf16.mxu1 %v885_v0 }
  0x4d   :  { %711 = vmatprep.subr.bf16.mxu0 %v967_v10 }
  0x4f   :  { %814 = vmatpush3.bf16.msra.mxu1 %v973_v11 }
  0x50   :  { %712 = vmatpush3.bf16.msra.mxu0 %v980_v12  ;;  %815 = vmatprep.subr.bf16.mxu1 %v885_v0 }
  0x51   :  { %713 = vmatprep.subr.bf16.mxu0 %v986_v13 }
  0x53   :  { %816 = vmatpush3.bf16.msra.mxu1 %v992_v14 }
  0x54   :  { %714 = vmatpush3.bf16.msra.mxu0 %v999_v15  ;;  %817 = vmatprep.subr.bf16.mxu1 %v885_v0 }
  0x55   :  { %715 = vmatprep.subr.bf16.mxu0 %v1005_v16 }
  0x57   :  { %818 = vmatpush3.bf16.msra.mxu1 %v1011_v17 }
  0x58   :  { %716 = vmatpush3.bf16.msra.mxu0 %v1018_v18  ;;  %819 = vmatprep.subr.bf16.mxu1 %v885_v0 }
  0x59   :  { %717 = vmatprep.subr.bf16.mxu0 %v1024_v19 }
  0x5b   :  { %820 = vmatpush3.bf16.msra.mxu1 %v1030_v20 }
  0x5c   :  { %718 = vmatpush3.bf16.msra.mxu0 %v1037_v21  ;;  %821 = vmatprep.subr.bf16.mxu1 %v885_v0 }
  0x5d   :  { %719 = vmatprep.subr.bf16.mxu0 %v1046_v23 }
  0x5f   :  { %822 = vmatpush3.bf16.msra.mxu1 %v1052_v25 }
  0x60   :  { %720 = vmatpush3.bf16.msra.mxu0 %v1059_v26  ;;  %827 = vmatprep.subr.bf16.mxu1 %v885_v0 }
  0x61   :  { %736 = vmatprep.subr.bf16.mxu0 %v911_v1 }
  0x62   :  { %824 = vmatmul.mubr.bf16.vlgmr.msra.gmra.mxu1 %v881_v35 }
  0x63   :  { %442 = vmatmul.mubr.bf16.vlgmr.msra.gmra.mxu0 %v634_v36  ;;  %828 = vmatpush3.bf16.msra.mxu1 %v918_v2 }
  0x64   :  { %737 = vmatpush3.bf16.msra.mxu0 %v924_v3  ;;  %829 = vmatprep.subr.bf16.mxu1 %v885_v0 }
  0x65   :  { %738 = vmatprep.subr.bf16.mxu0 %v930_v4  ;;  %843 = vmatprep.mubr.msk.bf16.mxu1 %vm886_vm0, %v885_v0 }
  0x66   :  { %536 = vmatprep.mubr.bf16.mxu0 %v640_v38 }
  0x67   :  { %830 = vmatpush3.bf16.msra.mxu1 %v937_v5 }
  0x68   :  { %739 = vmatpush3.bf16.msra.mxu0 %v943_v6  ;;  %831 = vmatprep.subr.bf16.mxu1 %v885_v0 }
  0x69   :  { %740 = vmatprep.subr.bf16.mxu0 %v948_v7 }
  0x6b   :  { %832 = vmatpush3.bf16.msra.mxu1 %v954_v8 }
  0x6c   :  { %741 = vmatpush3.bf16.msra.mxu0 %v961_v9  ;;  %833 = vmatprep.subr.bf16.mxu1 %v885_v0 }
  0x6d   :  { %742 = vmatprep.subr.bf16.mxu0 %v967_v10 }
  0x6f   :  { %834 = vmatpush3.bf16.msra.mxu1 %v973_v11 }
  0x70   :  { %743 = vmatpush3.bf16.msra.mxu0 %v980_v12  ;;  %835 = vmatprep.subr.bf16.mxu1 %v885_v0 }
  0x71   :  { %744 = vmatprep.subr.bf16.mxu0 %v986_v13 }
  0x73   :  { %836 = vmatpush3.bf16.msra.mxu1 %v992_v14 }
  0x74   :  { %745 = vmatpush3.bf16.msra.mxu0 %v999_v15  ;;  %837 = vmatprep.subr.bf16.mxu1 %v885_v0 }
  0x75   :  { %746 = vmatprep.subr.bf16.mxu0 %v1005_v16 }
  0x77   :  { %838 = vmatpush3.bf16.msra.mxu1 %v1011_v17 }
  0x78   :  { %747 = vmatpush3.bf16.msra.mxu0 %v1018_v18  ;;  %839 = vmatprep.subr.bf16.mxu1 %v885_v0  ;;  %v642_v18 = vld [vmem:[%s1195_s2] ss:$0 sm:$0xff] }
  0x79   :  { %748 = vmatprep.subr.bf16.mxu0 %v1024_v19 }
  0x7b   :  { %840 = vmatpush3.bf16.msra.mxu1 %v1030_v20 }
  0x7c   :  { %749 = vmatpush3.bf16.msra.mxu0 %v1037_v21  ;;  %841 = vmatprep.subr.bf16.mxu1 %v885_v0 }
  0x7d   :  { %750 = vmatprep.subr.bf16.mxu0 %v1046_v23 }
  0x7f   :  { %842 = vmatpush3.bf16.msra.mxu1 %v1052_v25 }
  0x80   :  { %751 = vmatpush3.bf16.msra.mxu0 %v1059_v26 }
  0x82   :  { %844 = vmatmul.mubr.bf16.vlgmr.msra.gmra.mxu1 %v884_v39 }
  0x83   :  { %537 = vmatmul.mubr.bf16.vlgmr.msra.gmra.mxu0 %v639_v40 }
  0xe2   :  { %v294_v41 = vpop.f32.mrf.mxu1 }
  0xe3   :  { %v659_v42 = vpop.f32.mrf.mxu0 }
  0xe4   :  { %v785_v43 = vpop.f32.mrf.mxu1 }
  0xe5   :  { %v660_v44 = vpop.f32.mrf.mxu0 }
  0xe6   :  { %v661_v45 = vadd.f32 %v660_v44, %v659_v42  ;;  %v297_v46 = vpop.f32.mrf.mxu1 }
  0xe7   :  { %v662_v47 = vpop.f32.mrf.mxu0 }
  0xe8   :  { %v295_v48 = vadd.f32 %v661_v45, %v294_v41  ;;  %v786_v49 = vpop.f32.mrf.mxu1 }
  0xe9   :  { %v663_v50 = vpop.f32.mrf.mxu0 }
 0x102   :  { %v388_v51 = vpop.f32.mrf.mxu1 }
 0x103   :  { %v690_v52 = vpop.f32.mrf.mxu0 }
 0x104   :  { %v805_v53 = vpop.f32.mrf.mxu1 }
 0x105   :  { %v691_v54 = vpop.f32.mrf.mxu0 }
 0x106   :  { %v692_v55 = vadd.f32 %v691_v54, %v690_v52  ;;  %v391_v56 = vpop.f32.mrf.mxu1 }
 0x107   :  { %v693_v57 = vpop.f32.mrf.mxu0 }
 0x108   :  { %v389_v58 = vadd.f32 %v692_v55, %v388_v51  ;;  %v806_v59 = vpop.f32.mrf.mxu1 }
 0x109   :  { %v694_v60 = vpop.f32.mrf.mxu0 }
 0x10a   :  { %v394_v61 = vmax.f32 %v295_v48, %v389_v58 }
 0x122   :  { %v483_v62 = vpop.f32.mrf.mxu1 }
 0x123   :  { %v721_v63 = vpop.f32.mrf.mxu0 }
 0x124   :  { %v825_v0 = vpop.f32.mrf.mxu1 }
 0x125   :  { %v722_v1 = vpop.f32.mrf.mxu0 }
 0x126   :  { %v486_v2 = vpop.f32.mrf.mxu1  ;;  %v723_v6 = vadd.f32 %v722_v1, %v721_v63 }
 0x127   :  { %v724_v3 = vpop.f32.mrf.mxu0 }
 0x128   :  { %v826_v4 = vpop.f32.mrf.mxu1  ;;  %v484_v9 = vadd.f32 %v723_v6, %v483_v62 }
 0x129   :  { %v725_v5 = vpop.f32.mrf.mxu0 }
 0x12a   :  { %v489_v15 = vmax.f32 %v394_v61, %v484_v9 }
 0x142   :  { %v578_v7 = vpop.f32.mrf.mxu1 }
 0x143   :  { %v752_v8 = vpop.f32.mrf.mxu0 }
 0x144   :  { %v845_v10 = vpop.f32.mrf.mxu1 }
 0x145   :  { %v753_v11 = vpop.f32.mrf.mxu0 }
 0x146   :  { %v754_v12 = vadd.f32 %v753_v11, %v752_v8  ;;  %v581_v13 = vpop.f32.mrf.mxu1 }
 0x147   :  { %v755_v14 = vpop.f32.mrf.mxu0 }
 0x148   :  { %v579_v16 = vadd.f32 %v754_v12, %v578_v7  ;;  %v846_v17 = vpop.f32.mrf.mxu1 }
 0x149   :  { %v756_v19 = vpop.f32.mrf.mxu0 }
 0x14a   :  { %v584_v20 = vmax.f32 %v489_v15, %v579_v16 }
 0x14c   :  { %v592_v21 = vadd.f32 %v642_v18, %v584_v20 }
 0x14e   :  { %v593_v22 = vmax.f32 %v592_v21, 0.0 }
 0x150   :  { %v594_v23 = vpack.c.bf16 %v593_v22, %v593_v22 }
 0x152   :  { %595 = vst [vmem:[%s1196_s3] sm:$0xf] %v594_v23 }

// kernel: generator_forward.17
= control target key start
LH: loop header
LB: loop body
LE: loop exit
PB: predicated region body
PF: predicated region fallthrough
CT: control target
= control target key end

     0   :  { %s550_s12 = smov 0   ;;  %s596_s0 = inlined_call_operand.vmem [shape: bf16[4,8,256], index: 0, kind: input, shape index: {}]   ;;  %s597_s1 = inlined_call_operand.vmem [shape: bf16[4,256,128], index: 1, kind: input, shape index: {}]   ;;  %s598_s2 = inlined_call_operand.vmem [shape: f32[1,128], index: 2, kind: input, shape index: {}]   ;;  %s599_s3 = inlined_call_operand.vmem [shape: bf16[4,8,128], index: 3, kind: output, shape index: {}]  }
   0x1 LB: > { %s441_s13 = sadd.s32 4294967295, %s528_s12   ;;  %p445_p0 = scmp.ge.s32.totalorder %s528_s12, 1  ;;  %s528_s12 = sphi %s550_s12, %s13_s12  }
   0x2   : > { %p147_p1 = scmp.lt.s32.totalorder %s528_s12, 5 }
   0x4   : > { %p148_p2 = pnand %p445_p0, %p147_p1 }
   0x5   : > { %p175_p3 = scmp.lt.s32.totalorder (!%p148_p2), %s441_s13, 3 }
   0x6   : > { %151 = sbr.rel (%p148_p2) target bundleno = 251 (0xfb), region = 32 }
   0xb   : > { %s601_s13 = smov (!%p175_p3, %s441_s13), 3  ;;  %v451_v20 = vld [vmem:[%s598_s2] ss:$0 sm:$0xff] }
   0xc   : > { %s473_s14 = sshll.u32 %s601_s13, 7  ;;  %s472_s18 = sshll.u32 %s601_s13, 3 }
   0xd   : > { %s564_s17 = scalar_lea.vmem %s597_s1, %s473_s14  ;;  %s179_s21 = scalar_lea.vmem %s596_s0, %s472_s18 }
   0xe   : > { %v504_v0 = vld [vmem:[%s564_s17 + $0x78] sm:$0xff]   ;;  %v506_v2 = vld [vmem:[%s564_s17 + $0x70] sm:$0xff]   ;;  %v508_v4 = vld [vmem:[%s564_s17 + $0x68] sm:$0xff]   ;;  %s450_s24 = sshll.u32 %s601_s13, 2 }
   0xf   : > { %v505_v1 = vld [vmem:[%s564_s17 + $0x38] sm:$0xff]   ;;  %474 = vmatprep.subr.bf16.mxu0 %v504_v0  ;;  %v507_v3 = vld [vmem:[%s564_s17 + $0x30] sm:$0xff]   ;;  %v509_v5 = vld [vmem:[%s564_s17 + $0x28] sm:$0xff]   ;;  %s188_s27 = scalar_lea.vmem %s599_s3, %s450_s24 }
  0x10   : > { %475 = vmatpush3.bf16.msra.mxu0 %v505_v1  ;;  %v510_v6 = vld [vmem:[%s564_s17 + $0x60] sm:$0xff]   ;;  %v512_v8 = vld [vmem:[%s564_s17 + $0x58] sm:$0xff]   ;;  %v514_v10 = vld [vmem:[%s564_s17 + $0x50] sm:$0xff]  }
  0x11   : > { %476 = vmatprep.subr.bf16.mxu0 %v506_v2  ;;  %v511_v7 = vld [vmem:[%s564_s17 + $0x20] sm:$0xff]   ;;  %v513_v9 = vld [vmem:[%s564_s17 + $0x18] sm:$0xff]   ;;  %v515_v13 = vld [vmem:[%s564_s17 + $0x10] sm:$0xff]  }
  0x12   : > { %v190_v11 = vld [vmem:[%s179_s21] sm:$0xff]  ;;  %v516_v14 = vld [vmem:[%s564_s17 + $0x48] sm:$0xff]  }
  0x13   : > { %v453_v12 = vcombine.high %v190_v11, %v190_v11  ;;  %v517_v15 = vld [vmem:[%s564_s17 + $0x8] sm:$0xff]   ;;  %v518_v16 = vld [vmem:[%s564_s17 + $0x40] sm:$0xff]   ;;  %v452_v18 = vcombine.low %v190_v11, %v190_v11 }
  0x14   : > { %477 = vmatpush3.bf16.msra.mxu0 %v507_v3  ;;  %v519_v17 = vld [vmem:[%s564_s17] sm:$0xff]  }
  0x15   : > { %478 = vmatprep.subr.bf16.mxu0 %v508_v4  ;;  %365 = vmatprep.mubr.bf16.mxu0 %v453_v12 }
  0x18   : > { %479 = vmatpush3.bf16.msra.mxu0 %v509_v5 }
  0x19   : > { %480 = vmatprep.subr.bf16.mxu0 %v510_v6 }
  0x1c   : > { %481 = vmatpush3.bf16.msra.mxu0 %v511_v7 }
  0x1d   : > { %482 = vmatprep.subr.bf16.mxu0 %v512_v8 }
  0x20   : > { %483 = vmatpush3.bf16.msra.mxu0 %v513_v9 }
  0x21   : > { %484 = vmatprep.subr.bf16.mxu0 %v514_v10 }
  0x24   : > { %485 = vmatpush3.bf16.msra.mxu0 %v515_v13 }
  0x25   : > { %486 = vmatprep.subr.bf16.mxu0 %v516_v14 }
  0x28   : > { %487 = vmatpush3.bf16.msra.mxu0 %v517_v15 }
  0x29   : > { %488 = vmatprep.subr.bf16.mxu0 %v518_v16 }
  0x2c   : > { %489 = vmatpush3.bf16.msra.mxu0 %v519_v17 }
  0x2f   : > { %366 = vmatmul.mubr.bf16.vlgmr.msra.gmra.mxu0 %v452_v18 }
  0xef   : > { %v490_v19 = vpop.f32.mrf.mxu0 }
  0xf1   : > { %v491_v21 = vpop.f32.mrf.mxu0 }
  0xf2   : > { %v492_v22 = vadd.f32 %v491_v21, %v490_v19 }
  0xf3   : > { %v493_v23 = vpop.f32.mrf.mxu0 }
  0xf4   : > { %v368_v24 = vadd.f32 %v492_v22, %v451_v20 }
  0xf5   : > { %v494_v25 = vpop.f32.mrf.mxu0 }
  0xf6   : > { %v373_v26 = vmax.f32 %v368_v24, 0.0 }
  0xf8   : > { %v374_v27 = vpack.c.bf16 %v373_v26, %v373_v26 }
  0xfa   : > { %375 = vst [vmem:[%s188_s27] sm:$0xf] %v374_v27 }
  0xfb PF: > { %s13_s12 = sadd.s32 1, %s528_s12  }
  0xfc   : > { %p10_p4 = scmp.ge.s32.totalorder %s13_s12, 6  }
  0xfe   :  { %12 = sbr.rel (!%p10_p4) target bundleno = 1 (0x1), region = 65 }

// kernel: generator_forward.18
= control target key start
LH: loop header
LB: loop body
LE: loop exit
PB: predicated region body
PF: predicated region fallthrough
CT: control target
= control target key end

     0   :  { %s541_s12 = smov 0   ;;  %s572_s0 = inlined_call_operand.vmem [shape: bf16[4,32,128], index: 0, kind: input, shape index: {}]   ;;  %s573_s1 = inlined_call_operand.vmem [shape: bf16[4,128,128], index: 1, kind: input, shape index: {}]   ;;  %s574_s2 = inlined_call_operand.vmem [shape: f32[1,128], index: 2, kind: input, shape index: {}]   ;;  %s575_s3 = inlined_call_operand.vmem [shape: bf16[4,32,128], index: 3, kind: output, shape index: {}]  }
   0x1 LB: > { %s419_s13 = sadd.s32 4294967295, %s519_s12   ;;  %p423_p0 = scmp.ge.s32.totalorder %s519_s12, 1  ;;  %s519_s12 = sphi %s541_s12, %s13_s12  }
   0x2   : > { %p147_p1 = scmp.lt.s32.totalorder %s519_s12, 5 }
   0x4   : > { %p148_p2 = pnand %p423_p0, %p147_p1 }
   0x5   : > { %p176_p3 = scmp.lt.s32.totalorder (!%p148_p2), %s419_s13, 3 }
   0x6   : > { %151 = sbr.rel (%p148_p2) target bundleno = 253 (0xfd), region = 32 }
   0xb   : > { %s577_s13 = smov (!%p176_p3, %s419_s13), 3  ;;  %v430_v11 = vld [vmem:[%s574_s2] ss:$0 sm:$0xff] }
   0xc   : > { %s448_s14 = sshll.u32 %s577_s13, 6  ;;  %s447_s18 = sshll.u32 %s577_s13, 4 }
   0xd   : > { %s185_s17 = scalar_lea.vmem %s573_s1, %s448_s14  ;;  %s180_s21 = scalar_lea.vmem %s572_s0, %s447_s18 }
   0xe   : > { %v503_v0 = vld [vmem:[%s185_s17 + $0x38] sm:$0xff]   ;;  %v504_v1 = vld [vmem:[%s185_s17 + $0x30] sm:$0xff]   ;;  %v505_v2 = vld [vmem:[%s185_s17 + $0x28] sm:$0xff]   ;;  %s190_s26 = scalar_lea.vmem %s575_s3, %s447_s18 }
   0xf   : > { %475 = vmatprep.subr.bf16.mxu0 %v503_v0  ;;  %v506_v3 = vld [vmem:[%s185_s17 + $0x20] sm:$0xff]   ;;  %v507_v5 = vld [vmem:[%s185_s17 + $0x18] sm:$0xff]   ;;  %v508_v6 = vld [vmem:[%s185_s17 + $0x10] sm:$0xff]  }
  0x10   : > { %476 = vmatpush3.bf16.msra.mxu0 %v503_v0  ;;  %v511_v4 = vld [vmem:[%s180_s21] sm:$0xff]   ;;  %v509_v7 = vld [vmem:[%s185_s17 + $0x8] sm:$0xff]  }
  0x11   : > { %477 = vmatprep.subr.bf16.mxu0 %v504_v1  ;;  %491 = vmatprep.mubr.bf16.mxu0 %v511_v4  ;;  %v510_v8 = vld [vmem:[%s185_s17] sm:$0xff]   ;;  %v512_v9 = vld [vmem:[%s180_s21 + $0x8] sm:$0xff]  }
  0x14   : > { %478 = vmatpush3.bf16.msra.mxu0 %v504_v1 }
  0x15   : > { %479 = vmatprep.subr.bf16.mxu0 %v505_v2 }
  0x18   : > { %480 = vmatpush3.bf16.msra.mxu0 %v505_v2 }
  0x19   : > { %481 = vmatprep.subr.bf16.mxu0 %v506_v3 }
  0x1c   : > { %482 = vmatpush3.bf16.msra.mxu0 %v506_v3 }
  0x1d   : > { %483 = vmatprep.subr.bf16.mxu0 %v507_v5 }
  0x20   : > { %484 = vmatpush3.bf16.msra.mxu0 %v507_v5 }
  0x21   : > { %485 = vmatprep.subr.bf16.mxu0 %v508_v6 }
  0x24   : > { %486 = vmatpush3.bf16.msra.mxu0 %v508_v6 }
  0x25   : > { %487 = vmatprep.subr.bf16.mxu0 %v509_v7 }
  0x28   : > { %488 = vmatpush3.bf16.msra.mxu0 %v509_v7 }
  0x29   : > { %489 = vmatprep.subr.bf16.mxu0 %v510_v8 }
  0x2c   : > { %490 = vmatpush3.bf16.msra.mxu0 %v510_v8 }
  0x2f   : > { %492 = vmatmul.mubr.bf16.vlgmr.msra.gmra.mxu0 %v512_v9 }
  0xef   : > { %v493_v10 = vpop.f32.mrf.mxu0 }
  0xf0   : > { %v322_v13 = vadd.f32 %v493_v10, %v430_v11 }
  0xf1   : > { %v313_v12 = vpop.f32.mrf.mxu0 }
  0xf2   : > { %v314_v15 = vadd.f32 %v430_v11, %v313_v12  ;;  %v330_v18 = vmax.f32 %v322_v13, 0.0 }
  0xf3   : > { %v494_v14 = vpop.f32.mrf.mxu0 }
  0xf4   : > { %v325_v16 = vadd.f32 %v494_v14, %v430_v11  ;;  %v328_v21 = vmax.f32 %v314_v15, 0.0 }
  0xf5   : > { %v316_v17 = vpop.f32.mrf.mxu0 }
  0xf6   : > { %v331_v19 = vmax.f32 %v325_v16, 0.0  ;;  %v317_v20 = vadd.f32 %v430_v11, %v316_v17 }
  0xf8   : > { %v462_v22 = vpack.c.bf16 %v331_v19, %v330_v18  ;;  %v329_v23 = vmax.f32 %v317_v20, 0.0 }
  0xfa   : > { %464 = vst [vmem:[%s190_s26 + $0x8] sm:$0xff] %v462_v22   ;;  %v457_v24 = vpack.c.bf16 %v329_v23, %v328_v21 }
  0xfc   : > { %458 = vst [vmem:[%s190_s26] sm:$0xff] %v457_v24  }
  0xfd PF: > { %s13_s12 = sadd.s32 1, %s519_s12  }
  0xfe   : > { %p10_p4 = scmp.ge.s32.totalorder %s13_s12, 6  }
 0x100   :  { %12 = sbr.rel (!%p10_p4) target bundleno = 1 (0x1), region = 65 }

// kernel: generator_forward.19
= control target key start
LH: loop header
LB: loop body
LE: loop exit
PB: predicated region body
PF: predicated region fallthrough
CT: control target
= control target key end

     0   :  { %s816_s12 = smov 0   ;;  %s899_s0 = inlined_call_operand.vmem [shape: bf16[4,128,128], index: 0, kind: input, shape index: {}]   ;;  %s900_s1 = inlined_call_operand.vmem [shape: bf16[4,128,128], index: 1, kind: input, shape index: {}]   ;;  %s901_s2 = inlined_call_operand.vmem [shape: f32[1,128], index: 2, kind: input, shape index: {}]   ;;  %s902_s3 = inlined_call_operand.vmem [shape: f32[4,128,128], index: 3, kind: output, shape index: {}]  }
   0x1 LB: > { %s603_s13 = sadd.s32 4294967295, %s794_s12   ;;  %p607_p0 = scmp.ge.s32.totalorder %s794_s12, 1  ;;  %s794_s12 = sphi %s816_s12, %s13_s12  }
   0x2   : > { %p147_p1 = scmp.lt.s32.totalorder %s794_s12, 5 }
   0x4   : > { %p148_p2 = pnand %p607_p0, %p147_p1 }
   0x5   : > { %p176_p3 = scmp.lt.s32.totalorder (!%p148_p2), %s603_s13, 3 }
   0x6   : > { %151 = sbr.rel (%p148_p2) target bundleno = 297 (0x129), region = 32 }
   0xb   : > { %s904_s13 = smov (!%p176_p3, %s603_s13), 3  ;;  %v856_v16 = vld [vmem:[%s901_s2] ss:$0 sm:$0xff] }
   0xc   : > { %s633_s14 = sshll.u32 %s904_s13, 6  ;;  %s635_s23 = sshll.u32 %s904_s13, 7 }
   0xd   : > { %s830_s17 = scalar_lea.vmem %s900_s1, %s633_s14  ;;  %s838_s20 = scalar_lea.vmem %s899_s0, %s633_s14 }
   0xe   : > { %v708_v0 = vld [vmem:[%s830_s17 + $0x38] sm:$0xff]   ;;  %v709_v1 = vld [vmem:[%s830_s17 + $0x30] sm:$0xff]   ;;  %v710_v2 = vld [vmem:[%s830_s17 + $0x28] sm:$0xff]   ;;  %s878_s26 = scalar_lea.vmem %s902_s3, %s635_s23 }
   0xf   : > { %652 = vmatprep.subr.bf16.mxu0 %v708_v0  ;;  %684 = vmatprep.subr.bf16.mxu1 %v708_v0  ;;  %v711_v3 = vld [vmem:[%s830_s17 + $0x20] sm:$0xff]   ;;  %v712_v6 = vld [vmem:[%s830_s17 + $0x18] sm:$0xff]   ;;  %v713_v7 = vld [vmem:[%s830_s17 + $0x10] sm:$0xff]  }
  0x10   : > { %653 = vmatpush3.bf16.msra.mxu0 %v708_v0  ;;  %692 = vmatpush3.bf16.msra.mxu1 %v708_v0  ;;  %v716_v4 = vld [vmem:[%s838_s20] sm:$0xff]   ;;  %v714_v8 = vld [vmem:[%s830_s17 + $0x8] sm:$0xff]   ;;  %v720_v12 = vld [vmem:[%s838_s20 + $0x10] sm:$0xff]  }
  0x11   : > { %654 = vmatprep.subr.bf16.mxu0 %v709_v1  ;;  %685 = vmatprep.subr.bf16.mxu1 %v709_v1  ;;  %v717_v5 = vld [vmem:[%s838_s20 + $0x20] sm:$0xff]   ;;  %v718_v10 = vld [vmem:[%s838_s20 + $0x8] sm:$0xff]   ;;  %v721_v13 = vld [vmem:[%s838_s20 + $0x30] sm:$0xff]  }
  0x12   : > { %668 = vmatprep.mubr.bf16.mxu0 %v716_v4  ;;  %676 = vmatprep.mubr.bf16.mxu1 %v717_v5  ;;  %v715_v9 = vld [vmem:[%s830_s17] sm:$0xff]   ;;  %v719_v11 = vld [vmem:[%s838_s20 + $0x28] sm:$0xff]   ;;  %v722_v14 = vld [vmem:[%s838_s20 + $0x18] sm:$0xff]  }
  0x13   : > { %v723_v15 = vld [vmem:[%s838_s20 + $0x38] sm:$0xff]  }
  0x14   : > { %655 = vmatpush3.bf16.msra.mxu0 %v709_v1  ;;  %693 = vmatpush3.bf16.msra.mxu1 %v709_v1 }
  0x15   : > { %656 = vmatprep.subr.bf16.mxu0 %v710_v2  ;;  %686 = vmatprep.subr.bf16.mxu1 %v710_v2 }
  0x18   : > { %657 = vmatpush3.bf16.msra.mxu0 %v710_v2  ;;  %694 = vmatpush3.bf16.msra.mxu1 %v710_v2 }
  0x19   : > { %658 = vmatprep.subr.bf16.mxu0 %v711_v3  ;;  %687 = vmatprep.subr.bf16.mxu1 %v711_v3 }
  0x1c   : > { %659 = vmatpush3.bf16.msra.mxu0 %v711_v3  ;;  %695 = vmatpush3.bf16.msra.mxu1 %v711_v3 }
  0x1d   : > { %660 = vmatprep.subr.bf16.mxu0 %v712_v6  ;;  %688 = vmatprep.subr.bf16.mxu1 %v712_v6 }
  0x20   : > { %661 = vmatpush3.bf16.msra.mxu0 %v712_v6  ;;  %696 = vmatpush3.bf16.msra.mxu1 %v712_v6 }
  0x21   : > { %662 = vmatprep.subr.bf16.mxu0 %v713_v7  ;;  %689 = vmatprep.subr.bf16.mxu1 %v713_v7 }
  0x24   : > { %663 = vmatpush3.bf16.msra.mxu0 %v713_v7  ;;  %697 = vmatpush3.bf16.msra.mxu1 %v713_v7 }
  0x25   : > { %664 = vmatprep.subr.bf16.mxu0 %v714_v8  ;;  %690 = vmatprep.subr.bf16.mxu1 %v714_v8 }
  0x28   : > { %665 = vmatpush3.bf16.msra.mxu0 %v714_v8  ;;  %698 = vmatpush3.bf16.msra.mxu1 %v714_v8 }
  0x29   : > { %666 = vmatprep.subr.bf16.mxu0 %v715_v9  ;;  %691 = vmatprep.subr.bf16.mxu1 %v715_v9 }
  0x2c   : > { %667 = vmatpush3.bf16.msra.mxu0 %v715_v9  ;;  %699 = vmatpush3.bf16.msra.mxu1 %v715_v9 }
  0x2f   : > { %669 = vmatmul.mubr.bf16.vlgmr.msra.gmra.mxu0 %v718_v10  ;;  %677 = vmatmul.mubr.bf16.vlgmr.msra.gmra.mxu1 %v719_v11 }
  0x30   : > { %672 = vmatprep.mubr.bf16.mxu0 %v720_v12  ;;  %680 = vmatprep.mubr.bf16.mxu1 %v721_v13 }
  0x37   : > { %673 = vmatmul.mubr.bf16.gmra.mxu0 %v722_v14  ;;  %681 = vmatmul.mubr.bf16.gmra.mxu1 %v723_v15 }
  0xef   : > { %v670_v17 = vpop.f32.mrf.mxu0  ;;  %v678_v18 = vpop.f32.mrf.mxu1 }
  0xf0   : > { %v370_v19 = vadd.f32 %v670_v17, %v856_v16  ;;  %v402_v20 = vadd.f32 %v678_v18, %v856_v16 }
  0xf1   : > { %v361_v21 = vpop.f32.mrf.mxu0  ;;  %v393_v22 = vpop.f32.mrf.mxu1 }
  0xf2   : > { %v426_v23 = vsub.f32 0.0, %v370_v19  ;;  %v434_v24 = vsub.f32 0.0, %v402_v20  ;;  %v362_v25 = vadd.f32 %v856_v16, %v361_v21  ;;  %v394_v26 = vadd.f32 %v856_v16, %v393_v22 }
  0xf3   : > { %v671_v27 = vpop.f32.mrf.mxu0  ;;  %v679_v28 = vpop.f32.mrf.mxu1 }
  0xf4   : > { %v444_v29 = vmul.f32 1.442695, %v426_v23  ;;  %v460_v30 = vmul.f32 1.442695, %v434_v24  ;;  %v424_v31 = vsub.f32 0.0, %v362_v25  ;;  %v432_v32 = vsub.f32 0.0, %v394_v26 }
  0xf5   : > { %v373_v33 = vadd.f32 %v671_v27, %v856_v16  ;;  %v405_v34 = vadd.f32 %v679_v28, %v856_v16  ;;  %v364_v35 = vpop.f32.mrf.mxu0  ;;  %v396_v36 = vpop.f32.mrf.mxu1 }
  0xf6   : > { %724 = vpow2.f32 %v444_v29  ;;  %v440_v37 = vmul.f32 1.442695, %v424_v31  ;;  %v456_v38 = vmul.f32 1.442695, %v432_v32  ;;  %v365_v39 = vadd.f32 %v856_v16, %v364_v35 }
  0xf7   : > { %726 = vpow2.f32 %v460_v30  ;;  %v427_v40 = vsub.f32 0.0, %v373_v33  ;;  %v435_v41 = vsub.f32 0.0, %v405_v34  ;;  %v397_v42 = vadd.f32 %v856_v16, %v396_v36  ;;  %v674_v43 = vpop.f32.mrf.mxu0  ;;  %v682_v44 = vpop.f32.mrf.mxu1 }
  0xf8   : > { %728 = vpow2.f32 %v440_v37  ;;  %v425_v45 = vsub.f32 0.0, %v365_v39  ;;  %v386_v46 = vadd.f32 %v674_v43, %v856_v16  ;;  %v418_v47 = vadd.f32 %v682_v44, %v856_v16 }
  0xf9   : > { %730 = vpow2.f32 %v456_v38  ;;  %v446_v48 = vmul.f32 1.442695, %v427_v40  ;;  %v462_v49 = vmul.f32 1.442695, %v435_v41  ;;  %v433_v50 = vsub.f32 0.0, %v397_v42  ;;  %v377_v51 = vpop.f32.mrf.mxu0  ;;  %v409_v52 = vpop.f32.mrf.mxu1 }
  0xfa   : > { %v442_v53 = vmul.f32 1.442695, %v425_v45  ;;  %v430_v54 = vsub.f32 0.0, %v386_v46  ;;  %v438_v55 = vsub.f32 0.0, %v418_v47  ;;  %v378_v56 = vadd.f32 %v856_v16, %v377_v51 }
  0xfb   : > { %732 = vpow2.f32 %v446_v48  ;;  %v458_v57 = vmul.f32 1.442695, %v433_v50  ;;  %v410_v58 = vadd.f32 %v856_v16, %v409_v52  ;;  %v675_v59 = vpop.f32.mrf.mxu0  ;;  %v683_v60 = vpop.f32.mrf.mxu1 }
  0xfc   : > { %734 = vpow2.f32 %v462_v49  ;;  %v452_v61 = vmul.f32 1.442695, %v430_v54  ;;  %v468_v62 = vmul.f32 1.442695, %v438_v55  ;;  %v428_v63 = vsub.f32 0.0, %v378_v56 }
  0xfd   : > { %736 = vpow2.f32 %v442_v53  ;;  %v436_v0 = vsub.f32 0.0, %v410_v58  ;;  %v389_v1 = vadd.f32 %v675_v59, %v856_v16  ;;  %v421_v2 = vadd.f32 %v683_v60, %v856_v16  ;;  %v380_v3 = vpop.f32.mrf.mxu0  ;;  %v412_v4 = vpop.f32.mrf.mxu1 }
  0xfe   : > { %738 = vpow2.f32 %v458_v57  ;;  %v448_v5 = vmul.f32 1.442695, %v428_v63  ;;  %v381_v6 = vadd.f32 %v856_v16, %v380_v3  ;;  %v413_v7 = vadd.f32 %v856_v16, %v412_v4 }
  0xff   : > { %740 = vpow2.f32 %v452_v61  ;;  %v464_v8 = vmul.f32 1.442695, %v436_v0  ;;  %v431_v9 = vsub.f32 0.0, %v389_v1  ;;  %v439_v10 = vsub.f32 0.0, %v421_v2 }
 0x100   : > { %742 = vpow2.f32 %v468_v62  ;;  %v429_v11 = vsub.f32 0.0, %v381_v6  ;;  %v437_v15 = vsub.f32 0.0, %v413_v7 }
 0x101   : > { %744 = vpow2.f32 %v448_v5  ;;  %v454_v12 = vmul.f32 1.442695, %v431_v9  ;;  %v470_v13 = vmul.f32 1.442695, %v439_v10 }
 0x102   : > { %746 = vpow2.f32 %v464_v8  ;;  %v450_v14 = vmul.f32 1.442695, %v429_v11  ;;  %v466_v23 = vmul.f32 1.442695, %v437_v15 }
 0x103   : > { %v725_v17 = vpop.eup %724  ;;  %748 = vpow2.f32 %v454_v12 }
 0x104   : > { %v727_v18 = vpop.eup %726  ;;  %v474_v19 = vadd.f32 1.0, %v725_v17  ;;  %750 = vpow2.f32 %v470_v13 }
 0x105   : > { %v729_v20 = vpop.eup %728  ;;  %v482_v21 = vadd.f32 1.0, %v727_v18  ;;  %752 = vpow2.f32 %v450_v14 }
 0x106   : > { %v731_v16 = vpop.eup %730  ;;  %754 = vrcp.f32 %v474_v19  ;;  %v472_v22 = vadd.f32 1.0, %v729_v20 }
 0x107   : > { %756 = vrcp.f32 %v482_v21  ;;  %v480_v24 = vadd.f32 1.0, %v731_v16 }
 0x108   : > { %v733_v25 = vpop.eup %732  ;;  %758 = vrcp.f32 %v472_v22 }
 0x109   : > { %v735_v26 = vpop.eup %734  ;;  %760 = vrcp.f32 %v480_v24  ;;  %v475_v27 = vadd.f32 1.0, %v733_v25 }
 0x10a   : > { %v737_v28 = vpop.eup %736  ;;  %v483_v29 = vadd.f32 1.0, %v735_v26  ;;  %762 = vpow2.f32 %v466_v23 }
 0x10b   : > { %v739_v30 = vpop.eup %738  ;;  %764 = vrcp.f32 %v475_v27  ;;  %v473_v31 = vadd.f32 1.0, %v737_v28 }
 0x10c   : > { %v741_v32 = vpop.eup %740  ;;  %766 = vrcp.f32 %v483_v29  ;;  %v481_v33 = vadd.f32 1.0, %v739_v30 }
 0x10d   : > { %v743_v34 = vpop.eup %742  ;;  %768 = vrcp.f32 %v473_v31  ;;  %v478_v35 = vadd.f32 1.0, %v741_v32 }
 0x10e   : > { %v745_v36 = vpop.eup %744  ;;  %770 = vrcp.f32 %v481_v33  ;;  %v486_v37 = vadd.f32 1.0, %v743_v34 }
 0x10f   : > { %v747_v38 = vpop.eup %746  ;;  %772 = vrcp.f32 %v478_v35  ;;  %v476_v39 = vadd.f32 1.0, %v745_v36 }
 0x110   : > { %v749_v40 = vpop.eup %748  ;;  %774 = vrcp.f32 %v486_v37  ;;  %v484_v41 = vadd.f32 1.0, %v747_v38 }
 0x111   : > { %v751_v42 = vpop.eup %750  ;;  %776 = vrcp.f32 %v476_v39  ;;  %v479_v43 = vadd.f32 1.0, %v749_v40 }
 0x112   : > { %v753_v44 = vpop.eup %752  ;;  %778 = vrcp.f32 %v484_v41  ;;  %v487_v45 = vadd.f32 1.0, %v751_v42 }
 0x113   : > { %v755_v46 = vpop.eup %754  ;;  %780 = vrcp.f32 %v479_v43  ;;  %v477_v47 = vadd.f32 1.0, %v753_v44 }
 0x114   : > { %v757_v48 = vpop.eup %756  ;;  %522 = vst [vmem:[%s878_s26 + $0x10] sm:$0xff] %v755_v46  ;;  %782 = vrcp.f32 %v487_v45 }
 0x115   : > { %v759_v49 = vpop.eup %758  ;;  %530 = vst [vmem:[%s878_s26 + $0x50] sm:$0xff] %v757_v48  ;;  %784 = vrcp.f32 %v477_v47 }
 0x116   : > { %v761_v50 = vpop.eup %760  ;;  %520 = vst [vmem:[%s878_s26] sm:$0xff] %v759_v49 }
 0x117   : > { %v763_v51 = vpop.eup %762  ;;  %528 = vst [vmem:[%s878_s26 + $0x40] sm:$0xff] %v761_v50 }
 0x118   : > { %v765_v52 = vpop.eup %764  ;;  %v485_v53 = vadd.f32 1.0, %v763_v51 }
 0x119   : > { %v767_v54 = vpop.eup %766  ;;  %523 = vst [vmem:[%s878_s26 + $0x18] sm:$0xff] %v765_v52 }
 0x11a   : > { %v769_v55 = vpop.eup %768  ;;  %531 = vst [vmem:[%s878_s26 + $0x58] sm:$0xff] %v767_v54  ;;  %786 = vrcp.f32 %v485_v53 }
 0x11b   : > { %v771_v56 = vpop.eup %770  ;;  %521 = vst [vmem:[%s878_s26 + $0x8] sm:$0xff] %v769_v55 }
 0x11c   : > { %v773_v57 = vpop.eup %772  ;;  %529 = vst [vmem:[%s878_s26 + $0x48] sm:$0xff] %v771_v56 }
 0x11d   : > { %v775_v58 = vpop.eup %774  ;;  %526 = vst [vmem:[%s878_s26 + $0x30] sm:$0xff] %v773_v57 }
 0x11e   : > { %v777_v59 = vpop.eup %776  ;;  %534 = vst [vmem:[%s878_s26 + $0x70] sm:$0xff] %v775_v58 }
 0x11f   : > { %v779_v60 = vpop.eup %778  ;;  %524 = vst [vmem:[%s878_s26 + $0x20] sm:$0xff] %v777_v59 }
 0x120   : > { %v781_v61 = vpop.eup %780  ;;  %532 = vst [vmem:[%s878_s26 + $0x60] sm:$0xff] %v779_v60 }
 0x121   : > { %v783_v62 = vpop.eup %782  ;;  %527 = vst [vmem:[%s878_s26 + $0x38] sm:$0xff] %v781_v61 }
 0x122   : > { %v785_v63 = vpop.eup %784  ;;  %535 = vst [vmem:[%s878_s26 + $0x78] sm:$0xff] %v783_v62 }
 0x123   : > { %525 = vst [vmem:[%s878_s26 + $0x28] sm:$0xff] %v785_v63 }
 0x127   : > { %v787_v0 = vpop.eup %786 }
 0x128   : > { %533 = vst [vmem:[%s878_s26 + $0x68] sm:$0xff] %v787_v0 }
 0x129 PF: > { %s13_s12 = sadd.s32 1, %s794_s12  }
 0x12a   : > { %p10_p4 = scmp.ge.s32.totalorder %s13_s12, 6  }
 0x12c   :  { %12 = sbr.rel (!%p10_p4) target bundleno = 1 (0x1), region = 65 }

</bundles_post_ra>
